<compile_context>
chip_gen: v6e
topology: v6e:2x2x1
jax: 0.10.0
libtpu: 0.0.40
codegen_flags: <defaults>
</compile_context>

<pallas_src>
import math
from functools import partial

import jax
import jax.numpy as jnp
from jax.experimental import pallas as pl
from jax.experimental.pallas import tpu as pltpu


# ---------------------------------------------------------------------------
# The single fused kernel, one grid step per batch element.
# Kernel view of activations is (S, Ep) with Ep lane-dense (padded to 128).
# ---------------------------------------------------------------------------

def _vid2vid_kernel(
    x_ref,      # (S, Ep)        flattened src + tokens, zero-padded lanes
    pos_ref,    # (S, Ep)        sinusoidal PE (padded)
    wq_ref,     # (L, H, Ep, Dh) bf16, 1/sqrt(Dh) folded in
    wk_ref,     # (L, H, Ep, Dh) bf16
    wv_ref,     # (L, H, Ep, Dh) bf16
    bq_ref,     # (L, H, 1, Dh)  f32, scaled
    bk_ref,     # (L, H, 1, Dh)  f32
    bv_ref,     # (L, H, 1, Dh)  f32
    wout_ref,   # (L, E, Ep)     bf16 (E = H*Dh true width, output cols padded)
    bout_ref,   # (L, 1, Ep)     f32
    g1_ref,     # (L, 1, Ep)     norm1 gamma (padded with zeros)
    b1_ref,     # (L, 1, Ep)     norm1 beta
    wff1_ref,   # (L, Ep, F)     bf16 (input rows padded with zeros)
    bff1_ref,   # (L, 1, F)      f32
    wff2_ref,   # (L, F, Ep)     bf16 (output cols padded with zeros)
    bff2_ref,   # (L, 1, Ep)     f32
    g2_ref,     # (L, 1, Ep)
    b2_ref,     # (L, 1, Ep)
    genw_ref,   # (Ep, Ep)       bf16
    genb_ref,   # (1, Ep)        f32
    o_ref,      # (S, Ep)        output (lane-dense stores)
    *, nhead, e_true, eps,
):
    S, Ep = x_ref.shape
    L, H, _, Dh = wq_ref.shape
    f32 = jnp.float32
    bf16 = jnp.bfloat16

    # Positional encoding fused in; padded lanes of x and pos are both zero.
    x = x_ref[...] + pos_ref[...]                       # (S, Ep) f32

    # Lane-validity mask for LayerNorm over the *true* feature width.
    if e_true != Ep:
        lane = jax.lax.broadcasted_iota(jnp.int32, (1, Ep), 1)
        valid = (lane < e_true).astype(f32)
    else:
        valid = None
    inv_e = 1.0 / float(e_true)

    def layer_norm(y, g, b):
        mu = jnp.sum(y, axis=-1, keepdims=True) * inv_e
        d = y - mu
        d2 = d * d if valid is None else d * d * valid
        var = jnp.sum(d2, axis=-1, keepdims=True) * inv_e
        # padded lanes: g = b = 0  ->  output stays exactly zero there
        return d * jax.lax.rsqrt(var + eps) * g + b

    for l in range(L):                                  # static unroll
        xb = x.astype(bf16)                             # MXU operand

        # --- self attention (per-head weights: no lane slicing of acts) -----
        attn = bout_ref[l]                              # (1, Ep), broadcasts
        for h in range(nhead):                          # static unroll
            q = jnp.dot(xb, wq_ref[l, h], preferred_element_type=f32) + bq_ref[l, h]
            k = jnp.dot(xb, wk_ref[l, h], preferred_element_type=f32) + bk_ref[l, h]
            v = jnp.dot(xb, wv_ref[l, h], preferred_element_type=f32) + bv_ref[l, h]

            # scores = (q * 1/sqrt(Dh)) @ k^T  (scale folded into wq/bq)
            s = jax.lax.dot_general(q, k, (((1,), (1,)), ((), ())),
                                    preferred_element_type=f32)    # (S, S)
            m = jnp.max(s, axis=-1, keepdims=True)
            p = jnp.exp(s - m)
            p = p / jnp.sum(p, axis=-1, keepdims=True)              # exact
            ctx = jnp.dot(p, v, preferred_element_type=f32)         # (S, Dh)

            # out-projection folded per head; weight slice is sublane-aligned
            attn = attn + jnp.dot(ctx.astype(bf16),
                                  wout_ref[l, h * Dh:(h + 1) * Dh, :],
                                  preferred_element_type=f32)       # (S, Ep)

        # --- add & norm 1 ---------------------------------------------------
        x = layer_norm(x + attn, g1_ref[l], b1_ref[l])

        # --- FFN (ReLU) + add & norm 2 ---------------------------------------
        hid = jnp.dot(x.astype(bf16), wff1_ref[l], preferred_element_type=f32)
        hid = jnp.maximum(hid + bff1_ref[l], 0.0)
        ffn = jnp.dot(hid.astype(bf16), wff2_ref[l], preferred_element_type=f32)
        x = layer_norm(x + ffn + bff2_ref[l], g2_ref[l], b2_ref[l])

    # --- generator linear ----------------------------------------------------
    o_ref[...] = (jnp.dot(x.astype(bf16), genw_ref[...],
                          preferred_element_type=f32) + genb_ref[...])


# ---------------------------------------------------------------------------
# pallas_call wrapper
# ---------------------------------------------------------------------------

def _rep_spec(a):
    """Whole-array block, replicated across the batch grid axis."""
    nd = a.ndim
    return pl.BlockSpec(a.shape, lambda b, nd=nd: (0,) * nd)


def _cost_estimate(bs, S, Ep, F, L, H, Dh, bytes_in, bytes_out):
    mm = lambda m, k, n: 2 * m * k * n
    per_layer = (
        3 * H * mm(S, Ep, Dh)                               # per-head Q/K/V
        + H * (mm(S, Dh, S) + mm(S, S, Dh) + mm(S, Dh, Ep)) # attn + out-proj
        + mm(S, Ep, F) + mm(S, F, Ep)                       # FFN
    )
    flops = bs * (L * per_layer + mm(S, Ep, Ep))            # + generator
    trans = bs * L * (H * S * S + 2 * S)                    # exp + rsqrt
    return pl.CostEstimate(flops=int(flops), transcendentals=int(trans),
                           bytes_accessed=int(bytes_in + bytes_out))


def fused_encoder_generator(x, pk, *, nhead, e_true):
    bs, S, Ep = x.shape
    L, H, _, Dh = pk["w_q"].shape
    F = pk["w_ff1"].shape[2]

    act_spec = pl.BlockSpec((pl.Squeezed(), S, Ep), lambda b: (b, 0, 0))

    weights = (pk["pos"],
               pk["w_q"], pk["w_k"], pk["w_v"],
               pk["b_q"], pk["b_k"], pk["b_v"],
               pk["w_out"], pk["b_out"],
               pk["g1"], pk["bn1"],
               pk["w_ff1"], pk["b_ff1"], pk["w_ff2"], pk["b_ff2"],
               pk["g2"], pk["bn2"],
               pk["gen_w"], pk["gen_b"])
    args = (x,) + weights
    in_specs = [act_spec] + [_rep_spec(a) for a in weights]

    bytes_in = sum(int(a.size) * a.dtype.itemsize for a in args)
    bytes_out = bs * S * Ep * 4

    return pl.pallas_call(
        partial(_vid2vid_kernel, nhead=nhead, e_true=e_true, eps=1e-5),
        grid=(bs,),
        out_shape=jax.ShapeDtypeStruct((bs, S, Ep), jnp.float32),
        in_specs=in_specs,
        out_specs=act_spec,
        compiler_params=pltpu.CompilerParams(
            dimension_semantics=("parallel",),
            vmem_limit_bytes=32 * 1024 * 1024),
        cost_estimate=_cost_estimate(bs, S, Ep, F, L, H, Dh,
                                     bytes_in, bytes_out),
    )(*args)


# ---------------------------------------------------------------------------
# Full Vid2VidTransformer forward (thin XLA glue around the single kernel)
# ---------------------------------------------------------------------------

def vid2vid_forward(src, packed, opt):
    bs, c, n, h, w = src.shape
    E = c * h * w
    n_token = opt["n_token"]
    S = n + n_token
    Ep = packed["pos"].shape[-1]

    # _flatten_img kept batch-major: (bs, c, n, h, w) -> (bs, n, c*h*w).
    # Attention runs per batch element inside the kernel, so batch-major vs.
    # PyTorch's seq-major layout is semantically identical.
    x = jnp.transpose(src, (0, 2, 1, 3, 4)).reshape(bs, n, E)
    tok = jnp.broadcast_to(packed["tokens"][None], (bs, n_token, E))
    x = jnp.concatenate([tok, x], axis=1)                    # (bs, S, E)
    if Ep != E:
        x = jnp.pad(x, ((0, 0), (0, 0), (0, Ep - E)))        # lane-dense slab

    out = fused_encoder_generator(x, packed, nhead=opt["nhead"], e_true=E)

    out = out[..., :E]                                       # drop lane padding
    # _recon_img + residual (exact PyTorch reshape semantics)
    y = out.reshape(bs, c, S, h, w)[:, :, n_token:]
    return y + src


# ---------------------------------------------------------------------------
# Parameter init (PyTorch layout) + one-time packing into the kernel layout
# ---------------------------------------------------------------------------

def sine_pos_embedding(length, emb_size):
    den = jnp.exp(-jnp.arange(0, emb_size, 2) * (math.log(10000.0) / emb_size))
    pos = jnp.arange(length, dtype=jnp.float32)[:, None]
    pe = jnp.zeros((length, emb_size), jnp.float32)
    pe = pe.at[:, 0::2].set(jnp.sin(pos * den))
    pe = pe.at[:, 1::2].set(jnp.cos(pos * den))
    return pe


def init_params(key, E, F, num_layers, n_token, maxlen):
    keys = iter(jax.random.split(key, 8 + 8 * num_layers))

    def rnd(shape, scale=0.02):
        return scale * jax.random.normal(next(keys), shape, dtype=jnp.float32)

    layers = []
    for _ in range(num_layers):
        layers.append(dict(
            in_proj_w=rnd((3 * E, E)), in_proj_b=rnd((3 * E,)),
            out_proj_w=rnd((E, E)), out_proj_b=rnd((E,)),
            norm1_g=jnp.ones((E,), jnp.float32),
            norm1_b=jnp.zeros((E,), jnp.float32),
            lin1_w=rnd((F, E)), lin1_b=rnd((F,)),
            lin2_w=rnd((E, F)), lin2_b=rnd((E,)),
            norm2_g=jnp.ones((E,), jnp.float32),
            norm2_b=jnp.zeros((E,), jnp.float32),
        ))
    return dict(
        layers=layers,
        gen_w=rnd((E, E)), gen_b=rnd((E,)),
        tokens=rnd((n_token, E)),
        pos_embedding=sine_pos_embedding(maxlen + n_token, E),
    )


def pack_params(params, *, nhead, n_frames, n_token, e_pad):
    """One-time (outside jit) pack: per-head split, pre-transposed (in, out)
    layout, 1/sqrt(Dh) folded into Q, lane padding E->e_pad with zeros, and
    bf16 cast of every matmul weight."""
    layers = params["layers"]
    E = params["gen_w"].shape[0]
    H = nhead
    Dh = E // H
    scale = 1.0 / math.sqrt(Dh)
    S = n_frames + n_token
    bf16 = jnp.bfloat16

    def pad_last(a, width):
        return jnp.pad(a, [(0, 0)] * (a.ndim - 1) + [(0, width - a.shape[-1])])

    def pad_rows(a, width):
        pads = [(0, 0)] * a.ndim
        pads[-2] = (0, width - a.shape[-2])
        return jnp.pad(a, pads)

    def head_w(lp, off, do_scale):
        out = []
        for h in range(H):
            Wh = lp["in_proj_w"][off * E + h * Dh: off * E + (h + 1) * Dh, :]
            Wt = Wh.T * scale if do_scale else Wh.T            # (E, Dh)
            out.append(jnp.pad(Wt, ((0, e_pad - E), (0, 0))))  # (Ep, Dh)
        return jnp.stack(out)                                  # (H, Ep, Dh)

    def head_b(lp, off, do_scale):
        out = []
        for h in range(H):
            bh = lp["in_proj_b"][off * E + h * Dh: off * E + (h + 1) * Dh]
            if do_scale:
                bh = bh * scale
            out.append(bh.reshape(1, Dh))
        return jnp.stack(out)                                  # (H, 1, Dh)

    w_q = jnp.stack([head_w(lp, 0, True) for lp in layers])    # (L,H,Ep,Dh)
    w_k = jnp.stack([head_w(lp, 1, False) for lp in layers])
    w_v = jnp.stack([head_w(lp, 2, False) for lp in layers])
    b_q = jnp.stack([head_b(lp, 0, True) for lp in layers])    # (L,H,1,Dh)
    b_k = jnp.stack([head_b(lp, 1, False) for lp in layers])
    b_v = jnp.stack([head_b(lp, 2, False) for lp in layers])

    w_out = jnp.stack([pad_last(lp["out_proj_w"].T, e_pad) for lp in layers])
    b_out = jnp.stack([pad_last(lp["out_proj_b"].reshape(1, -1), e_pad)
                       for lp in layers])
    g1 = jnp.stack([pad_last(lp["norm1_g"].reshape(1, -1), e_pad) for lp in layers])
    bn1 = jnp.stack([pad_last(lp["norm1_b"].reshape(1, -1), e_pad) for lp in layers])
    w_ff1 = jnp.stack([pad_rows(lp["lin1_w"].T, e_pad) for lp in layers])  # (L,Ep,F)
    b_ff1 = jnp.stack([lp["lin1_b"].reshape(1, -1) for lp in layers])      # (L,1,F)
    w_ff2 = jnp.stack([pad_last(lp["lin2_w"].T, e_pad) for lp in layers])  # (L,F,Ep)
    b_ff2 = jnp.stack([pad_last(lp["lin2_b"].reshape(1, -1), e_pad) for lp in layers])
    g2 = jnp.stack([pad_last(lp["norm2_g"].reshape(1, -1), e_pad) for lp in layers])
    bn2 = jnp.stack([pad_last(lp["norm2_b"].reshape(1, -1), e_pad) for lp in layers])

    gen_w = pad_last(pad_rows(params["gen_w"].T, e_pad), e_pad)            # (Ep,Ep)
    gen_b = pad_last(params["gen_b"].reshape(1, -1), e_pad)
    pos = pad_last(params["pos_embedding"][:S], e_pad)                     # (S,Ep)

    return dict(
        w_q=w_q.astype(bf16), w_k=w_k.astype(bf16), w_v=w_v.astype(bf16),
        b_q=b_q, b_k=b_k, b_v=b_v,
        w_out=w_out.astype(bf16), b_out=b_out,
        g1=g1, bn1=bn1,
        w_ff1=w_ff1.astype(bf16), b_ff1=b_ff1,
        w_ff2=w_ff2.astype(bf16), b_ff2=b_ff2,
        g2=g2, bn2=bn2,
        gen_w=gen_w.astype(bf16), gen_b=gen_b,
        tokens=params["tokens"],
        pos=pos,
    )


# ---------------------------------------------------------------------------

if __name__ == "__main__":
    opt = dict(
        patch_size=4,
        n_channels=4,
        n_token=2,
        nhead=4,
        dim_feedforward=128,     # already a lane multiple of 128
        num_encoder_layers=2,
        n_frames=8,
        batch=2,
    )
    E = opt["patch_size"] * opt["patch_size"] * opt["n_channels"]  # 64
    e_pad = ((E + 127) // 128) * 128                               # 128

    key = jax.random.PRNGKey(0)
    k_src, k_par = jax.random.split(key)

    src = jax.random.normal(
        k_src,
        (opt["batch"], opt["n_channels"], opt["n_frames"],
         opt["patch_size"], opt["patch_size"]),
        dtype=jnp.float32,
    )
    params = init_params(
        k_par, E, opt["dim_feedforward"], opt["num_encoder_layers"],
        opt["n_token"], opt["n_frames"],
    )
    packed = pack_params(
        params, nhead=opt["nhead"], n_frames=opt["n_frames"],
        n_token=opt["n_token"], e_pad=e_pad,
    )

    fwd = jax.jit(partial(vid2vid_forward, opt=opt))
    out = fwd(src, packed)
    jax.block_until_ready(out)
    assert out.shape == src.shape, out.shape
    assert out.dtype == jnp.float32
    print("KERNEL_OK")
</pallas_src>

<mosaic_0001>
module attributes {stable_mosaic.version = 11 : i64} {
  func.func @_vid2vid_kernel(%arg0: i32, %arg1: memref<1x10x128xf32, #tpu.memory_space<vmem>>, %arg2: memref<10x128xf32, #tpu.memory_space<vmem>>, %arg3: memref<2x4x128x16xbf16, #tpu.memory_space<vmem>>, %arg4: memref<2x4x128x16xbf16, #tpu.memory_space<vmem>>, %arg5: memref<2x4x128x16xbf16, #tpu.memory_space<vmem>>, %arg6: memref<2x4x1x16xf32, #tpu.memory_space<vmem>>, %arg7: memref<2x4x1x16xf32, #tpu.memory_space<vmem>>, %arg8: memref<2x4x1x16xf32, #tpu.memory_space<vmem>>, %arg9: memref<2x64x128xbf16, #tpu.memory_space<vmem>>, %arg10: memref<2x1x128xf32, #tpu.memory_space<vmem>>, %arg11: memref<2x1x128xf32, #tpu.memory_space<vmem>>, %arg12: memref<2x1x128xf32, #tpu.memory_space<vmem>>, %arg13: memref<2x128x128xbf16, #tpu.memory_space<vmem>>, %arg14: memref<2x1x128xf32, #tpu.memory_space<vmem>>, %arg15: memref<2x128x128xbf16, #tpu.memory_space<vmem>>, %arg16: memref<2x1x128xf32, #tpu.memory_space<vmem>>, %arg17: memref<2x1x128xf32, #tpu.memory_space<vmem>>, %arg18: memref<2x1x128xf32, #tpu.memory_space<vmem>>, %arg19: memref<128x128xbf16, #tpu.memory_space<vmem>>, %arg20: memref<1x128xf32, #tpu.memory_space<vmem>>, %arg21: memref<1x10x128xf32, #tpu.memory_space<vmem>>) attributes {dimension_semantics = [#tpu.dimension_semantics<parallel>], iteration_bounds = array<i64: 2>, scalar_prefetch = 0 : i64, scratch_operands = 0 : i64, tpu.core_type = #tpu.core_type<tc>, window_params = [{transform_indices = @transform_0, window_bounds = array<i64: 1, 10, 128>}, {pipeline_mode = #tpu.pipeline_mode<synchronous>, transform_indices = @transform_1, window_bounds = array<i64: 10, 128>}, {pipeline_mode = #tpu.pipeline_mode<synchronous>, transform_indices = @transform_2, window_bounds = array<i64: 2, 4, 128, 16>}, {pipeline_mode = #tpu.pipeline_mode<synchronous>, transform_indices = @transform_3, window_bounds = array<i64: 2, 4, 128, 16>}, {pipeline_mode = #tpu.pipeline_mode<synchronous>, transform_indices = @transform_4, window_bounds = array<i64: 2, 4, 128, 16>}, {pipeline_mode = #tpu.pipeline_mode<synchronous>, transform_indices = @transform_5, window_bounds = array<i64: 2, 4, 1, 16>}, {pipeline_mode = #tpu.pipeline_mode<synchronous>, transform_indices = @transform_6, window_bounds = array<i64: 2, 4, 1, 16>}, {pipeline_mode = #tpu.pipeline_mode<synchronous>, transform_indices = @transform_7, window_bounds = array<i64: 2, 4, 1, 16>}, {pipeline_mode = #tpu.pipeline_mode<synchronous>, transform_indices = @transform_8, window_bounds = array<i64: 2, 64, 128>}, {pipeline_mode = #tpu.pipeline_mode<synchronous>, transform_indices = @transform_9, window_bounds = array<i64: 2, 1, 128>}, {pipeline_mode = #tpu.pipeline_mode<synchronous>, transform_indices = @transform_10, window_bounds = array<i64: 2, 1, 128>}, {pipeline_mode = #tpu.pipeline_mode<synchronous>, transform_indices = @transform_11, window_bounds = array<i64: 2, 1, 128>}, {pipeline_mode = #tpu.pipeline_mode<synchronous>, transform_indices = @transform_12, window_bounds = array<i64: 2, 128, 128>}, {pipeline_mode = #tpu.pipeline_mode<synchronous>, transform_indices = @transform_13, window_bounds = array<i64: 2, 1, 128>}, {pipeline_mode = #tpu.pipeline_mode<synchronous>, transform_indices = @transform_14, window_bounds = array<i64: 2, 128, 128>}, {pipeline_mode = #tpu.pipeline_mode<synchronous>, transform_indices = @transform_15, window_bounds = array<i64: 2, 1, 128>}, {pipeline_mode = #tpu.pipeline_mode<synchronous>, transform_indices = @transform_16, window_bounds = array<i64: 2, 1, 128>}, {pipeline_mode = #tpu.pipeline_mode<synchronous>, transform_indices = @transform_17, window_bounds = array<i64: 2, 1, 128>}, {pipeline_mode = #tpu.pipeline_mode<synchronous>, transform_indices = @transform_18, window_bounds = array<i64: 128, 128>}, {pipeline_mode = #tpu.pipeline_mode<synchronous>, transform_indices = @transform_19, window_bounds = array<i64: 1, 128>}, {transform_indices = @transform_20, window_bounds = array<i64: 1, 10, 128>}]} {
    %c0 = arith.constant 0 : index
    %c0_0 = arith.constant 0 : index
    %c0_1 = arith.constant 0 : index
    %0 = vector.load %arg1[%c0, %c0_0, %c0_1] : memref<1x10x128xf32, #tpu.memory_space<vmem>>, vector<1x10x128xf32>
    %1 = vector.shape_cast %0 : vector<1x10x128xf32> to vector<10x128xf32>
    %c0_2 = arith.constant 0 : index
    %c0_3 = arith.constant 0 : index
    %2 = vector.load %arg2[%c0_2, %c0_3] : memref<10x128xf32, #tpu.memory_space<vmem>>, vector<10x128xf32>
    %3 = arith.addf %1, %2 : vector<10x128xf32>
    %4 = tpu.iota {dimensions = array<i32: 1>} : vector<1x128xi32>
    %c64_i32 = arith.constant 64 : i32
    %5 = vector.broadcast %c64_i32 : i32 to vector<1x128xi32>
    %6 = arith.cmpi slt, %4, %5 : vector<1x128xi32>
    %7 = arith.extui %6 : vector<1x128xi1> to vector<1x128xi32>
    %8 = arith.sitofp %7 : vector<1x128xi32> to vector<1x128xf32>
    %9 = arith.truncf %3 : vector<10x128xf32> to vector<10x128xbf16>
    %c0_4 = arith.constant 0 : index
    %c0_5 = arith.constant 0 : index
    %c0_6 = arith.constant 0 : index
    %10 = vector.load %arg10[%c0_4, %c0_5, %c0_6] : memref<2x1x128xf32, #tpu.memory_space<vmem>>, vector<1x1x128xf32>
    %11 = vector.shape_cast %10 : vector<1x1x128xf32> to vector<1x128xf32>
    %c0_7 = arith.constant 0 : index
    %c0_8 = arith.constant 0 : index
    %c0_9 = arith.constant 0 : index
    %c0_10 = arith.constant 0 : index
    %12 = vector.load %arg3[%c0_7, %c0_8, %c0_9, %c0_10] : memref<2x4x128x16xbf16, #tpu.memory_space<vmem>>, vector<1x1x128x16xbf16>
    %13 = vector.shape_cast %12 : vector<1x1x128x16xbf16> to vector<128x16xbf16>
    %cst = arith.constant dense<0.000000e+00> : vector<10x16xf32>
    %14 = tpu.matmul %9, %13, %cst {dimension_numbers = #tpu.dot_dimension_numbers<[1], [0], [0], [1], [0, 0, 1, 1], [], []>} : vector<10x128xbf16>, vector<128x16xbf16>, vector<10x16xf32> -> vector<10x16xf32>
    %c0_11 = arith.constant 0 : index
    %c0_12 = arith.constant 0 : index
    %c0_13 = arith.constant 0 : index
    %c0_14 = arith.constant 0 : index
    %15 = vector.load %arg6[%c0_11, %c0_12, %c0_13, %c0_14] : memref<2x4x1x16xf32, #tpu.memory_space<vmem>>, vector<1x1x1x16xf32>
    %16 = vector.shape_cast %15 : vector<1x1x1x16xf32> to vector<1x16xf32>
    %17 = vector.broadcast %16 : vector<1x16xf32> to vector<10x16xf32>
    %18 = arith.addf %14, %17 : vector<10x16xf32>
    %c0_15 = arith.constant 0 : index
    %c0_16 = arith.constant 0 : index
    %c0_17 = arith.constant 0 : index
    %c0_18 = arith.constant 0 : index
    %19 = vector.load %arg4[%c0_15, %c0_16, %c0_17, %c0_18] : memref<2x4x128x16xbf16, #tpu.memory_space<vmem>>, vector<1x1x128x16xbf16>
    %20 = vector.shape_cast %19 : vector<1x1x128x16xbf16> to vector<128x16xbf16>
    %cst_19 = arith.constant dense<0.000000e+00> : vector<10x16xf32>
    %21 = tpu.matmul %9, %20, %cst_19 {dimension_numbers = #tpu.dot_dimension_numbers<[1], [0], [0], [1], [0, 0, 1, 1], [], []>} : vector<10x128xbf16>, vector<128x16xbf16>, vector<10x16xf32> -> vector<10x16xf32>
    %c0_20 = arith.constant 0 : index
    %c0_21 = arith.constant 0 : index
    %c0_22 = arith.constant 0 : index
    %c0_23 = arith.constant 0 : index
    %22 = vector.load %arg7[%c0_20, %c0_21, %c0_22, %c0_23] : memref<2x4x1x16xf32, #tpu.memory_space<vmem>>, vector<1x1x1x16xf32>
    %23 = vector.shape_cast %22 : vector<1x1x1x16xf32> to vector<1x16xf32>
    %24 = vector.broadcast %23 : vector<1x16xf32> to vector<10x16xf32>
    %25 = arith.addf %21, %24 : vector<10x16xf32>
    %c0_24 = arith.constant 0 : index
    %c0_25 = arith.constant 0 : index
    %c0_26 = arith.constant 0 : index
    %c0_27 = arith.constant 0 : index
    %26 = vector.load %arg5[%c0_24, %c0_25, %c0_26, %c0_27] : memref<2x4x128x16xbf16, #tpu.memory_space<vmem>>, vector<1x1x128x16xbf16>
    %27 = vector.shape_cast %26 : vector<1x1x128x16xbf16> to vector<128x16xbf16>
    %cst_28 = arith.constant dense<0.000000e+00> : vector<10x16xf32>
    %28 = tpu.matmul %9, %27, %cst_28 {dimension_numbers = #tpu.dot_dimension_numbers<[1], [0], [0], [1], [0, 0, 1, 1], [], []>} : vector<10x128xbf16>, vector<128x16xbf16>, vector<10x16xf32> -> vector<10x16xf32>
    %c0_29 = arith.constant 0 : index
    %c0_30 = arith.constant 0 : index
    %c0_31 = arith.constant 0 : index
    %c0_32 = arith.constant 0 : index
    %29 = vector.load %arg8[%c0_29, %c0_30, %c0_31, %c0_32] : memref<2x4x1x16xf32, #tpu.memory_space<vmem>>, vector<1x1x1x16xf32>
    %30 = vector.shape_cast %29 : vector<1x1x1x16xf32> to vector<1x16xf32>
    %31 = vector.broadcast %30 : vector<1x16xf32> to vector<10x16xf32>
    %32 = arith.addf %28, %31 : vector<10x16xf32>
    %cst_33 = arith.constant dense<0.000000e+00> : vector<10x10xf32>
    %33 = tpu.matmul %18, %25, %cst_33 {dimension_numbers = #tpu.dot_dimension_numbers<[1], [1], [0], [0], [0, 0, 1, 0], [], []>} : vector<10x16xf32>, vector<10x16xf32>, vector<10x10xf32> -> vector<10x10xf32>
    %cst_34 = arith.constant dense<0xFF800000> : vector<10xf32>
    %34 = vector.multi_reduction <maximumf>, %33, %cst_34 [1] : vector<10x10xf32> to vector<10xf32>
    %35 = vector.shape_cast %34 : vector<10xf32> to vector<10x1xf32>
    %36 = vector.broadcast %35 : vector<10x1xf32> to vector<10x10xf32>
    %37 = arith.subf %33, %36 : vector<10x10xf32>
    %38 = math.exp %37 : vector<10x10xf32>
    %cst_35 = arith.constant dense<0.000000e+00> : vector<10xf32>
    %39 = vector.multi_reduction <add>, %38, %cst_35 [1] : vector<10x10xf32> to vector<10xf32>
    %40 = vector.shape_cast %39 : vector<10xf32> to vector<10x1xf32>
    %41 = vector.broadcast %40 : vector<10x1xf32> to vector<10x10xf32>
    %42 = arith.divf %38, %41 : vector<10x10xf32>
    %cst_36 = arith.constant dense<0.000000e+00> : vector<10x16xf32>
    %43 = tpu.matmul %42, %32, %cst_36 {dimension_numbers = #tpu.dot_dimension_numbers<[1], [0], [0], [1], [0, 0, 1, 1], [], []>} : vector<10x10xf32>, vector<10x16xf32>, vector<10x16xf32> -> vector<10x16xf32>
    %44 = arith.truncf %43 : vector<10x16xf32> to vector<10x16xbf16>
    %c0_37 = arith.constant 0 : index
    %c0_38 = arith.constant 0 : index
    %c0_39 = arith.constant 0 : index
    %45 = vector.load %arg9[%c0_37, %c0_38, %c0_39] : memref<2x64x128xbf16, #tpu.memory_space<vmem>>, vector<1x16x128xbf16>
    %46 = vector.shape_cast %45 : vector<1x16x128xbf16> to vector<16x128xbf16>
    %cst_40 = arith.constant dense<0.000000e+00> : vector<10x128xf32>
    %47 = tpu.matmul %44, %46, %cst_40 {dimension_numbers = #tpu.dot_dimension_numbers<[1], [0], [0], [1], [0, 0, 1, 1], [], []>} : vector<10x16xbf16>, vector<16x128xbf16>, vector<10x128xf32> -> vector<10x128xf32>
    %48 = vector.broadcast %11 : vector<1x128xf32> to vector<10x128xf32>
    %49 = arith.addf %48, %47 : vector<10x128xf32>
    %c0_41 = arith.constant 0 : index
    %c1 = arith.constant 1 : index
    %c0_42 = arith.constant 0 : index
    %c0_43 = arith.constant 0 : index
    %50 = vector.load %arg3[%c0_41, %c1, %c0_42, %c0_43] : memref<2x4x128x16xbf16, #tpu.memory_space<vmem>>, vector<1x1x128x16xbf16>
    %51 = vector.shape_cast %50 : vector<1x1x128x16xbf16> to vector<128x16xbf16>
    %cst_44 = arith.constant dense<0.000000e+00> : vector<10x16xf32>
    %52 = tpu.matmul %9, %51, %cst_44 {dimension_numbers = #tpu.dot_dimension_numbers<[1], [0], [0], [1], [0, 0, 1, 1], [], []>} : vector<10x128xbf16>, vector<128x16xbf16>, vector<10x16xf32> -> vector<10x16xf32>
    %c0_45 = arith.constant 0 : index
    %c1_46 = arith.constant 1 : index
    %c0_47 = arith.constant 0 : index
    %c0_48 = arith.constant 0 : index
    %53 = vector.load %arg6[%c0_45, %c1_46, %c0_47, %c0_48] : memref<2x4x1x16xf32, #tpu.memory_space<vmem>>, vector<1x1x1x16xf32>
    %54 = vector.shape_cast %53 : vector<1x1x1x16xf32> to vector<1x16xf32>
    %55 = vector.broadcast %54 : vector<1x16xf32> to vector<10x16xf32>
    %56 = arith.addf %52, %55 : vector<10x16xf32>
    %c0_49 = arith.constant 0 : index
    %c1_50 = arith.constant 1 : index
    %c0_51 = arith.constant 0 : index
    %c0_52 = arith.constant 0 : index
    %57 = vector.load %arg4[%c0_49, %c1_50, %c0_51, %c0_52] : memref<2x4x128x16xbf16, #tpu.memory_space<vmem>>, vector<1x1x128x16xbf16>
    %58 = vector.shape_cast %57 : vector<1x1x128x16xbf16> to vector<128x16xbf16>
    %cst_53 = arith.constant dense<0.000000e+00> : vector<10x16xf32>
    %59 = tpu.matmul %9, %58, %cst_53 {dimension_numbers = #tpu.dot_dimension_numbers<[1], [0], [0], [1], [0, 0, 1, 1], [], []>} : vector<10x128xbf16>, vector<128x16xbf16>, vector<10x16xf32> -> vector<10x16xf32>
    %c0_54 = arith.constant 0 : index
    %c1_55 = arith.constant 1 : index
    %c0_56 = arith.constant 0 : index
    %c0_57 = arith.constant 0 : index
    %60 = vector.load %arg7[%c0_54, %c1_55, %c0_56, %c0_57] : memref<2x4x1x16xf32, #tpu.memory_space<vmem>>, vector<1x1x1x16xf32>
    %61 = vector.shape_cast %60 : vector<1x1x1x16xf32> to vector<1x16xf32>
    %62 = vector.broadcast %61 : vector<1x16xf32> to vector<10x16xf32>
    %63 = arith.addf %59, %62 : vector<10x16xf32>
    %c0_58 = arith.constant 0 : index
    %c1_59 = arith.constant 1 : index
    %c0_60 = arith.constant 0 : index
    %c0_61 = arith.constant 0 : index
    %64 = vector.load %arg5[%c0_58, %c1_59, %c0_60, %c0_61] : memref<2x4x128x16xbf16, #tpu.memory_space<vmem>>, vector<1x1x128x16xbf16>
    %65 = vector.shape_cast %64 : vector<1x1x128x16xbf16> to vector<128x16xbf16>
    %cst_62 = arith.constant dense<0.000000e+00> : vector<10x16xf32>
    %66 = tpu.matmul %9, %65, %cst_62 {dimension_numbers = #tpu.dot_dimension_numbers<[1], [0], [0], [1], [0, 0, 1, 1], [], []>} : vector<10x128xbf16>, vector<128x16xbf16>, vector<10x16xf32> -> vector<10x16xf32>
    %c0_63 = arith.constant 0 : index
    %c1_64 = arith.constant 1 : index
    %c0_65 = arith.constant 0 : index
    %c0_66 = arith.constant 0 : index
    %67 = vector.load %arg8[%c0_63, %c1_64, %c0_65, %c0_66] : memref<2x4x1x16xf32, #tpu.memory_space<vmem>>, vector<1x1x1x16xf32>
    %68 = vector.shape_cast %67 : vector<1x1x1x16xf32> to vector<1x16xf32>
    %69 = vector.broadcast %68 : vector<1x16xf32> to vector<10x16xf32>
    %70 = arith.addf %66, %69 : vector<10x16xf32>
    %cst_67 = arith.constant dense<0.000000e+00> : vector<10x10xf32>
    %71 = tpu.matmul %56, %63, %cst_67 {dimension_numbers = #tpu.dot_dimension_numbers<[1], [1], [0], [0], [0, 0, 1, 0], [], []>} : vector<10x16xf32>, vector<10x16xf32>, vector<10x10xf32> -> vector<10x10xf32>
    %cst_68 = arith.constant dense<0xFF800000> : vector<10xf32>
    %72 = vector.multi_reduction <maximumf>, %71, %cst_68 [1] : vector<10x10xf32> to vector<10xf32>
    %73 = vector.shape_cast %72 : vector<10xf32> to vector<10x1xf32>
    %74 = vector.broadcast %73 : vector<10x1xf32> to vector<10x10xf32>
    %75 = arith.subf %71, %74 : vector<10x10xf32>
    %76 = math.exp %75 : vector<10x10xf32>
    %cst_69 = arith.constant dense<0.000000e+00> : vector<10xf32>
    %77 = vector.multi_reduction <add>, %76, %cst_69 [1] : vector<10x10xf32> to vector<10xf32>
    %78 = vector.shape_cast %77 : vector<10xf32> to vector<10x1xf32>
    %79 = vector.broadcast %78 : vector<10x1xf32> to vector<10x10xf32>
    %80 = arith.divf %76, %79 : vector<10x10xf32>
    %cst_70 = arith.constant dense<0.000000e+00> : vector<10x16xf32>
    %81 = tpu.matmul %80, %70, %cst_70 {dimension_numbers = #tpu.dot_dimension_numbers<[1], [0], [0], [1], [0, 0, 1, 1], [], []>} : vector<10x10xf32>, vector<10x16xf32>, vector<10x16xf32> -> vector<10x16xf32>
    %82 = arith.truncf %81 : vector<10x16xf32> to vector<10x16xbf16>
    %c0_71 = arith.constant 0 : index
    %c16 = arith.constant 16 : index
    %c0_72 = arith.constant 0 : index
    %83 = vector.load %arg9[%c0_71, %c16, %c0_72] : memref<2x64x128xbf16, #tpu.memory_space<vmem>>, vector<1x16x128xbf16>
    %84 = vector.shape_cast %83 : vector<1x16x128xbf16> to vector<16x128xbf16>
    %cst_73 = arith.constant dense<0.000000e+00> : vector<10x128xf32>
    %85 = tpu.matmul %82, %84, %cst_73 {dimension_numbers = #tpu.dot_dimension_numbers<[1], [0], [0], [1], [0, 0, 1, 1], [], []>} : vector<10x16xbf16>, vector<16x128xbf16>, vector<10x128xf32> -> vector<10x128xf32>
    %86 = arith.addf %49, %85 : vector<10x128xf32>
    %c0_74 = arith.constant 0 : index
    %c2 = arith.constant 2 : index
    %c0_75 = arith.constant 0 : index
    %c0_76 = arith.constant 0 : index
    %87 = vector.load %arg3[%c0_74, %c2, %c0_75, %c0_76] : memref<2x4x128x16xbf16, #tpu.memory_space<vmem>>, vector<1x1x128x16xbf16>
    %88 = vector.shape_cast %87 : vector<1x1x128x16xbf16> to vector<128x16xbf16>
    %cst_77 = arith.constant dense<0.000000e+00> : vector<10x16xf32>
    %89 = tpu.matmul %9, %88, %cst_77 {dimension_numbers = #tpu.dot_dimension_numbers<[1], [0], [0], [1], [0, 0, 1, 1], [], []>} : vector<10x128xbf16>, vector<128x16xbf16>, vector<10x16xf32> -> vector<10x16xf32>
    %c0_78 = arith.constant 0 : index
    %c2_79 = arith.constant 2 : index
    %c0_80 = arith.constant 0 : index
    %c0_81 = arith.constant 0 : index
    %90 = vector.load %arg6[%c0_78, %c2_79, %c0_80, %c0_81] : memref<2x4x1x16xf32, #tpu.memory_space<vmem>>, vector<1x1x1x16xf32>
    %91 = vector.shape_cast %90 : vector<1x1x1x16xf32> to vector<1x16xf32>
    %92 = vector.broadcast %91 : vector<1x16xf32> to vector<10x16xf32>
    %93 = arith.addf %89, %92 : vector<10x16xf32>
    %c0_82 = arith.constant 0 : index
    %c2_83 = arith.constant 2 : index
    %c0_84 = arith.constant 0 : index
    %c0_85 = arith.constant 0 : index
    %94 = vector.load %arg4[%c0_82, %c2_83, %c0_84, %c0_85] : memref<2x4x128x16xbf16, #tpu.memory_space<vmem>>, vector<1x1x128x16xbf16>
    %95 = vector.shape_cast %94 : vector<1x1x128x16xbf16> to vector<128x16xbf16>
    %cst_86 = arith.constant dense<0.000000e+00> : vector<10x16xf32>
    %96 = tpu.matmul %9, %95, %cst_86 {dimension_numbers = #tpu.dot_dimension_numbers<[1], [0], [0], [1], [0, 0, 1, 1], [], []>} : vector<10x128xbf16>, vector<128x16xbf16>, vector<10x16xf32> -> vector<10x16xf32>
    %c0_87 = arith.constant 0 : index
    %c2_88 = arith.constant 2 : index
    %c0_89 = arith.constant 0 : index
    %c0_90 = arith.constant 0 : index
    %97 = vector.load %arg7[%c0_87, %c2_88, %c0_89, %c0_90] : memref<2x4x1x16xf32, #tpu.memory_space<vmem>>, vector<1x1x1x16xf32>
    %98 = vector.shape_cast %97 : vector<1x1x1x16xf32> to vector<1x16xf32>
    %99 = vector.broadcast %98 : vector<1x16xf32> to vector<10x16xf32>
    %100 = arith.addf %96, %99 : vector<10x16xf32>
    %c0_91 = arith.constant 0 : index
    %c2_92 = arith.constant 2 : index
    %c0_93 = arith.constant 0 : index
    %c0_94 = arith.constant 0 : index
    %101 = vector.load %arg5[%c0_91, %c2_92, %c0_93, %c0_94] : memref<2x4x128x16xbf16, #tpu.memory_space<vmem>>, vector<1x1x128x16xbf16>
    %102 = vector.shape_cast %101 : vector<1x1x128x16xbf16> to vector<128x16xbf16>
    %cst_95 = arith.constant dense<0.000000e+00> : vector<10x16xf32>
    %103 = tpu.matmul %9, %102, %cst_95 {dimension_numbers = #tpu.dot_dimension_numbers<[1], [0], [0], [1], [0, 0, 1, 1], [], []>} : vector<10x128xbf16>, vector<128x16xbf16>, vector<10x16xf32> -> vector<10x16xf32>
    %c0_96 = arith.constant 0 : index
    %c2_97 = arith.constant 2 : index
    %c0_98 = arith.constant 0 : index
    %c0_99 = arith.constant 0 : index
    %104 = vector.load %arg8[%c0_96, %c2_97, %c0_98, %c0_99] : memref<2x4x1x16xf32, #tpu.memory_space<vmem>>, vector<1x1x1x16xf32>
    %105 = vector.shape_cast %104 : vector<1x1x1x16xf32> to vector<1x16xf32>
    %106 = vector.broadcast %105 : vector<1x16xf32> to vector<10x16xf32>
    %107 = arith.addf %103, %106 : vector<10x16xf32>
    %cst_100 = arith.constant dense<0.000000e+00> : vector<10x10xf32>
    %108 = tpu.matmul %93, %100, %cst_100 {dimension_numbers = #tpu.dot_dimension_numbers<[1], [1], [0], [0], [0, 0, 1, 0], [], []>} : vector<10x16xf32>, vector<10x16xf32>, vector<10x10xf32> -> vector<10x10xf32>
    %cst_101 = arith.constant dense<0xFF800000> : vector<10xf32>
    %109 = vector.multi_reduction <maximumf>, %108, %cst_101 [1] : vector<10x10xf32> to vector<10xf32>
    %110 = vector.shape_cast %109 : vector<10xf32> to vector<10x1xf32>
    %111 = vector.broadcast %110 : vector<10x1xf32> to vector<10x10xf32>
    %112 = arith.subf %108, %111 : vector<10x10xf32>
    %113 = math.exp %112 : vector<10x10xf32>
    %cst_102 = arith.constant dense<0.000000e+00> : vector<10xf32>
    %114 = vector.multi_reduction <add>, %113, %cst_102 [1] : vector<10x10xf32> to vector<10xf32>
    %115 = vector.shape_cast %114 : vector<10xf32> to vector<10x1xf32>
    %116 = vector.broadcast %115 : vector<10x1xf32> to vector<10x10xf32>
    %117 = arith.divf %113, %116 : vector<10x10xf32>
    %cst_103 = arith.constant dense<0.000000e+00> : vector<10x16xf32>
    %118 = tpu.matmul %117, %107, %cst_103 {dimension_numbers = #tpu.dot_dimension_numbers<[1], [0], [0], [1], [0, 0, 1, 1], [], []>} : vector<10x10xf32>, vector<10x16xf32>, vector<10x16xf32> -> vector<10x16xf32>
    %119 = arith.truncf %118 : vector<10x16xf32> to vector<10x16xbf16>
    %c0_104 = arith.constant 0 : index
    %c32 = arith.constant 32 : index
    %c0_105 = arith.constant 0 : index
    %120 = vector.load %arg9[%c0_104, %c32, %c0_105] : memref<2x64x128xbf16, #tpu.memory_space<vmem>>, vector<1x16x128xbf16>
    %121 = vector.shape_cast %120 : vector<1x16x128xbf16> to vector<16x128xbf16>
    %cst_106 = arith.constant dense<0.000000e+00> : vector<10x128xf32>
    %122 = tpu.matmul %119, %121, %cst_106 {dimension_numbers = #tpu.dot_dimension_numbers<[1], [0], [0], [1], [0, 0, 1, 1], [], []>} : vector<10x16xbf16>, vector<16x128xbf16>, vector<10x128xf32> -> vector<10x128xf32>
    %123 = arith.addf %86, %122 : vector<10x128xf32>
    %c0_107 = arith.constant 0 : index
    %c3 = arith.constant 3 : index
    %c0_108 = arith.constant 0 : index
    %c0_109 = arith.constant 0 : index
    %124 = vector.load %arg3[%c0_107, %c3, %c0_108, %c0_109] : memref<2x4x128x16xbf16, #tpu.memory_space<vmem>>, vector<1x1x128x16xbf16>
    %125 = vector.shape_cast %124 : vector<1x1x128x16xbf16> to vector<128x16xbf16>
    %cst_110 = arith.constant dense<0.000000e+00> : vector<10x16xf32>
    %126 = tpu.matmul %9, %125, %cst_110 {dimension_numbers = #tpu.dot_dimension_numbers<[1], [0], [0], [1], [0, 0, 1, 1], [], []>} : vector<10x128xbf16>, vector<128x16xbf16>, vector<10x16xf32> -> vector<10x16xf32>
    %c0_111 = arith.constant 0 : index
    %c3_112 = arith.constant 3 : index
    %c0_113 = arith.constant 0 : index
    %c0_114 = arith.constant 0 : index
    %127 = vector.load %arg6[%c0_111, %c3_112, %c0_113, %c0_114] : memref<2x4x1x16xf32, #tpu.memory_space<vmem>>, vector<1x1x1x16xf32>
    %128 = vector.shape_cast %127 : vector<1x1x1x16xf32> to vector<1x16xf32>
    %129 = vector.broadcast %128 : vector<1x16xf32> to vector<10x16xf32>
    %130 = arith.addf %126, %129 : vector<10x16xf32>
    %c0_115 = arith.constant 0 : index
    %c3_116 = arith.constant 3 : index
    %c0_117 = arith.constant 0 : index
    %c0_118 = arith.constant 0 : index
    %131 = vector.load %arg4[%c0_115, %c3_116, %c0_117, %c0_118] : memref<2x4x128x16xbf16, #tpu.memory_space<vmem>>, vector<1x1x128x16xbf16>
    %132 = vector.shape_cast %131 : vector<1x1x128x16xbf16> to vector<128x16xbf16>
    %cst_119 = arith.constant dense<0.000000e+00> : vector<10x16xf32>
    %133 = tpu.matmul %9, %132, %cst_119 {dimension_numbers = #tpu.dot_dimension_numbers<[1], [0], [0], [1], [0, 0, 1, 1], [], []>} : vector<10x128xbf16>, vector<128x16xbf16>, vector<10x16xf32> -> vector<10x16xf32>
    %c0_120 = arith.constant 0 : index
    %c3_121 = arith.constant 3 : index
    %c0_122 = arith.constant 0 : index
    %c0_123 = arith.constant 0 : index
    %134 = vector.load %arg7[%c0_120, %c3_121, %c0_122, %c0_123] : memref<2x4x1x16xf32, #tpu.memory_space<vmem>>, vector<1x1x1x16xf32>
    %135 = vector.shape_cast %134 : vector<1x1x1x16xf32> to vector<1x16xf32>
    %136 = vector.broadcast %135 : vector<1x16xf32> to vector<10x16xf32>
    %137 = arith.addf %133, %136 : vector<10x16xf32>
    %c0_124 = arith.constant 0 : index
    %c3_125 = arith.constant 3 : index
    %c0_126 = arith.constant 0 : index
    %c0_127 = arith.constant 0 : index
    %138 = vector.load %arg5[%c0_124, %c3_125, %c0_126, %c0_127] : memref<2x4x128x16xbf16, #tpu.memory_space<vmem>>, vector<1x1x128x16xbf16>
    %139 = vector.shape_cast %138 : vector<1x1x128x16xbf16> to vector<128x16xbf16>
    %cst_128 = arith.constant dense<0.000000e+00> : vector<10x16xf32>
    %140 = tpu.matmul %9, %139, %cst_128 {dimension_numbers = #tpu.dot_dimension_numbers<[1], [0], [0], [1], [0, 0, 1, 1], [], []>} : vector<10x128xbf16>, vector<128x16xbf16>, vector<10x16xf32> -> vector<10x16xf32>
    %c0_129 = arith.constant 0 : index
    %c3_130 = arith.constant 3 : index
    %c0_131 = arith.constant 0 : index
    %c0_132 = arith.constant 0 : index
    %141 = vector.load %arg8[%c0_129, %c3_130, %c0_131, %c0_132] : memref<2x4x1x16xf32, #tpu.memory_space<vmem>>, vector<1x1x1x16xf32>
    %142 = vector.shape_cast %141 : vector<1x1x1x16xf32> to vector<1x16xf32>
    %143 = vector.broadcast %142 : vector<1x16xf32> to vector<10x16xf32>
    %144 = arith.addf %140, %143 : vector<10x16xf32>
    %cst_133 = arith.constant dense<0.000000e+00> : vector<10x10xf32>
    %145 = tpu.matmul %130, %137, %cst_133 {dimension_numbers = #tpu.dot_dimension_numbers<[1], [1], [0], [0], [0, 0, 1, 0], [], []>} : vector<10x16xf32>, vector<10x16xf32>, vector<10x10xf32> -> vector<10x10xf32>
    %cst_134 = arith.constant dense<0xFF800000> : vector<10xf32>
    %146 = vector.multi_reduction <maximumf>, %145, %cst_134 [1] : vector<10x10xf32> to vector<10xf32>
    %147 = vector.shape_cast %146 : vector<10xf32> to vector<10x1xf32>
    %148 = vector.broadcast %147 : vector<10x1xf32> to vector<10x10xf32>
    %149 = arith.subf %145, %148 : vector<10x10xf32>
    %150 = math.exp %149 : vector<10x10xf32>
    %cst_135 = arith.constant dense<0.000000e+00> : vector<10xf32>
    %151 = vector.multi_reduction <add>, %150, %cst_135 [1] : vector<10x10xf32> to vector<10xf32>
    %152 = vector.shape_cast %151 : vector<10xf32> to vector<10x1xf32>
    %153 = vector.broadcast %152 : vector<10x1xf32> to vector<10x10xf32>
    %154 = arith.divf %150, %153 : vector<10x10xf32>
    %cst_136 = arith.constant dense<0.000000e+00> : vector<10x16xf32>
    %155 = tpu.matmul %154, %144, %cst_136 {dimension_numbers = #tpu.dot_dimension_numbers<[1], [0], [0], [1], [0, 0, 1, 1], [], []>} : vector<10x10xf32>, vector<10x16xf32>, vector<10x16xf32> -> vector<10x16xf32>
    %156 = arith.truncf %155 : vector<10x16xf32> to vector<10x16xbf16>
    %c0_137 = arith.constant 0 : index
    %c48 = arith.constant 48 : index
    %c0_138 = arith.constant 0 : index
    %157 = vector.load %arg9[%c0_137, %c48, %c0_138] : memref<2x64x128xbf16, #tpu.memory_space<vmem>>, vector<1x16x128xbf16>
    %158 = vector.shape_cast %157 : vector<1x16x128xbf16> to vector<16x128xbf16>
    %cst_139 = arith.constant dense<0.000000e+00> : vector<10x128xf32>
    %159 = tpu.matmul %156, %158, %cst_139 {dimension_numbers = #tpu.dot_dimension_numbers<[1], [0], [0], [1], [0, 0, 1, 1], [], []>} : vector<10x16xbf16>, vector<16x128xbf16>, vector<10x128xf32> -> vector<10x128xf32>
    %160 = arith.addf %123, %159 : vector<10x128xf32>
    %161 = arith.addf %3, %160 : vector<10x128xf32>
    %c0_140 = arith.constant 0 : index
    %c0_141 = arith.constant 0 : index
    %c0_142 = arith.constant 0 : index
    %162 = vector.load %arg11[%c0_140, %c0_141, %c0_142] : memref<2x1x128xf32, #tpu.memory_space<vmem>>, vector<1x1x128xf32>
    %163 = vector.shape_cast %162 : vector<1x1x128xf32> to vector<1x128xf32>
    %c0_143 = arith.constant 0 : index
    %c0_144 = arith.constant 0 : index
    %c0_145 = arith.constant 0 : index
    %164 = vector.load %arg12[%c0_143, %c0_144, %c0_145] : memref<2x1x128xf32, #tpu.memory_space<vmem>>, vector<1x1x128xf32>
    %165 = vector.shape_cast %164 : vector<1x1x128xf32> to vector<1x128xf32>
    %cst_146 = arith.constant dense<0.000000e+00> : vector<10xf32>
    %166 = vector.multi_reduction <add>, %161, %cst_146 [1] : vector<10x128xf32> to vector<10xf32>
    %167 = vector.shape_cast %166 : vector<10xf32> to vector<10x1xf32>
    %cst_147 = arith.constant 1.562500e-02 : f32
    %168 = vector.broadcast %cst_147 : f32 to vector<10x1xf32>
    %169 = arith.mulf %167, %168 : vector<10x1xf32>
    %170 = vector.broadcast %169 : vector<10x1xf32> to vector<10x128xf32>
    %171 = arith.subf %161, %170 : vector<10x128xf32>
    %172 = arith.mulf %171, %171 : vector<10x128xf32>
    %173 = vector.broadcast %8 : vector<1x128xf32> to vector<10x128xf32>
    %174 = arith.mulf %172, %173 : vector<10x128xf32>
    %cst_148 = arith.constant dense<0.000000e+00> : vector<10xf32>
    %175 = vector.multi_reduction <add>, %174, %cst_148 [1] : vector<10x128xf32> to vector<10xf32>
    %176 = vector.shape_cast %175 : vector<10xf32> to vector<10x1xf32>
    %cst_149 = arith.constant 1.562500e-02 : f32
    %177 = vector.broadcast %cst_149 : f32 to vector<10x1xf32>
    %178 = arith.mulf %176, %177 : vector<10x1xf32>
    %cst_150 = arith.constant 9.99999974E-6 : f32
    %179 = vector.broadcast %cst_150 : f32 to vector<10x1xf32>
    %180 = arith.addf %178, %179 : vector<10x1xf32>
    %181 = math.rsqrt %180 : vector<10x1xf32>
    %182 = vector.broadcast %181 : vector<10x1xf32> to vector<10x128xf32>
    %183 = arith.mulf %171, %182 : vector<10x128xf32>
    %184 = vector.broadcast %163 : vector<1x128xf32> to vector<10x128xf32>
    %185 = arith.mulf %183, %184 : vector<10x128xf32>
    %186 = vector.broadcast %165 : vector<1x128xf32> to vector<10x128xf32>
    %187 = arith.addf %185, %186 : vector<10x128xf32>
    %188 = arith.truncf %187 : vector<10x128xf32> to vector<10x128xbf16>
    %c0_151 = arith.constant 0 : index
    %c0_152 = arith.constant 0 : index
    %c0_153 = arith.constant 0 : index
    %189 = vector.load %arg13[%c0_151, %c0_152, %c0_153] : memref<2x128x128xbf16, #tpu.memory_space<vmem>>, vector<1x128x128xbf16>
    %190 = vector.shape_cast %189 : vector<1x128x128xbf16> to vector<128x128xbf16>
    %cst_154 = arith.constant dense<0.000000e+00> : vector<10x128xf32>
    %191 = tpu.matmul %188, %190, %cst_154 {dimension_numbers = #tpu.dot_dimension_numbers<[1], [0], [0], [1], [0, 0, 1, 1], [], []>} : vector<10x128xbf16>, vector<128x128xbf16>, vector<10x128xf32> -> vector<10x128xf32>
    %c0_155 = arith.constant 0 : index
    %c0_156 = arith.constant 0 : index
    %c0_157 = arith.constant 0 : index
    %192 = vector.load %arg14[%c0_155, %c0_156, %c0_157] : memref<2x1x128xf32, #tpu.memory_space<vmem>>, vector<1x1x128xf32>
    %193 = vector.shape_cast %192 : vector<1x1x128xf32> to vector<1x128xf32>
    %194 = vector.broadcast %193 : vector<1x128xf32> to vector<10x128xf32>
    %195 = arith.addf %191, %194 : vector<10x128xf32>
    %cst_158 = arith.constant 0.000000e+00 : f32
    %196 = vector.broadcast %cst_158 : f32 to vector<10x128xf32>
    %197 = arith.maximumf %195, %196 : vector<10x128xf32>
    %198 = arith.truncf %197 : vector<10x128xf32> to vector<10x128xbf16>
    %c0_159 = arith.constant 0 : index
    %c0_160 = arith.constant 0 : index
    %c0_161 = arith.constant 0 : index
    %199 = vector.load %arg15[%c0_159, %c0_160, %c0_161] : memref<2x128x128xbf16, #tpu.memory_space<vmem>>, vector<1x128x128xbf16>
    %200 = vector.shape_cast %199 : vector<1x128x128xbf16> to vector<128x128xbf16>
    %cst_162 = arith.constant dense<0.000000e+00> : vector<10x128xf32>
    %201 = tpu.matmul %198, %200, %cst_162 {dimension_numbers = #tpu.dot_dimension_numbers<[1], [0], [0], [1], [0, 0, 1, 1], [], []>} : vector<10x128xbf16>, vector<128x128xbf16>, vector<10x128xf32> -> vector<10x128xf32>
    %202 = arith.addf %187, %201 : vector<10x128xf32>
    %c0_163 = arith.constant 0 : index
    %c0_164 = arith.constant 0 : index
    %c0_165 = arith.constant 0 : index
    %203 = vector.load %arg16[%c0_163, %c0_164, %c0_165] : memref<2x1x128xf32, #tpu.memory_space<vmem>>, vector<1x1x128xf32>
    %204 = vector.shape_cast %203 : vector<1x1x128xf32> to vector<1x128xf32>
    %205 = vector.broadcast %204 : vector<1x128xf32> to vector<10x128xf32>
    %206 = arith.addf %202, %205 : vector<10x128xf32>
    %c0_166 = arith.constant 0 : index
    %c0_167 = arith.constant 0 : index
    %c0_168 = arith.constant 0 : index
    %207 = vector.load %arg17[%c0_166, %c0_167, %c0_168] : memref<2x1x128xf32, #tpu.memory_space<vmem>>, vector<1x1x128xf32>
    %208 = vector.shape_cast %207 : vector<1x1x128xf32> to vector<1x128xf32>
    %c0_169 = arith.constant 0 : index
    %c0_170 = arith.constant 0 : index
    %c0_171 = arith.constant 0 : index
    %209 = vector.load %arg18[%c0_169, %c0_170, %c0_171] : memref<2x1x128xf32, #tpu.memory_space<vmem>>, vector<1x1x128xf32>
    %210 = vector.shape_cast %209 : vector<1x1x128xf32> to vector<1x128xf32>
    %cst_172 = arith.constant dense<0.000000e+00> : vector<10xf32>
    %211 = vector.multi_reduction <add>, %206, %cst_172 [1] : vector<10x128xf32> to vector<10xf32>
    %212 = vector.shape_cast %211 : vector<10xf32> to vector<10x1xf32>
    %cst_173 = arith.constant 1.562500e-02 : f32
    %213 = vector.broadcast %cst_173 : f32 to vector<10x1xf32>
    %214 = arith.mulf %212, %213 : vector<10x1xf32>
    %215 = vector.broadcast %214 : vector<10x1xf32> to vector<10x128xf32>
    %216 = arith.subf %206, %215 : vector<10x128xf32>
    %217 = arith.mulf %216, %216 : vector<10x128xf32>
    %218 = vector.broadcast %8 : vector<1x128xf32> to vector<10x128xf32>
    %219 = arith.mulf %217, %218 : vector<10x128xf32>
    %cst_174 = arith.constant dense<0.000000e+00> : vector<10xf32>
    %220 = vector.multi_reduction <add>, %219, %cst_174 [1] : vector<10x128xf32> to vector<10xf32>
    %221 = vector.shape_cast %220 : vector<10xf32> to vector<10x1xf32>
    %cst_175 = arith.constant 1.562500e-02 : f32
    %222 = vector.broadcast %cst_175 : f32 to vector<10x1xf32>
    %223 = arith.mulf %221, %222 : vector<10x1xf32>
    %cst_176 = arith.constant 9.99999974E-6 : f32
    %224 = vector.broadcast %cst_176 : f32 to vector<10x1xf32>
    %225 = arith.addf %223, %224 : vector<10x1xf32>
    %226 = math.rsqrt %225 : vector<10x1xf32>
    %227 = vector.broadcast %226 : vector<10x1xf32> to vector<10x128xf32>
    %228 = arith.mulf %216, %227 : vector<10x128xf32>
    %229 = vector.broadcast %208 : vector<1x128xf32> to vector<10x128xf32>
    %230 = arith.mulf %228, %229 : vector<10x128xf32>
    %231 = vector.broadcast %210 : vector<1x128xf32> to vector<10x128xf32>
    %232 = arith.addf %230, %231 : vector<10x128xf32>
    %233 = arith.truncf %232 : vector<10x128xf32> to vector<10x128xbf16>
    %c1_177 = arith.constant 1 : index
    %c0_178 = arith.constant 0 : index
    %c0_179 = arith.constant 0 : index
    %234 = vector.load %arg10[%c1_177, %c0_178, %c0_179] : memref<2x1x128xf32, #tpu.memory_space<vmem>>, vector<1x1x128xf32>
    %235 = vector.shape_cast %234 : vector<1x1x128xf32> to vector<1x128xf32>
    %c1_180 = arith.constant 1 : index
    %c0_181 = arith.constant 0 : index
    %c0_182 = arith.constant 0 : index
    %c0_183 = arith.constant 0 : index
    %236 = vector.load %arg3[%c1_180, %c0_181, %c0_182, %c0_183] : memref<2x4x128x16xbf16, #tpu.memory_space<vmem>>, vector<1x1x128x16xbf16>
    %237 = vector.shape_cast %236 : vector<1x1x128x16xbf16> to vector<128x16xbf16>
    %cst_184 = arith.constant dense<0.000000e+00> : vector<10x16xf32>
    %238 = tpu.matmul %233, %237, %cst_184 {dimension_numbers = #tpu.dot_dimension_numbers<[1], [0], [0], [1], [0, 0, 1, 1], [], []>} : vector<10x128xbf16>, vector<128x16xbf16>, vector<10x16xf32> -> vector<10x16xf32>
    %c1_185 = arith.constant 1 : index
    %c0_186 = arith.constant 0 : index
    %c0_187 = arith.constant 0 : index
    %c0_188 = arith.constant 0 : index
    %239 = vector.load %arg6[%c1_185, %c0_186, %c0_187, %c0_188] : memref<2x4x1x16xf32, #tpu.memory_space<vmem>>, vector<1x1x1x16xf32>
    %240 = vector.shape_cast %239 : vector<1x1x1x16xf32> to vector<1x16xf32>
    %241 = vector.broadcast %240 : vector<1x16xf32> to vector<10x16xf32>
    %242 = arith.addf %238, %241 : vector<10x16xf32>
    %c1_189 = arith.constant 1 : index
    %c0_190 = arith.constant 0 : index
    %c0_191 = arith.constant 0 : index
    %c0_192 = arith.constant 0 : index
    %243 = vector.load %arg4[%c1_189, %c0_190, %c0_191, %c0_192] : memref<2x4x128x16xbf16, #tpu.memory_space<vmem>>, vector<1x1x128x16xbf16>
    %244 = vector.shape_cast %243 : vector<1x1x128x16xbf16> to vector<128x16xbf16>
    %cst_193 = arith.constant dense<0.000000e+00> : vector<10x16xf32>
    %245 = tpu.matmul %233, %244, %cst_193 {dimension_numbers = #tpu.dot_dimension_numbers<[1], [0], [0], [1], [0, 0, 1, 1], [], []>} : vector<10x128xbf16>, vector<128x16xbf16>, vector<10x16xf32> -> vector<10x16xf32>
    %c1_194 = arith.constant 1 : index
    %c0_195 = arith.constant 0 : index
    %c0_196 = arith.constant 0 : index
    %c0_197 = arith.constant 0 : index
    %246 = vector.load %arg7[%c1_194, %c0_195, %c0_196, %c0_197] : memref<2x4x1x16xf32, #tpu.memory_space<vmem>>, vector<1x1x1x16xf32>
    %247 = vector.shape_cast %246 : vector<1x1x1x16xf32> to vector<1x16xf32>
    %248 = vector.broadcast %247 : vector<1x16xf32> to vector<10x16xf32>
    %249 = arith.addf %245, %248 : vector<10x16xf32>
    %c1_198 = arith.constant 1 : index
    %c0_199 = arith.constant 0 : index
    %c0_200 = arith.constant 0 : index
    %c0_201 = arith.constant 0 : index
    %250 = vector.load %arg5[%c1_198, %c0_199, %c0_200, %c0_201] : memref<2x4x128x16xbf16, #tpu.memory_space<vmem>>, vector<1x1x128x16xbf16>
    %251 = vector.shape_cast %250 : vector<1x1x128x16xbf16> to vector<128x16xbf16>
    %cst_202 = arith.constant dense<0.000000e+00> : vector<10x16xf32>
    %252 = tpu.matmul %233, %251, %cst_202 {dimension_numbers = #tpu.dot_dimension_numbers<[1], [0], [0], [1], [0, 0, 1, 1], [], []>} : vector<10x128xbf16>, vector<128x16xbf16>, vector<10x16xf32> -> vector<10x16xf32>
    %c1_203 = arith.constant 1 : index
    %c0_204 = arith.constant 0 : index
    %c0_205 = arith.constant 0 : index
    %c0_206 = arith.constant 0 : index
    %253 = vector.load %arg8[%c1_203, %c0_204, %c0_205, %c0_206] : memref<2x4x1x16xf32, #tpu.memory_space<vmem>>, vector<1x1x1x16xf32>
    %254 = vector.shape_cast %253 : vector<1x1x1x16xf32> to vector<1x16xf32>
    %255 = vector.broadcast %254 : vector<1x16xf32> to vector<10x16xf32>
    %256 = arith.addf %252, %255 : vector<10x16xf32>
    %cst_207 = arith.constant dense<0.000000e+00> : vector<10x10xf32>
    %257 = tpu.matmul %242, %249, %cst_207 {dimension_numbers = #tpu.dot_dimension_numbers<[1], [1], [0], [0], [0, 0, 1, 0], [], []>} : vector<10x16xf32>, vector<10x16xf32>, vector<10x10xf32> -> vector<10x10xf32>
    %cst_208 = arith.constant dense<0xFF800000> : vector<10xf32>
    %258 = vector.multi_reduction <maximumf>, %257, %cst_208 [1] : vector<10x10xf32> to vector<10xf32>
    %259 = vector.shape_cast %258 : vector<10xf32> to vector<10x1xf32>
    %260 = vector.broadcast %259 : vector<10x1xf32> to vector<10x10xf32>
    %261 = arith.subf %257, %260 : vector<10x10xf32>
    %262 = math.exp %261 : vector<10x10xf32>
    %cst_209 = arith.constant dense<0.000000e+00> : vector<10xf32>
    %263 = vector.multi_reduction <add>, %262, %cst_209 [1] : vector<10x10xf32> to vector<10xf32>
    %264 = vector.shape_cast %263 : vector<10xf32> to vector<10x1xf32>
    %265 = vector.broadcast %264 : vector<10x1xf32> to vector<10x10xf32>
    %266 = arith.divf %262, %265 : vector<10x10xf32>
    %cst_210 = arith.constant dense<0.000000e+00> : vector<10x16xf32>
    %267 = tpu.matmul %266, %256, %cst_210 {dimension_numbers = #tpu.dot_dimension_numbers<[1], [0], [0], [1], [0, 0, 1, 1], [], []>} : vector<10x10xf32>, vector<10x16xf32>, vector<10x16xf32> -> vector<10x16xf32>
    %268 = arith.truncf %267 : vector<10x16xf32> to vector<10x16xbf16>
    %c1_211 = arith.constant 1 : index
    %c0_212 = arith.constant 0 : index
    %c0_213 = arith.constant 0 : index
    %269 = vector.load %arg9[%c1_211, %c0_212, %c0_213] : memref<2x64x128xbf16, #tpu.memory_space<vmem>>, vector<1x16x128xbf16>
    %270 = vector.shape_cast %269 : vector<1x16x128xbf16> to vector<16x128xbf16>
    %cst_214 = arith.constant dense<0.000000e+00> : vector<10x128xf32>
    %271 = tpu.matmul %268, %270, %cst_214 {dimension_numbers = #tpu.dot_dimension_numbers<[1], [0], [0], [1], [0, 0, 1, 1], [], []>} : vector<10x16xbf16>, vector<16x128xbf16>, vector<10x128xf32> -> vector<10x128xf32>
    %272 = vector.broadcast %235 : vector<1x128xf32> to vector<10x128xf32>
    %273 = arith.addf %272, %271 : vector<10x128xf32>
    %c1_215 = arith.constant 1 : index
    %c1_216 = arith.constant 1 : index
    %c0_217 = arith.constant 0 : index
    %c0_218 = arith.constant 0 : index
    %274 = vector.load %arg3[%c1_215, %c1_216, %c0_217, %c0_218] : memref<2x4x128x16xbf16, #tpu.memory_space<vmem>>, vector<1x1x128x16xbf16>
    %275 = vector.shape_cast %274 : vector<1x1x128x16xbf16> to vector<128x16xbf16>
    %cst_219 = arith.constant dense<0.000000e+00> : vector<10x16xf32>
    %276 = tpu.matmul %233, %275, %cst_219 {dimension_numbers = #tpu.dot_dimension_numbers<[1], [0], [0], [1], [0, 0, 1, 1], [], []>} : vector<10x128xbf16>, vector<128x16xbf16>, vector<10x16xf32> -> vector<10x16xf32>
    %c1_220 = arith.constant 1 : index
    %c1_221 = arith.constant 1 : index
    %c0_222 = arith.constant 0 : index
    %c0_223 = arith.constant 0 : index
    %277 = vector.load %arg6[%c1_220, %c1_221, %c0_222, %c0_223] : memref<2x4x1x16xf32, #tpu.memory_space<vmem>>, vector<1x1x1x16xf32>
    %278 = vector.shape_cast %277 : vector<1x1x1x16xf32> to vector<1x16xf32>
    %279 = vector.broadcast %278 : vector<1x16xf32> to vector<10x16xf32>
    %280 = arith.addf %276, %279 : vector<10x16xf32>
    %c1_224 = arith.constant 1 : index
    %c1_225 = arith.constant 1 : index
    %c0_226 = arith.constant 0 : index
    %c0_227 = arith.constant 0 : index
    %281 = vector.load %arg4[%c1_224, %c1_225, %c0_226, %c0_227] : memref<2x4x128x16xbf16, #tpu.memory_space<vmem>>, vector<1x1x128x16xbf16>
    %282 = vector.shape_cast %281 : vector<1x1x128x16xbf16> to vector<128x16xbf16>
    %cst_228 = arith.constant dense<0.000000e+00> : vector<10x16xf32>
    %283 = tpu.matmul %233, %282, %cst_228 {dimension_numbers = #tpu.dot_dimension_numbers<[1], [0], [0], [1], [0, 0, 1, 1], [], []>} : vector<10x128xbf16>, vector<128x16xbf16>, vector<10x16xf32> -> vector<10x16xf32>
    %c1_229 = arith.constant 1 : index
    %c1_230 = arith.constant 1 : index
    %c0_231 = arith.constant 0 : index
    %c0_232 = arith.constant 0 : index
    %284 = vector.load %arg7[%c1_229, %c1_230, %c0_231, %c0_232] : memref<2x4x1x16xf32, #tpu.memory_space<vmem>>, vector<1x1x1x16xf32>
    %285 = vector.shape_cast %284 : vector<1x1x1x16xf32> to vector<1x16xf32>
    %286 = vector.broadcast %285 : vector<1x16xf32> to vector<10x16xf32>
    %287 = arith.addf %283, %286 : vector<10x16xf32>
    %c1_233 = arith.constant 1 : index
    %c1_234 = arith.constant 1 : index
    %c0_235 = arith.constant 0 : index
    %c0_236 = arith.constant 0 : index
    %288 = vector.load %arg5[%c1_233, %c1_234, %c0_235, %c0_236] : memref<2x4x128x16xbf16, #tpu.memory_space<vmem>>, vector<1x1x128x16xbf16>
    %289 = vector.shape_cast %288 : vector<1x1x128x16xbf16> to vector<128x16xbf16>
    %cst_237 = arith.constant dense<0.000000e+00> : vector<10x16xf32>
    %290 = tpu.matmul %233, %289, %cst_237 {dimension_numbers = #tpu.dot_dimension_numbers<[1], [0], [0], [1], [0, 0, 1, 1], [], []>} : vector<10x128xbf16>, vector<128x16xbf16>, vector<10x16xf32> -> vector<10x16xf32>
    %c1_238 = arith.constant 1 : index
    %c1_239 = arith.constant 1 : index
    %c0_240 = arith.constant 0 : index
    %c0_241 = arith.constant 0 : index
    %291 = vector.load %arg8[%c1_238, %c1_239, %c0_240, %c0_241] : memref<2x4x1x16xf32, #tpu.memory_space<vmem>>, vector<1x1x1x16xf32>
    %292 = vector.shape_cast %291 : vector<1x1x1x16xf32> to vector<1x16xf32>
    %293 = vector.broadcast %292 : vector<1x16xf32> to vector<10x16xf32>
    %294 = arith.addf %290, %293 : vector<10x16xf32>
    %cst_242 = arith.constant dense<0.000000e+00> : vector<10x10xf32>
    %295 = tpu.matmul %280, %287, %cst_242 {dimension_numbers = #tpu.dot_dimension_numbers<[1], [1], [0], [0], [0, 0, 1, 0], [], []>} : vector<10x16xf32>, vector<10x16xf32>, vector<10x10xf32> -> vector<10x10xf32>
    %cst_243 = arith.constant dense<0xFF800000> : vector<10xf32>
    %296 = vector.multi_reduction <maximumf>, %295, %cst_243 [1] : vector<10x10xf32> to vector<10xf32>
    %297 = vector.shape_cast %296 : vector<10xf32> to vector<10x1xf32>
    %298 = vector.broadcast %297 : vector<10x1xf32> to vector<10x10xf32>
    %299 = arith.subf %295, %298 : vector<10x10xf32>
    %300 = math.exp %299 : vector<10x10xf32>
    %cst_244 = arith.constant dense<0.000000e+00> : vector<10xf32>
    %301 = vector.multi_reduction <add>, %300, %cst_244 [1] : vector<10x10xf32> to vector<10xf32>
    %302 = vector.shape_cast %301 : vector<10xf32> to vector<10x1xf32>
    %303 = vector.broadcast %302 : vector<10x1xf32> to vector<10x10xf32>
    %304 = arith.divf %300, %303 : vector<10x10xf32>
    %cst_245 = arith.constant dense<0.000000e+00> : vector<10x16xf32>
    %305 = tpu.matmul %304, %294, %cst_245 {dimension_numbers = #tpu.dot_dimension_numbers<[1], [0], [0], [1], [0, 0, 1, 1], [], []>} : vector<10x10xf32>, vector<10x16xf32>, vector<10x16xf32> -> vector<10x16xf32>
    %306 = arith.truncf %305 : vector<10x16xf32> to vector<10x16xbf16>
    %c1_246 = arith.constant 1 : index
    %c16_247 = arith.constant 16 : index
    %c0_248 = arith.constant 0 : index
    %307 = vector.load %arg9[%c1_246, %c16_247, %c0_248] : memref<2x64x128xbf16, #tpu.memory_space<vmem>>, vector<1x16x128xbf16>
    %308 = vector.shape_cast %307 : vector<1x16x128xbf16> to vector<16x128xbf16>
    %cst_249 = arith.constant dense<0.000000e+00> : vector<10x128xf32>
    %309 = tpu.matmul %306, %308, %cst_249 {dimension_numbers = #tpu.dot_dimension_numbers<[1], [0], [0], [1], [0, 0, 1, 1], [], []>} : vector<10x16xbf16>, vector<16x128xbf16>, vector<10x128xf32> -> vector<10x128xf32>
    %310 = arith.addf %273, %309 : vector<10x128xf32>
    %c1_250 = arith.constant 1 : index
    %c2_251 = arith.constant 2 : index
    %c0_252 = arith.constant 0 : index
    %c0_253 = arith.constant 0 : index
    %311 = vector.load %arg3[%c1_250, %c2_251, %c0_252, %c0_253] : memref<2x4x128x16xbf16, #tpu.memory_space<vmem>>, vector<1x1x128x16xbf16>
    %312 = vector.shape_cast %311 : vector<1x1x128x16xbf16> to vector<128x16xbf16>
    %cst_254 = arith.constant dense<0.000000e+00> : vector<10x16xf32>
    %313 = tpu.matmul %233, %312, %cst_254 {dimension_numbers = #tpu.dot_dimension_numbers<[1], [0], [0], [1], [0, 0, 1, 1], [], []>} : vector<10x128xbf16>, vector<128x16xbf16>, vector<10x16xf32> -> vector<10x16xf32>
    %c1_255 = arith.constant 1 : index
    %c2_256 = arith.constant 2 : index
    %c0_257 = arith.constant 0 : index
    %c0_258 = arith.constant 0 : index
    %314 = vector.load %arg6[%c1_255, %c2_256, %c0_257, %c0_258] : memref<2x4x1x16xf32, #tpu.memory_space<vmem>>, vector<1x1x1x16xf32>
    %315 = vector.shape_cast %314 : vector<1x1x1x16xf32> to vector<1x16xf32>
    %316 = vector.broadcast %315 : vector<1x16xf32> to vector<10x16xf32>
    %317 = arith.addf %313, %316 : vector<10x16xf32>
    %c1_259 = arith.constant 1 : index
    %c2_260 = arith.constant 2 : index
    %c0_261 = arith.constant 0 : index
    %c0_262 = arith.constant 0 : index
    %318 = vector.load %arg4[%c1_259, %c2_260, %c0_261, %c0_262] : memref<2x4x128x16xbf16, #tpu.memory_space<vmem>>, vector<1x1x128x16xbf16>
    %319 = vector.shape_cast %318 : vector<1x1x128x16xbf16> to vector<128x16xbf16>
    %cst_263 = arith.constant dense<0.000000e+00> : vector<10x16xf32>
    %320 = tpu.matmul %233, %319, %cst_263 {dimension_numbers = #tpu.dot_dimension_numbers<[1], [0], [0], [1], [0, 0, 1, 1], [], []>} : vector<10x128xbf16>, vector<128x16xbf16>, vector<10x16xf32> -> vector<10x16xf32>
    %c1_264 = arith.constant 1 : index
    %c2_265 = arith.constant 2 : index
    %c0_266 = arith.constant 0 : index
    %c0_267 = arith.constant 0 : index
    %321 = vector.load %arg7[%c1_264, %c2_265, %c0_266, %c0_267] : memref<2x4x1x16xf32, #tpu.memory_space<vmem>>, vector<1x1x1x16xf32>
    %322 = vector.shape_cast %321 : vector<1x1x1x16xf32> to vector<1x16xf32>
    %323 = vector.broadcast %322 : vector<1x16xf32> to vector<10x16xf32>
    %324 = arith.addf %320, %323 : vector<10x16xf32>
    %c1_268 = arith.constant 1 : index
    %c2_269 = arith.constant 2 : index
    %c0_270 = arith.constant 0 : index
    %c0_271 = arith.constant 0 : index
    %325 = vector.load %arg5[%c1_268, %c2_269, %c0_270, %c0_271] : memref<2x4x128x16xbf16, #tpu.memory_space<vmem>>, vector<1x1x128x16xbf16>
    %326 = vector.shape_cast %325 : vector<1x1x128x16xbf16> to vector<128x16xbf16>
    %cst_272 = arith.constant dense<0.000000e+00> : vector<10x16xf32>
    %327 = tpu.matmul %233, %326, %cst_272 {dimension_numbers = #tpu.dot_dimension_numbers<[1], [0], [0], [1], [0, 0, 1, 1], [], []>} : vector<10x128xbf16>, vector<128x16xbf16>, vector<10x16xf32> -> vector<10x16xf32>
    %c1_273 = arith.constant 1 : index
    %c2_274 = arith.constant 2 : index
    %c0_275 = arith.constant 0 : index
    %c0_276 = arith.constant 0 : index
    %328 = vector.load %arg8[%c1_273, %c2_274, %c0_275, %c0_276] : memref<2x4x1x16xf32, #tpu.memory_space<vmem>>, vector<1x1x1x16xf32>
    %329 = vector.shape_cast %328 : vector<1x1x1x16xf32> to vector<1x16xf32>
    %330 = vector.broadcast %329 : vector<1x16xf32> to vector<10x16xf32>
    %331 = arith.addf %327, %330 : vector<10x16xf32>
    %cst_277 = arith.constant dense<0.000000e+00> : vector<10x10xf32>
    %332 = tpu.matmul %317, %324, %cst_277 {dimension_numbers = #tpu.dot_dimension_numbers<[1], [1], [0], [0], [0, 0, 1, 0], [], []>} : vector<10x16xf32>, vector<10x16xf32>, vector<10x10xf32> -> vector<10x10xf32>
    %cst_278 = arith.constant dense<0xFF800000> : vector<10xf32>
    %333 = vector.multi_reduction <maximumf>, %332, %cst_278 [1] : vector<10x10xf32> to vector<10xf32>
    %334 = vector.shape_cast %333 : vector<10xf32> to vector<10x1xf32>
    %335 = vector.broadcast %334 : vector<10x1xf32> to vector<10x10xf32>
    %336 = arith.subf %332, %335 : vector<10x10xf32>
    %337 = math.exp %336 : vector<10x10xf32>
    %cst_279 = arith.constant dense<0.000000e+00> : vector<10xf32>
    %338 = vector.multi_reduction <add>, %337, %cst_279 [1] : vector<10x10xf32> to vector<10xf32>
    %339 = vector.shape_cast %338 : vector<10xf32> to vector<10x1xf32>
    %340 = vector.broadcast %339 : vector<10x1xf32> to vector<10x10xf32>
    %341 = arith.divf %337, %340 : vector<10x10xf32>
    %cst_280 = arith.constant dense<0.000000e+00> : vector<10x16xf32>
    %342 = tpu.matmul %341, %331, %cst_280 {dimension_numbers = #tpu.dot_dimension_numbers<[1], [0], [0], [1], [0, 0, 1, 1], [], []>} : vector<10x10xf32>, vector<10x16xf32>, vector<10x16xf32> -> vector<10x16xf32>
    %343 = arith.truncf %342 : vector<10x16xf32> to vector<10x16xbf16>
    %c1_281 = arith.constant 1 : index
    %c32_282 = arith.constant 32 : index
    %c0_283 = arith.constant 0 : index
    %344 = vector.load %arg9[%c1_281, %c32_282, %c0_283] : memref<2x64x128xbf16, #tpu.memory_space<vmem>>, vector<1x16x128xbf16>
    %345 = vector.shape_cast %344 : vector<1x16x128xbf16> to vector<16x128xbf16>
    %cst_284 = arith.constant dense<0.000000e+00> : vector<10x128xf32>
    %346 = tpu.matmul %343, %345, %cst_284 {dimension_numbers = #tpu.dot_dimension_numbers<[1], [0], [0], [1], [0, 0, 1, 1], [], []>} : vector<10x16xbf16>, vector<16x128xbf16>, vector<10x128xf32> -> vector<10x128xf32>
    %347 = arith.addf %310, %346 : vector<10x128xf32>
    %c1_285 = arith.constant 1 : index
    %c3_286 = arith.constant 3 : index
    %c0_287 = arith.constant 0 : index
    %c0_288 = arith.constant 0 : index
    %348 = vector.load %arg3[%c1_285, %c3_286, %c0_287, %c0_288] : memref<2x4x128x16xbf16, #tpu.memory_space<vmem>>, vector<1x1x128x16xbf16>
    %349 = vector.shape_cast %348 : vector<1x1x128x16xbf16> to vector<128x16xbf16>
    %cst_289 = arith.constant dense<0.000000e+00> : vector<10x16xf32>
    %350 = tpu.matmul %233, %349, %cst_289 {dimension_numbers = #tpu.dot_dimension_numbers<[1], [0], [0], [1], [0, 0, 1, 1], [], []>} : vector<10x128xbf16>, vector<128x16xbf16>, vector<10x16xf32> -> vector<10x16xf32>
    %c1_290 = arith.constant 1 : index
    %c3_291 = arith.constant 3 : index
    %c0_292 = arith.constant 0 : index
    %c0_293 = arith.constant 0 : index
    %351 = vector.load %arg6[%c1_290, %c3_291, %c0_292, %c0_293] : memref<2x4x1x16xf32, #tpu.memory_space<vmem>>, vector<1x1x1x16xf32>
    %352 = vector.shape_cast %351 : vector<1x1x1x16xf32> to vector<1x16xf32>
    %353 = vector.broadcast %352 : vector<1x16xf32> to vector<10x16xf32>
    %354 = arith.addf %350, %353 : vector<10x16xf32>
    %c1_294 = arith.constant 1 : index
    %c3_295 = arith.constant 3 : index
    %c0_296 = arith.constant 0 : index
    %c0_297 = arith.constant 0 : index
    %355 = vector.load %arg4[%c1_294, %c3_295, %c0_296, %c0_297] : memref<2x4x128x16xbf16, #tpu.memory_space<vmem>>, vector<1x1x128x16xbf16>
    %356 = vector.shape_cast %355 : vector<1x1x128x16xbf16> to vector<128x16xbf16>
    %cst_298 = arith.constant dense<0.000000e+00> : vector<10x16xf32>
    %357 = tpu.matmul %233, %356, %cst_298 {dimension_numbers = #tpu.dot_dimension_numbers<[1], [0], [0], [1], [0, 0, 1, 1], [], []>} : vector<10x128xbf16>, vector<128x16xbf16>, vector<10x16xf32> -> vector<10x16xf32>
    %c1_299 = arith.constant 1 : index
    %c3_300 = arith.constant 3 : index
    %c0_301 = arith.constant 0 : index
    %c0_302 = arith.constant 0 : index
    %358 = vector.load %arg7[%c1_299, %c3_300, %c0_301, %c0_302] : memref<2x4x1x16xf32, #tpu.memory_space<vmem>>, vector<1x1x1x16xf32>
    %359 = vector.shape_cast %358 : vector<1x1x1x16xf32> to vector<1x16xf32>
    %360 = vector.broadcast %359 : vector<1x16xf32> to vector<10x16xf32>
    %361 = arith.addf %357, %360 : vector<10x16xf32>
    %c1_303 = arith.constant 1 : index
    %c3_304 = arith.constant 3 : index
    %c0_305 = arith.constant 0 : index
    %c0_306 = arith.constant 0 : index
    %362 = vector.load %arg5[%c1_303, %c3_304, %c0_305, %c0_306] : memref<2x4x128x16xbf16, #tpu.memory_space<vmem>>, vector<1x1x128x16xbf16>
    %363 = vector.shape_cast %362 : vector<1x1x128x16xbf16> to vector<128x16xbf16>
    %cst_307 = arith.constant dense<0.000000e+00> : vector<10x16xf32>
    %364 = tpu.matmul %233, %363, %cst_307 {dimension_numbers = #tpu.dot_dimension_numbers<[1], [0], [0], [1], [0, 0, 1, 1], [], []>} : vector<10x128xbf16>, vector<128x16xbf16>, vector<10x16xf32> -> vector<10x16xf32>
    %c1_308 = arith.constant 1 : index
    %c3_309 = arith.constant 3 : index
    %c0_310 = arith.constant 0 : index
    %c0_311 = arith.constant 0 : index
    %365 = vector.load %arg8[%c1_308, %c3_309, %c0_310, %c0_311] : memref<2x4x1x16xf32, #tpu.memory_space<vmem>>, vector<1x1x1x16xf32>
    %366 = vector.shape_cast %365 : vector<1x1x1x16xf32> to vector<1x16xf32>
    %367 = vector.broadcast %366 : vector<1x16xf32> to vector<10x16xf32>
    %368 = arith.addf %364, %367 : vector<10x16xf32>
    %cst_312 = arith.constant dense<0.000000e+00> : vector<10x10xf32>
    %369 = tpu.matmul %354, %361, %cst_312 {dimension_numbers = #tpu.dot_dimension_numbers<[1], [1], [0], [0], [0, 0, 1, 0], [], []>} : vector<10x16xf32>, vector<10x16xf32>, vector<10x10xf32> -> vector<10x10xf32>
    %cst_313 = arith.constant dense<0xFF800000> : vector<10xf32>
    %370 = vector.multi_reduction <maximumf>, %369, %cst_313 [1] : vector<10x10xf32> to vector<10xf32>
    %371 = vector.shape_cast %370 : vector<10xf32> to vector<10x1xf32>
    %372 = vector.broadcast %371 : vector<10x1xf32> to vector<10x10xf32>
    %373 = arith.subf %369, %372 : vector<10x10xf32>
    %374 = math.exp %373 : vector<10x10xf32>
    %cst_314 = arith.constant dense<0.000000e+00> : vector<10xf32>
    %375 = vector.multi_reduction <add>, %374, %cst_314 [1] : vector<10x10xf32> to vector<10xf32>
    %376 = vector.shape_cast %375 : vector<10xf32> to vector<10x1xf32>
    %377 = vector.broadcast %376 : vector<10x1xf32> to vector<10x10xf32>
    %378 = arith.divf %374, %377 : vector<10x10xf32>
    %cst_315 = arith.constant dense<0.000000e+00> : vector<10x16xf32>
    %379 = tpu.matmul %378, %368, %cst_315 {dimension_numbers = #tpu.dot_dimension_numbers<[1], [0], [0], [1], [0, 0, 1, 1], [], []>} : vector<10x10xf32>, vector<10x16xf32>, vector<10x16xf32> -> vector<10x16xf32>
    %380 = arith.truncf %379 : vector<10x16xf32> to vector<10x16xbf16>
    %c1_316 = arith.constant 1 : index
    %c48_317 = arith.constant 48 : index
    %c0_318 = arith.constant 0 : index
    %381 = vector.load %arg9[%c1_316, %c48_317, %c0_318] : memref<2x64x128xbf16, #tpu.memory_space<vmem>>, vector<1x16x128xbf16>
    %382 = vector.shape_cast %381 : vector<1x16x128xbf16> to vector<16x128xbf16>
    %cst_319 = arith.constant dense<0.000000e+00> : vector<10x128xf32>
    %383 = tpu.matmul %380, %382, %cst_319 {dimension_numbers = #tpu.dot_dimension_numbers<[1], [0], [0], [1], [0, 0, 1, 1], [], []>} : vector<10x16xbf16>, vector<16x128xbf16>, vector<10x128xf32> -> vector<10x128xf32>
    %384 = arith.addf %347, %383 : vector<10x128xf32>
    %385 = arith.addf %232, %384 : vector<10x128xf32>
    %c1_320 = arith.constant 1 : index
    %c0_321 = arith.constant 0 : index
    %c0_322 = arith.constant 0 : index
    %386 = vector.load %arg11[%c1_320, %c0_321, %c0_322] : memref<2x1x128xf32, #tpu.memory_space<vmem>>, vector<1x1x128xf32>
    %387 = vector.shape_cast %386 : vector<1x1x128xf32> to vector<1x128xf32>
    %c1_323 = arith.constant 1 : index
    %c0_324 = arith.constant 0 : index
    %c0_325 = arith.constant 0 : index
    %388 = vector.load %arg12[%c1_323, %c0_324, %c0_325] : memref<2x1x128xf32, #tpu.memory_space<vmem>>, vector<1x1x128xf32>
    %389 = vector.shape_cast %388 : vector<1x1x128xf32> to vector<1x128xf32>
    %cst_326 = arith.constant dense<0.000000e+00> : vector<10xf32>
    %390 = vector.multi_reduction <add>, %385, %cst_326 [1] : vector<10x128xf32> to vector<10xf32>
    %391 = vector.shape_cast %390 : vector<10xf32> to vector<10x1xf32>
    %cst_327 = arith.constant 1.562500e-02 : f32
    %392 = vector.broadcast %cst_327 : f32 to vector<10x1xf32>
    %393 = arith.mulf %391, %392 : vector<10x1xf32>
    %394 = vector.broadcast %393 : vector<10x1xf32> to vector<10x128xf32>
    %395 = arith.subf %385, %394 : vector<10x128xf32>
    %396 = arith.mulf %395, %395 : vector<10x128xf32>
    %397 = vector.broadcast %8 : vector<1x128xf32> to vector<10x128xf32>
    %398 = arith.mulf %396, %397 : vector<10x128xf32>
    %cst_328 = arith.constant dense<0.000000e+00> : vector<10xf32>
    %399 = vector.multi_reduction <add>, %398, %cst_328 [1] : vector<10x128xf32> to vector<10xf32>
    %400 = vector.shape_cast %399 : vector<10xf32> to vector<10x1xf32>
    %cst_329 = arith.constant 1.562500e-02 : f32
    %401 = vector.broadcast %cst_329 : f32 to vector<10x1xf32>
    %402 = arith.mulf %400, %401 : vector<10x1xf32>
    %cst_330 = arith.constant 9.99999974E-6 : f32
    %403 = vector.broadcast %cst_330 : f32 to vector<10x1xf32>
    %404 = arith.addf %402, %403 : vector<10x1xf32>
    %405 = math.rsqrt %404 : vector<10x1xf32>
    %406 = vector.broadcast %405 : vector<10x1xf32> to vector<10x128xf32>
    %407 = arith.mulf %395, %406 : vector<10x128xf32>
    %408 = vector.broadcast %387 : vector<1x128xf32> to vector<10x128xf32>
    %409 = arith.mulf %407, %408 : vector<10x128xf32>
    %410 = vector.broadcast %389 : vector<1x128xf32> to vector<10x128xf32>
    %411 = arith.addf %409, %410 : vector<10x128xf32>
    %412 = arith.truncf %411 : vector<10x128xf32> to vector<10x128xbf16>
    %c1_331 = arith.constant 1 : index
    %c0_332 = arith.constant 0 : index
    %c0_333 = arith.constant 0 : index
    %413 = vector.load %arg13[%c1_331, %c0_332, %c0_333] : memref<2x128x128xbf16, #tpu.memory_space<vmem>>, vector<1x128x128xbf16>
    %414 = vector.shape_cast %413 : vector<1x128x128xbf16> to vector<128x128xbf16>
    %cst_334 = arith.constant dense<0.000000e+00> : vector<10x128xf32>
    %415 = tpu.matmul %412, %414, %cst_334 {dimension_numbers = #tpu.dot_dimension_numbers<[1], [0], [0], [1], [0, 0, 1, 1], [], []>} : vector<10x128xbf16>, vector<128x128xbf16>, vector<10x128xf32> -> vector<10x128xf32>
    %c1_335 = arith.constant 1 : index
    %c0_336 = arith.constant 0 : index
    %c0_337 = arith.constant 0 : index
    %416 = vector.load %arg14[%c1_335, %c0_336, %c0_337] : memref<2x1x128xf32, #tpu.memory_space<vmem>>, vector<1x1x128xf32>
    %417 = vector.shape_cast %416 : vector<1x1x128xf32> to vector<1x128xf32>
    %418 = vector.broadcast %417 : vector<1x128xf32> to vector<10x128xf32>
    %419 = arith.addf %415, %418 : vector<10x128xf32>
    %cst_338 = arith.constant 0.000000e+00 : f32
    %420 = vector.broadcast %cst_338 : f32 to vector<10x128xf32>
    %421 = arith.maximumf %419, %420 : vector<10x128xf32>
    %422 = arith.truncf %421 : vector<10x128xf32> to vector<10x128xbf16>
    %c1_339 = arith.constant 1 : index
    %c0_340 = arith.constant 0 : index
    %c0_341 = arith.constant 0 : index
    %423 = vector.load %arg15[%c1_339, %c0_340, %c0_341] : memref<2x128x128xbf16, #tpu.memory_space<vmem>>, vector<1x128x128xbf16>
    %424 = vector.shape_cast %423 : vector<1x128x128xbf16> to vector<128x128xbf16>
    %cst_342 = arith.constant dense<0.000000e+00> : vector<10x128xf32>
    %425 = tpu.matmul %422, %424, %cst_342 {dimension_numbers = #tpu.dot_dimension_numbers<[1], [0], [0], [1], [0, 0, 1, 1], [], []>} : vector<10x128xbf16>, vector<128x128xbf16>, vector<10x128xf32> -> vector<10x128xf32>
    %426 = arith.addf %411, %425 : vector<10x128xf32>
    %c1_343 = arith.constant 1 : index
    %c0_344 = arith.constant 0 : index
    %c0_345 = arith.constant 0 : index
    %427 = vector.load %arg16[%c1_343, %c0_344, %c0_345] : memref<2x1x128xf32, #tpu.memory_space<vmem>>, vector<1x1x128xf32>
    %428 = vector.shape_cast %427 : vector<1x1x128xf32> to vector<1x128xf32>
    %429 = vector.broadcast %428 : vector<1x128xf32> to vector<10x128xf32>
    %430 = arith.addf %426, %429 : vector<10x128xf32>
    %c1_346 = arith.constant 1 : index
    %c0_347 = arith.constant 0 : index
    %c0_348 = arith.constant 0 : index
    %431 = vector.load %arg17[%c1_346, %c0_347, %c0_348] : memref<2x1x128xf32, #tpu.memory_space<vmem>>, vector<1x1x128xf32>
    %432 = vector.shape_cast %431 : vector<1x1x128xf32> to vector<1x128xf32>
    %c1_349 = arith.constant 1 : index
    %c0_350 = arith.constant 0 : index
    %c0_351 = arith.constant 0 : index
    %433 = vector.load %arg18[%c1_349, %c0_350, %c0_351] : memref<2x1x128xf32, #tpu.memory_space<vmem>>, vector<1x1x128xf32>
    %434 = vector.shape_cast %433 : vector<1x1x128xf32> to vector<1x128xf32>
    %cst_352 = arith.constant dense<0.000000e+00> : vector<10xf32>
    %435 = vector.multi_reduction <add>, %430, %cst_352 [1] : vector<10x128xf32> to vector<10xf32>
    %436 = vector.shape_cast %435 : vector<10xf32> to vector<10x1xf32>
    %cst_353 = arith.constant 1.562500e-02 : f32
    %437 = vector.broadcast %cst_353 : f32 to vector<10x1xf32>
    %438 = arith.mulf %436, %437 : vector<10x1xf32>
    %439 = vector.broadcast %438 : vector<10x1xf32> to vector<10x128xf32>
    %440 = arith.subf %430, %439 : vector<10x128xf32>
    %441 = arith.mulf %440, %440 : vector<10x128xf32>
    %442 = vector.broadcast %8 : vector<1x128xf32> to vector<10x128xf32>
    %443 = arith.mulf %441, %442 : vector<10x128xf32>
    %cst_354 = arith.constant dense<0.000000e+00> : vector<10xf32>
    %444 = vector.multi_reduction <add>, %443, %cst_354 [1] : vector<10x128xf32> to vector<10xf32>
    %445 = vector.shape_cast %444 : vector<10xf32> to vector<10x1xf32>
    %cst_355 = arith.constant 1.562500e-02 : f32
    %446 = vector.broadcast %cst_355 : f32 to vector<10x1xf32>
    %447 = arith.mulf %445, %446 : vector<10x1xf32>
    %cst_356 = arith.constant 9.99999974E-6 : f32
    %448 = vector.broadcast %cst_356 : f32 to vector<10x1xf32>
    %449 = arith.addf %447, %448 : vector<10x1xf32>
    %450 = math.rsqrt %449 : vector<10x1xf32>
    %451 = vector.broadcast %450 : vector<10x1xf32> to vector<10x128xf32>
    %452 = arith.mulf %440, %451 : vector<10x128xf32>
    %453 = vector.broadcast %432 : vector<1x128xf32> to vector<10x128xf32>
    %454 = arith.mulf %452, %453 : vector<10x128xf32>
    %455 = vector.broadcast %434 : vector<1x128xf32> to vector<10x128xf32>
    %456 = arith.addf %454, %455 : vector<10x128xf32>
    %457 = arith.truncf %456 : vector<10x128xf32> to vector<10x128xbf16>
    %c0_357 = arith.constant 0 : index
    %c0_358 = arith.constant 0 : index
    %458 = vector.load %arg19[%c0_357, %c0_358] : memref<128x128xbf16, #tpu.memory_space<vmem>>, vector<128x128xbf16>
    %cst_359 = arith.constant dense<0.000000e+00> : vector<10x128xf32>
    %459 = tpu.matmul %457, %458, %cst_359 {dimension_numbers = #tpu.dot_dimension_numbers<[1], [0], [0], [1], [0, 0, 1, 1], [], []>} : vector<10x128xbf16>, vector<128x128xbf16>, vector<10x128xf32> -> vector<10x128xf32>
    %c0_360 = arith.constant 0 : index
    %c0_361 = arith.constant 0 : index
    %460 = vector.load %arg20[%c0_360, %c0_361] : memref<1x128xf32, #tpu.memory_space<vmem>>, vector<1x128xf32>
    %461 = vector.broadcast %460 : vector<1x128xf32> to vector<10x128xf32>
    %462 = arith.addf %459, %461 : vector<10x128xf32>
    %c0_362 = arith.constant 0 : index
    %c0_363 = arith.constant 0 : index
    %c0_364 = arith.constant 0 : index
    %463 = vector.load %arg21[%c0_362, %c0_363, %c0_364] : memref<1x10x128xf32, #tpu.memory_space<vmem>>, vector<1x10x128xf32>
    %464 = vector.shape_cast %463 : vector<1x10x128xf32> to vector<10x128xf32>
    %465 = vector.shape_cast %462 : vector<10x128xf32> to vector<1x10x128xf32>
    tpu.vector_store %arg21[%c0_362, %c0_363, %c0_364], %465 {strides = array<i32>} : memref<1x10x128xf32, #tpu.memory_space<vmem>>, vector<1x10x128xf32>,
    return
  }
  func.func @transform_0(%arg0: i32) -> (i32, i32, i32) {
    %c0_i32 = arith.constant 0 : i32
    %c0_i32_0 = arith.constant 0 : i32
    %c0_i32_1 = arith.constant 0 : i32
    return %arg0, %c0_i32, %c0_i32_0 : i32, i32, i32
  }
  func.func @transform_1(%arg0: i32) -> (i32, i32) {
    %c0_i32 = arith.constant 0 : i32
    %c0_i32_0 = arith.constant 0 : i32
    %c0_i32_1 = arith.constant 0 : i32
    return %c0_i32, %c0_i32_0 : i32, i32
  }
  func.func @transform_2(%arg0: i32) -> (i32, i32, i32, i32) {
    %c0_i32 = arith.constant 0 : i32
    %c0_i32_0 = arith.constant 0 : i32
    %c0_i32_1 = arith.constant 0 : i32
    %c0_i32_2 = arith.constant 0 : i32
    %c0_i32_3 = arith.constant 0 : i32
    return %c0_i32, %c0_i32_0, %c0_i32_1, %c0_i32_2 : i32, i32, i32, i32
  }
  func.func @transform_3(%arg0: i32) -> (i32, i32, i32, i32) {
    %c0_i32 = arith.constant 0 : i32
    %c0_i32_0 = arith.constant 0 : i32
    %c0_i32_1 = arith.constant 0 : i32
    %c0_i32_2 = arith.constant 0 : i32
    %c0_i32_3 = arith.constant 0 : i32
    return %c0_i32, %c0_i32_0, %c0_i32_1, %c0_i32_2 : i32, i32, i32, i32
  }
  func.func @transform_4(%arg0: i32) -> (i32, i32, i32, i32) {
    %c0_i32 = arith.constant 0 : i32
    %c0_i32_0 = arith.constant 0 : i32
    %c0_i32_1 = arith.constant 0 : i32
    %c0_i32_2 = arith.constant 0 : i32
    %c0_i32_3 = arith.constant 0 : i32
    return %c0_i32, %c0_i32_0, %c0_i32_1, %c0_i32_2 : i32, i32, i32, i32
  }
  func.func @transform_5(%arg0: i32) -> (i32, i32, i32, i32) {
    %c0_i32 = arith.constant 0 : i32
    %c0_i32_0 = arith.constant 0 : i32
    %c0_i32_1 = arith.constant 0 : i32
    %c0_i32_2 = arith.constant 0 : i32
    %c0_i32_3 = arith.constant 0 : i32
    return %c0_i32, %c0_i32_0, %c0_i32_1, %c0_i32_2 : i32, i32, i32, i32
  }
  func.func @transform_6(%arg0: i32) -> (i32, i32, i32, i32) {
    %c0_i32 = arith.constant 0 : i32
    %c0_i32_0 = arith.constant 0 : i32
    %c0_i32_1 = arith.constant 0 : i32
    %c0_i32_2 = arith.constant 0 : i32
    %c0_i32_3 = arith.constant 0 : i32
    return %c0_i32, %c0_i32_0, %c0_i32_1, %c0_i32_2 : i32, i32, i32, i32
  }
  func.func @transform_7(%arg0: i32) -> (i32, i32, i32, i32) {
    %c0_i32 = arith.constant 0 : i32
    %c0_i32_0 = arith.constant 0 : i32
    %c0_i32_1 = arith.constant 0 : i32
    %c0_i32_2 = arith.constant 0 : i32
    %c0_i32_3 = arith.constant 0 : i32
    return %c0_i32, %c0_i32_0, %c0_i32_1, %c0_i32_2 : i32, i32, i32, i32
  }
  func.func @transform_8(%arg0: i32) -> (i32, i32, i32) {
    %c0_i32 = arith.constant 0 : i32
    %c0_i32_0 = arith.constant 0 : i32
    %c0_i32_1 = arith.constant 0 : i32
    %c0_i32_2 = arith.constant 0 : i32
    return %c0_i32, %c0_i32_0, %c0_i32_1 : i32, i32, i32
  }
  func.func @transform_9(%arg0: i32) -> (i32, i32, i32) {
    %c0_i32 = arith.constant 0 : i32
    %c0_i32_0 = arith.constant 0 : i32
    %c0_i32_1 = arith.constant 0 : i32
    %c0_i32_2 = arith.constant 0 : i32
    return %c0_i32, %c0_i32_0, %c0_i32_1 : i32, i32, i32
  }
  func.func @transform_10(%arg0: i32) -> (i32, i32, i32) {
    %c0_i32 = arith.constant 0 : i32
    %c0_i32_0 = arith.constant 0 : i32
    %c0_i32_1 = arith.constant 0 : i32
    %c0_i32_2 = arith.constant 0 : i32
    return %c0_i32, %c0_i32_0, %c0_i32_1 : i32, i32, i32
  }
  func.func @transform_11(%arg0: i32) -> (i32, i32, i32) {
    %c0_i32 = arith.constant 0 : i32
    %c0_i32_0 = arith.constant 0 : i32
    %c0_i32_1 = arith.constant 0 : i32
    %c0_i32_2 = arith.constant 0 : i32
    return %c0_i32, %c0_i32_0, %c0_i32_1 : i32, i32, i32
  }
  func.func @transform_12(%arg0: i32) -> (i32, i32, i32) {
    %c0_i32 = arith.constant 0 : i32
    %c0_i32_0 = arith.constant 0 : i32
    %c0_i32_1 = arith.constant 0 : i32
    %c0_i32_2 = arith.constant 0 : i32
    return %c0_i32, %c0_i32_0, %c0_i32_1 : i32, i32, i32
  }
  func.func @transform_13(%arg0: i32) -> (i32, i32, i32) {
    %c0_i32 = arith.constant 0 : i32
    %c0_i32_0 = arith.constant 0 : i32
    %c0_i32_1 = arith.constant 0 : i32
    %c0_i32_2 = arith.constant 0 : i32
    return %c0_i32, %c0_i32_0, %c0_i32_1 : i32, i32, i32
  }
  func.func @transform_14(%arg0: i32) -> (i32, i32, i32) {
    %c0_i32 = arith.constant 0 : i32
    %c0_i32_0 = arith.constant 0 : i32
    %c0_i32_1 = arith.constant 0 : i32
    %c0_i32_2 = arith.constant 0 : i32
    return %c0_i32, %c0_i32_0, %c0_i32_1 : i32, i32, i32
  }
  func.func @transform_15(%arg0: i32) -> (i32, i32, i32) {
    %c0_i32 = arith.constant 0 : i32
    %c0_i32_0 = arith.constant 0 : i32
    %c0_i32_1 = arith.constant 0 : i32
    %c0_i32_2 = arith.constant 0 : i32
    return %c0_i32, %c0_i32_0, %c0_i32_1 : i32, i32, i32
  }
  func.func @transform_16(%arg0: i32) -> (i32, i32, i32) {
    %c0_i32 = arith.constant 0 : i32
    %c0_i32_0 = arith.constant 0 : i32
    %c0_i32_1 = arith.constant 0 : i32
    %c0_i32_2 = arith.constant 0 : i32
    return %c0_i32, %c0_i32_0, %c0_i32_1 : i32, i32, i32
  }
  func.func @transform_17(%arg0: i32) -> (i32, i32, i32) {
    %c0_i32 = arith.constant 0 : i32
    %c0_i32_0 = arith.constant 0 : i32
    %c0_i32_1 = arith.constant 0 : i32
    %c0_i32_2 = arith.constant 0 : i32
    return %c0_i32, %c0_i32_0, %c0_i32_1 : i32, i32, i32
  }
  func.func @transform_18(%arg0: i32) -> (i32, i32) {
    %c0_i32 = arith.constant 0 : i32
    %c0_i32_0 = arith.constant 0 : i32
    %c0_i32_1 = arith.constant 0 : i32
    return %c0_i32, %c0_i32_0 : i32, i32
  }
  func.func @transform_19(%arg0: i32) -> (i32, i32) {
    %c0_i32 = arith.constant 0 : i32
    %c0_i32_0 = arith.constant 0 : i32
    %c0_i32_1 = arith.constant 0 : i32
    return %c0_i32, %c0_i32_0 : i32, i32
  }
  func.func @transform_20(%arg0: i32) -> (i32, i32, i32) {
    %c0_i32 = arith.constant 0 : i32
    %c0_i32_0 = arith.constant 0 : i32
    %c0_i32_1 = arith.constant 0 : i32
    return %arg0, %c0_i32, %c0_i32_0 : i32, i32, i32
  }
}

</mosaic_0001>

<bundles_post_ra>
// kernel: vid2vid_forward.1
= control target key start
LH: loop header
LB: loop body
LE: loop exit
PB: predicated region body
PF: predicated region fallthrough
CT: control target
= control target key end

     0   :  { %s9897_s0 = inlined_call_operand.vmem [shape: f32[2,10,128], index: 0, kind: input, shape index: {}]   ;;  %s9898_s1 = inlined_call_operand.vmem [shape: f32[10,128], index: 1, kind: input, shape index: {}]   ;;  %s9899_s2 = inlined_call_operand.vmem [shape: bf16[2,4,128,16], index: 2, kind: input, shape index: {}]   ;;  %s9900_s3 = inlined_call_operand.vmem [shape: bf16[2,4,128,16], index: 3, kind: input, shape index: {}]   ;;  %s9901_s4 = inlined_call_operand.vmem [shape: bf16[2,4,128,16], index: 4, kind: input, shape index: {}]   ;;  %s9902_s5 = inlined_call_operand.vmem [shape: f32[2,4,1,16], index: 5, kind: input, shape index: {}]   ;;  %s9903_s6 = inlined_call_operand.vmem [shape: f32[2,4,1,16], index: 6, kind: input, shape index: {}]   ;;  %s9904_s7 = inlined_call_operand.vmem [shape: f32[2,4,1,16], index: 7, kind: input, shape index: {}]   ;;  %s9905_s8 = inlined_call_operand.vmem [shape: bf16[2,64,128], index: 8, kind: input, shape index: {}]   ;;  %s9906_s9 = inlined_call_operand.vmem [shape: f32[2,1,128], index: 9, kind: input, shape index: {}]   ;;  %s9907_s10 = inlined_call_operand.vmem [shape: f32[2,1,128], index: 10, kind: input, shape index: {}]   ;;  %s9908_s11 = inlined_call_operand.vmem [shape: f32[2,1,128], index: 11, kind: input, shape index: {}]   ;;  %s9909_s12 = inlined_call_operand.vmem [shape: bf16[2,128,128], index: 12, kind: input, shape index: {}]   ;;  %s9910_s13 = inlined_call_operand.vmem [shape: f32[2,1,128], index: 13, kind: input, shape index: {}]   ;;  %s9911_s14 = inlined_call_operand.vmem [shape: bf16[2,128,128], index: 14, kind: input, shape index: {}]   ;;  %s9912_s15 = inlined_call_operand.vmem [shape: f32[2,1,128], index: 15, kind: input, shape index: {}]   ;;  %s9913_s16 = inlined_call_operand.vmem [shape: f32[2,1,128], index: 16, kind: input, shape index: {}]   ;;  %s9914_s17 = inlined_call_operand.vmem [shape: f32[2,1,128], index: 17, kind: input, shape index: {}]   ;;  %s9915_s18 = inlined_call_operand.vmem [shape: bf16[128,128], index: 18, kind: input, shape index: {}]   ;;  %s9916_s19 = inlined_call_operand.vmem [shape: f32[1,128], index: 19, kind: input, shape index: {}]   ;;  %s9917_s20 = inlined_call_operand.vmem [shape: f32[2,10,128], index: 20, kind: output, shape index: {}]  }
   0x1   :  { %9923 = sst [smem:[#allocation3_spill]] %s9897_s0 }
   0x2   :  { %9924 = sst [smem:[#allocation4_spill]] %s9898_s1  ;;  %s8487_s1 = smov 0  }
   0x3   :  { %9925 = sst [smem:[#allocation5_spill]] %s9899_s2 }
   0x4   :  { %9926 = sst [smem:[#allocation6_spill]] %s9900_s3 }
   0x5   :  { %9927 = sst [smem:[#allocation7_spill]] %s9901_s4 }
   0x6 LB: > { %9928 = sst [smem:[#allocation2_spill]] %s8378_s1  ;;  %s6200_s22 = sadd.s32 4294967295, %s8378_s1   ;;  %s8378_s1 = sphi %s8487_s1, %s30_s1  }
   0x7   : > { %p6204_p0 = scmp.ge.s32.totalorder %s8378_s1, 1  ;;  %p562_p1 = scmp.lt.s32.totalorder %s8378_s1, 3 }
   0x9   : > { %p563_p2 = pnand %p6204_p0, %p562_p1 }
   0xa   : > { %s9929_s2 = sld [smem:[#allocation6_spill]] (!%p563_p2)  ;;  %p620_p3 = scmp.lt.s32.totalorder (!%p563_p2), %s6200_s22, 1 }
   0xb   : > { %566 = sbr.rel (%p563_p2) target bundleno = 10158 (0x27ae), region = 100  ;;  %s9930_s26 = sld [smem:[#allocation5_spill]] (!%p563_p2) }
   0xc   : > { %s9931_s28 = sld [smem:[#allocation3_spill]] (!%p563_p2) }
   0xd   : > { %s9932_s24 = sld [smem:[#allocation4_spill]] (!%p563_p2) }
  0x10   : > { %v8052_v0 = vld [vmem:[%s9929_s2 + $0x38] sm:$0xff]   ;;  %v8380_v1 = vmov 0.0   ;;  %v8054_v3 = vld [vmem:[%s9929_s2 + $0x30] sm:$0xff]   ;;  %vm8381_vm0 = vmmov 0   ;;  %v8056_v5 = vld [vmem:[%s9929_s2 + $0x28] sm:$0xff]   ;;  %s9936_s22 = smov (!%p620_p3, %s6200_s22), 1 }
  0x11   : > { %7322 = vmatprep.subr.bf16.mxu1 %v8380_v1  ;;  %7302 = vmatprep.subr.bf16.mxu0 %v8380_v1  ;;  %v8053_v2 = vld [vmem:[%s9930_s26 + $0x38] sm:$0xff]   ;;  %v8055_v4 = vld [vmem:[%s9930_s26 + $0x30] sm:$0xff]   ;;  %v8057_v6 = vld [vmem:[%s9930_s26 + $0x28] sm:$0xff]   ;;  %s6959_s29 = sshll.u32 %s9936_s22, 4  ;;  %vm980_vm1 = vcmask 130048   ;;  %vm1068_vm2 = vcmask 80896  }
  0x12   : > { %7323 = vmatpush3.bf16.msra.mxu1 %v8052_v0  ;;  %7338 = vmatprep.mubr.msk.bf16.mxu1 %vm8381_vm0, %v8380_v1  ;;  %v8058_v7 = vld [vmem:[%s9929_s2 + $0x20] sm:$0xff]   ;;  %v8060_v9 = vld [vmem:[%s9929_s2 + $0x18] sm:$0xff]   ;;  %v8062_v11 = vld [vmem:[%s9929_s2 + $0x10] sm:$0xff]   ;;  %s624_s4 = scalar_lea.vmem %s9931_s28, %s6959_s29  ;;  %s9933_s28 = sld [smem:[#allocation7_spill]]  ;;  %vm1072_vm3 = vcmask 74752   ;;  %vm1098_vm4 = vcmask 1041408  }
  0x13   : > { %7303 = vmatpush3.bf16.msra.mxu0 %v8053_v2  ;;  %7324 = vmatprep.subr.bf16.mxu1 %v8380_v1  ;;  %v8059_v8 = vld [vmem:[%s9930_s26 + $0x20] sm:$0xff]   ;;  %v8061_v10 = vld [vmem:[%s9930_s26 + $0x18] sm:$0xff]   ;;  %v8063_v12 = vld [vmem:[%s9930_s26 + $0x10] sm:$0xff]  }
  0x14   : > { %7304 = vmatprep.subr.bf16.mxu0 %v8380_v1  ;;  %7318 = vmatprep.mubr.msk.bf16.mxu0 %vm8381_vm0, %v8380_v1  ;;  %v8064_v13 = vld [vmem:[%s9929_s2 + $0x8] sm:$0xff]   ;;  %v631_v14 = vld [vmem:[%s624_s4] sm:$0xff] }
  0x15   : > { %v632_v15 = vld [vmem:[%s624_s4 + $0x8] sm:$0x3]  ;;  %v633_v16 = vld [vmem:[%s9932_s24] sm:$0xff]  ;;  %s629_s4 = scalar_lea.vmem %s9917_s20, %s6959_s29 }
  0x16   : > { %7325 = vmatpush3.bf16.msra.mxu1 %v8054_v3  ;;  %v634_v17 = vld [vmem:[%s9932_s24 + $0x8] sm:$0x3]  ;;  %v8066_v19 = vld [vmem:[%s9929_s2] sm:$0xff]   ;;  %v8575_v21 = vadd.f32 %v633_v16, %v631_v14  ;;  %v8083_v16 = vld [vmem:[%s9929_s2 + $0x50] sm:$0xff]  }
  0x17   : > { %7305 = vmatpush3.bf16.msra.mxu0 %v8055_v4  ;;  %7326 = vmatprep.subr.bf16.mxu1 %v8380_v1  ;;  %v8065_v18 = vld [vmem:[%s9930_s26 + $0x8] sm:$0xff]   ;;  %v8067_v20 = vld [vmem:[%s9930_s26] sm:$0xff]   ;;  %v8577_v22 = vadd.f32 %v634_v17, %v632_v15  ;;  %v8076_v4 = vld [vmem:[%s9929_s2 + $0x78] sm:$0xff]  }
  0x18   : > { %7306 = vmatprep.subr.bf16.mxu0 %v8380_v1  ;;  %v6210_v24 = vld [vmem:[%s9902_s5] ss:$0 sm:$0xff]  ;;  %v8068_v38 = vld [vmem:[%s9933_s28 + $0x38] sm:$0xff]   ;;  %v8069_v39 = vld [vmem:[%s9933_s28 + $0x30] sm:$0xff]  }
  0x19   : > { %v8583_v23 = vpack.c.bf16 %v8577_v22, %v8575_v21  ;;  %v6219_v30 = vld [vmem:[%s9903_s6] ss:$0 sm:$0xff]  ;;  %v8070_v40 = vld [vmem:[%s9933_s28 + $0x28] sm:$0xff]   ;;  %v8072_v42 = vld [vmem:[%s9933_s28 + $0x18] sm:$0xff]  }
  0x1a   : > { %7327 = vmatpush3.bf16.msra.mxu1 %v8056_v5  ;;  %v8071_v41 = vld [vmem:[%s9933_s28 + $0x20] sm:$0xff]   ;;  %v8073_v43 = vld [vmem:[%s9933_s28 + $0x10] sm:$0xff]   ;;  %v8074_v44 = vld [vmem:[%s9933_s28 + $0x8] sm:$0xff]  }
  0x1b   : > { %7307 = vmatpush3.bf16.msra.mxu0 %v8057_v6  ;;  %7328 = vmatprep.subr.bf16.mxu1 %v8380_v1  ;;  %v8075_v45 = vld [vmem:[%s9933_s28] sm:$0xff]   ;;  %v8077_v5 = vld [vmem:[%s9929_s2 + $0x70] sm:$0xff]   ;;  %v8078_v6 = vld [vmem:[%s9929_s2 + $0x68] sm:$0xff]  }
  0x1c   : > { %7308 = vmatprep.subr.bf16.mxu0 %v8380_v1  ;;  %v6228_v61 = vld [vmem:[%s9904_s7] ss:$0 sm:$0xff]  ;;  %v8081_v15 = vld [vmem:[%s9929_s2 + $0x58] sm:$0xff]   ;;  %v8085_v17 = vld [vmem:[%s9929_s2 + $0x48] sm:$0xff]  }
  0x1d   : > { %v8080_v14 = vld [vmem:[%s9905_s8] sm:$0xff]  }
  0x1e   : > { %7329 = vmatpush3.bf16.msra.mxu1 %v8058_v7 }
  0x1f   : > { %7309 = vmatpush3.bf16.msra.mxu0 %v8059_v8  ;;  %7330 = vmatprep.subr.bf16.mxu1 %v8380_v1 }
  0x20   : > { %7310 = vmatprep.subr.bf16.mxu0 %v8380_v1 }
  0x22   : > { %7331 = vmatpush3.bf16.msra.mxu1 %v8060_v9 }
  0x23   : > { %7311 = vmatpush3.bf16.msra.mxu0 %v8061_v10  ;;  %7332 = vmatprep.subr.bf16.mxu1 %v8380_v1 }
  0x24   : > { %7312 = vmatprep.subr.bf16.mxu0 %v8380_v1 }
  0x26   : > { %7333 = vmatpush3.bf16.msra.mxu1 %v8062_v11 }
  0x27   : > { %7313 = vmatpush3.bf16.msra.mxu0 %v8063_v12  ;;  %7334 = vmatprep.subr.bf16.mxu1 %v8380_v1 }
  0x28   : > { %7314 = vmatprep.subr.bf16.mxu0 %v8380_v1 }
  0x2a   : > { %7335 = vmatpush3.bf16.msra.mxu1 %v8064_v13  ;;  %v8079_v13 = vld [vmem:[%s9929_s2 + $0x60] sm:$0xff]  }
  0x2b   : > { %7315 = vmatpush3.bf16.msra.mxu0 %v8065_v18  ;;  %7336 = vmatprep.subr.bf16.mxu1 %v8380_v1  ;;  %v8087_v18 = vld [vmem:[%s9929_s2 + $0x40] sm:$0xff]  }
  0x2c   : > { %7316 = vmatprep.subr.bf16.mxu0 %v8380_v1 }
  0x2e   : > { %7337 = vmatpush3.bf16.msra.mxu1 %v8066_v19 }
  0x2f   : > { %7317 = vmatpush3.bf16.msra.mxu0 %v8067_v20 }
  0x30   : > { %7342 = vmatprep.subr.bf16.mxu0 %v8380_v1 }
  0x31   : > { %7339 = vmatmul.mubr.bf16.vlgmr.msra.gmra.mxu1 %v8583_v23 }
  0x32   : > { %7319 = vmatmul.mubr.bf16.vlgmr.msra.gmra.mxu0 %v8583_v23 }
  0x33   : > { %7358 = vmatprep.mubr.msk.bf16.mxu0 %vm8381_vm0, %v8380_v1  ;;  %7343 = vmatpush3.bf16.msra.mxu0 %v8068_v38  ;;  %v8098_v38 = vld [vmem:[%s9933_s28 + $0x50] sm:$0xff]  }
  0x34   : > { %7344 = vmatprep.subr.bf16.mxu0 %v8380_v1 }
  0x37   : > { %7345 = vmatpush3.bf16.msra.mxu0 %v8069_v39  ;;  %v8099_v39 = vld [vmem:[%s9933_s28 + $0x48] sm:$0xff]  }
  0x38   : > { %7346 = vmatprep.subr.bf16.mxu0 %v8380_v1 }
  0x3b   : > { %7347 = vmatpush3.bf16.msra.mxu0 %v8070_v40 }
  0x3c   : > { %7348 = vmatprep.subr.bf16.mxu0 %v8380_v1 }
  0x3f   : > { %7349 = vmatpush3.bf16.msra.mxu0 %v8071_v41  ;;  %v8100_v41 = vld [vmem:[%s9933_s28 + $0x40] sm:$0xff]  }
  0x40   : > { %7350 = vmatprep.subr.bf16.mxu0 %v8380_v1 }
  0x43   : > { %7351 = vmatpush3.bf16.msra.mxu0 %v8072_v42  ;;  %v6290_v42 = vld [vmem:[%s9903_s6 + $0x1] ss:$0 sm:$0xff] }
  0x44   : > { %7352 = vmatprep.subr.bf16.mxu0 %v8380_v1 }
  0x47   : > { %7353 = vmatpush3.bf16.msra.mxu0 %v8073_v43 }
  0x48   : > { %7354 = vmatprep.subr.bf16.mxu0 %v8380_v1 }
  0x4b   : > { %7355 = vmatpush3.bf16.msra.mxu0 %v8074_v44 }
  0x4c   : > { %7356 = vmatprep.subr.bf16.mxu0 %v8380_v1 }
  0x4f   : > { %7357 = vmatpush3.bf16.msra.mxu0 %v8075_v45 }
  0x50   : > { %7402 = vmatprep.subr.bf16.mxu0 %v8380_v1 }
  0x52   : > { %7359 = vmatmul.mubr.bf16.vlgmr.msra.gmra.mxu0 %v8583_v23 }
  0x53   : > { %7418 = vmatprep.mubr.msk.bf16.mxu0 %vm8381_vm0, %v8380_v1  ;;  %7403 = vmatpush3.bf16.msra.mxu0 %v8076_v4 }
  0x54   : > { %7404 = vmatprep.subr.bf16.mxu0 %v8380_v1 }
  0x57   : > { %7405 = vmatpush3.bf16.msra.mxu0 %v8077_v5 }
  0x58   : > { %7406 = vmatprep.subr.bf16.mxu0 %v8380_v1 }
  0x5b   : > { %7407 = vmatpush3.bf16.msra.mxu0 %v8078_v6 }
  0x5c   : > { %7408 = vmatprep.subr.bf16.mxu0 %v8380_v1 }
  0x5f   : > { %7409 = vmatpush3.bf16.msra.mxu0 %v8079_v13 }
  0x60   : > { %7410 = vmatprep.subr.bf16.mxu0 %v8380_v1 }
  0x63   : > { %7411 = vmatpush3.bf16.msra.mxu0 %v8081_v15 }
  0x64   : > { %7412 = vmatprep.subr.bf16.mxu0 %v8380_v1 }
  0x67   : > { %7413 = vmatpush3.bf16.msra.mxu0 %v8083_v16 }
  0x68   : > { %7414 = vmatprep.subr.bf16.mxu0 %v8380_v1 }
  0x6b   : > { %7415 = vmatpush3.bf16.msra.mxu0 %v8085_v17 }
  0x6c   : > { %7416 = vmatprep.subr.bf16.mxu0 %v8380_v1 }
  0x6f   : > { %7417 = vmatpush3.bf16.msra.mxu0 %v8087_v18 }
  0x70   : > { %7462 = vmatprep.subr.bf16.mxu0 %v8380_v1 }
  0x72   : > { %7419 = vmatmul.mubr.bf16.vlgmr.msra.gmra.mxu0 %v8583_v23 }
  0x73   : > { %7478 = vmatprep.mubr.msk.bf16.mxu0 %vm8381_vm0, %v8380_v1 }
  0xf1   : > { %v861_v25 = vpop.f32.mrf.mxu1 }
  0xf2   : > { %v749_v26 = vpop.f32.mrf.mxu0  ;;  %v862_v35 = vadd.f32 %v6219_v30, %v861_v25 }
  0xf3   : > { %v750_v27 = vadd.f32 %v6210_v24, %v749_v26  ;;  %v7340_v28 = vpop.f32.mrf.mxu1  ;;  %v8084_v26 = vld [vmem:[%s9930_s26 + $0x70] sm:$0xff]  }
  0xf4   : > { %v7320_v29 = vpop.f32.mrf.mxu0  ;;  %v8088_v28 = vld [vmem:[%s9930_s26 + $0x60] sm:$0xff]  }
  0xf5   : > { %v864_v31 = vpop.f32.mrf.mxu1  ;;  %7366 = vmatprep.mubr.msk.f32.mxu1 %vm980_vm1, %v750_v27  ;;  %v8086_v27 = vld [vmem:[%s9930_s26 + $0x68] sm:$0xff]   ;;  %v8089_v29 = vld [vmem:[%s9930_s26 + $0x58] sm:$0xff]  }
  0xf6   : > { %v865_v32 = vadd.f32 %v6219_v30, %v864_v31  ;;  %v752_v33 = vpop.f32.mrf.mxu0  ;;  %v8090_v30 = vld [vmem:[%s9930_s26 + $0x50] sm:$0xff]   ;;  %v8091_v31 = vld [vmem:[%s9930_s26 + $0x48] sm:$0xff]  }
  0xf7   : > { %v7341_v34 = vpop.f32.mrf.mxu1  ;;  %v753_v37 = vadd.f32 %v6210_v24, %v752_v33  ;;  %v8082_v24 = vld [vmem:[%s9930_s26 + $0x78] sm:$0xff]  }
  0xf8   : > { %7362 = vmatprep.subr.msk.mxu1 %vm980_vm1, %v865_v32  ;;  %v7321_v36 = vpop.f32.mrf.mxu0  ;;  %v8093_v33 = vld [vmem:[%s9933_s28 + $0x78] sm:$0xff]   ;;  %v8094_v34 = vld [vmem:[%s9933_s28 + $0x70] sm:$0xff]  }
  0xf9   : > { %7363 = vmatpush3.xpose.msk.msra.mxu1 %vm980_vm1, %v865_v32  ;;  %v8092_v32 = vld [vmem:[%s9930_s26 + $0x40] sm:$0xff]  }
  0xfa   : > { %7364 = vmatprep.subr.msk.mxu1 %vm980_vm1, %v862_v35  ;;  %v8096_v36 = vld [vmem:[%s9933_s28 + $0x60] sm:$0xff]  }
  0xfd   : > { %7365 = vmatpush3.xpose.msk.msra.mxu1 %vm980_vm1, %v862_v35  ;;  %v8095_v35 = vld [vmem:[%s9933_s28 + $0x68] sm:$0xff]  }
 0x100   : > { %7367 = vmatmul.mubr.msk.f32.vlgmr.msra.gmra.mxu1 %vm980_vm1, %v753_v37  ;;  %v8097_v37 = vld [vmem:[%s9933_s28 + $0x58] sm:$0xff]  }
 0x112   : > { %v973_v60 = vpop.f32.mrf.mxu0 }
 0x113   : > { %v974_v0 = vadd.f32 %v6228_v61, %v973_v60  ;;  %v6316_v60 = vld [vmem:[%s9904_s7 + $0x1] ss:$0 sm:$0xff] }
 0x114   : > { %v7360_v62 = vpop.f32.mrf.mxu0 }
 0x116   : > { %v976_v63 = vpop.f32.mrf.mxu0 }
 0x117   : > { %v977_v2 = vadd.f32 %v6228_v61, %v976_v63 }
 0x118   : > { %v7361_v3 = vpop.f32.mrf.mxu0 }
 0x119   : > { %7369 = vmatprep.subr.msk.mxu1 %vm1098_vm4, %v977_v2 }
 0x11a   : > { %7370 = vmatpush3.msk.msra.mxu1 %vm1098_vm4, %v977_v2 }
 0x11b   : > { %7371 = vmatprep.subr.mxu1 %v974_v0 }
 0x11c   : > { %7372 = vmatpush3.msra.mxu1 %v974_v0 }
 0x11d   : > { %7376 = vmatprep.subr.bf16.mxu1 %v8380_v1 }
 0x132   : > { %v1459_v40 = vpop.f32.mrf.mxu0 }
 0x133   : > { %v1460_v45 = vadd.f32 %v6290_v42, %v1459_v40  ;;  %v8106_v40 = vld [vmem:[%s9929_s2 + $0xa8] sm:$0xff]  }
 0x134   : > { %v7420_v43 = vpop.f32.mrf.mxu0 }
 0x135   : > { %v8112_v43 = vld [vmem:[%s9929_s2 + $0x90] sm:$0xff]  }
 0x136   : > { %v1462_v44 = vpop.f32.mrf.mxu0 }
 0x1c0   : > { %v7368_v46 = vpop.f32.mrf.mxu1 }
 0x1c1   : > { %v1073_v49 = vsel %vm1072_vm3, %v7368_v46, -inf }
 0x1c2   : > { %v1059_v47 = vpop.f32.mrf.mxu1 }
 0x1c3   : > { %v1069_v48 = vsel %vm1068_vm2, %v1059_v47, -inf }
 0x1c4   : > { %1070 = vmax.xlane.f32.xlu0 %v1069_v48 }
 0x1c8   : > { %1074 = vmax.xlane.f32.xlu0 %v1073_v49 }
 0x24d   : > { %v1071_v50 = vpop.xlane.xlu0 %1070 }
 0x24e   : > { %v1076_v51 = vsub.f32 %v1059_v47, %v1071_v50  ;;  %v7421_v47 = vpop.f32.mrf.mxu0 }
 0x250   : > { %v1078_v52 = vmul.f32 1.442695, %v1076_v51 }
 0x251   : > { %v1075_v53 = vpop.xlane.xlu0 %1074 }
 0x252   : > { %8292 = vpow2.f32 %v1078_v52  ;;  %v1077_v54 = vsub.f32 %v7368_v46, %v1075_v53  ;;  %v1463_v46 = vadd.f32 %v6290_v42, %v1462_v44  ;;  %v6264_v52 = vld [vmem:[%s9902_s5 + $0x1] ss:$0 sm:$0xff]  ;;  %v8110_v42 = vld [vmem:[%s9929_s2 + $0x98] sm:$0xff]   ;;  %v8114_v44 = vld [vmem:[%s9929_s2 + $0x88] sm:$0xff]  }
 0x254   : > { %v1080_v55 = vmul.f32 1.442695, %v1077_v54 }
 0x256   : > { %8294 = vpow2.f32 %v1080_v55 }
 0x25f   : > { %v8293_v56 = vpop.eup %8292 }
 0x260   : > { %v1082_v57 = vsel %vm1068_vm2, %v8293_v56, 0.0 }
 0x261   : > { %1083 = vadd.xlane.f32.xlu1 %v1082_v57 }
 0x263   : > { %v8295_v58 = vpop.eup %8294 }
 0x264   : > { %v1085_v59 = vsel %vm1072_vm3, %v8295_v58, 0.0 }
 0x265   : > { %1086 = vadd.xlane.f32.xlu1 %v1085_v59 }
 0x2ea   : > { %v1084_v7 = vpop.xlane.xlu1 %1083 }
 0x2eb   : > { %8296 = vrcp.f32 %v1084_v7 }
 0x2ee   : > { %v1087_v8 = vpop.xlane.xlu1 %1086 }
 0x2ef   : > { %8298 = vrcp.f32 %v1087_v8 }
 0x2f8   : > { %v8297_v9 = vpop.eup %8296 }
 0x2f9   : > { %v1089_v10 = vmul.f32 %v8297_v9, %v8293_v56 }
 0x2fb   : > { %7373 = vmatprep.mubr.msk.f32.mxu1 %vm1068_vm2, %v1089_v10 }
 0x2fc   : > { %v8299_v11 = vpop.eup %8298 }
 0x2fd   : > { %v1091_v12 = vmul.f32 %v8299_v11, %v8295_v58 }
 0x2ff   : > { %7374 = vmatmul.mubr.msk.f32.vlgmr.msra.gmra.mxu1 %vm1068_vm2, %v1091_v12 }
 0x300   : > { %7378 = vmatprep.mubr.msk.bf16.mxu1 %vm8381_vm0, %v8380_v1  ;;  %7377 = vmatpush3.bf16.msra.mxu1 %v8080_v14 }
 0x301   : > { %7382 = vmatprep.subr.bf16.mxu1 %v8380_v1 }
 0x3bf   : > { %v7375_v19 = vpop.f32.mrf.mxu1 }
 0x3c1   : > { %v1168_v20 = vpop.f32.mrf.mxu1 }
 0x3c2   : > { %v1177_v25 = vpack.c.bf16 %v7375_v19, %v1168_v20 }
 0x3c4   : > { %7379 = vmatmul.mubr.msk.bf16.vlgmr.msra.gmra.mxu1 %vm980_vm1, %v1177_v25 }
 0x3c5   : > { %7383 = vmatpush3.bf16.msra.mxu1 %v8082_v24  ;;  %7398 = vmatprep.mubr.msk.bf16.mxu1 %vm8381_vm0, %v8380_v1 }
 0x3c6   : > { %7384 = vmatprep.subr.bf16.mxu1 %v8380_v1 }
 0x3c9   : > { %7385 = vmatpush3.bf16.msra.mxu1 %v8084_v26  ;;  %v8101_v26 = vld [vmem:[%s9905_s8 + $0x8] sm:$0xff]  }
 0x3ca   : > { %7386 = vmatprep.subr.bf16.mxu1 %v8380_v1 }
 0x3cd   : > { %7387 = vmatpush3.bf16.msra.mxu1 %v8086_v27  ;;  %v8103_v27 = vld [vmem:[%s9930_s26 + $0xb8] sm:$0xff]  }
 0x3ce   : > { %7388 = vmatprep.subr.bf16.mxu1 %v8380_v1  ;;  %7463 = vmatpush3.bf16.msra.mxu0 %v8103_v27 }
 0x3cf   : > { %7464 = vmatprep.subr.bf16.mxu0 %v8380_v1 }
 0x3d1   : > { %7389 = vmatpush3.bf16.msra.mxu1 %v8088_v28  ;;  %v8105_v28 = vld [vmem:[%s9930_s26 + $0xb0] sm:$0xff]  }
 0x3d2   : > { %7390 = vmatprep.subr.bf16.mxu1 %v8380_v1  ;;  %7465 = vmatpush3.bf16.msra.mxu0 %v8105_v28 }
 0x3d3   : > { %7466 = vmatprep.subr.bf16.mxu0 %v8380_v1 }
 0x3d5   : > { %7391 = vmatpush3.bf16.msra.mxu1 %v8089_v29  ;;  %v8107_v29 = vld [vmem:[%s9930_s26 + $0xa8] sm:$0xff]  }
 0x3d6   : > { %7392 = vmatprep.subr.bf16.mxu1 %v8380_v1  ;;  %7467 = vmatpush3.bf16.msra.mxu0 %v8107_v29 }
 0x3d7   : > { %7468 = vmatprep.subr.bf16.mxu0 %v8380_v1 }
 0x3d9   : > { %7393 = vmatpush3.bf16.msra.mxu1 %v8090_v30  ;;  %v8109_v30 = vld [vmem:[%s9930_s26 + $0xa0] sm:$0xff]  }
 0x3da   : > { %7394 = vmatprep.subr.bf16.mxu1 %v8380_v1  ;;  %7469 = vmatpush3.bf16.msra.mxu0 %v8109_v30 }
 0x3db   : > { %7470 = vmatprep.subr.bf16.mxu0 %v8380_v1 }
 0x3dd   : > { %7395 = vmatpush3.bf16.msra.mxu1 %v8091_v31  ;;  %v8111_v31 = vld [vmem:[%s9930_s26 + $0x98] sm:$0xff]  }
 0x3de   : > { %7396 = vmatprep.subr.bf16.mxu1 %v8380_v1  ;;  %7471 = vmatpush3.bf16.msra.mxu0 %v8111_v31 }
 0x3df   : > { %7472 = vmatprep.subr.bf16.mxu0 %v8380_v1 }
 0x3e1   : > { %7397 = vmatpush3.bf16.msra.mxu1 %v8092_v32  ;;  %v8113_v32 = vld [vmem:[%s9930_s26 + $0x90] sm:$0xff]  }
 0x3e2   : > { %7422 = vmatprep.subr.bf16.mxu1 %v8380_v1  ;;  %7473 = vmatpush3.bf16.msra.mxu0 %v8113_v32  ;;  %v6403_v32 = vld [vmem:[%s9904_s7 + $0x2] ss:$0 sm:$0xff] }
 0x3e3   : > { %7474 = vmatprep.subr.bf16.mxu0 %v8380_v1 }
 0x3e4   : > { %7399 = vmatmul.mubr.bf16.vlgmr.msra.gmra.mxu1 %v8583_v23 }
 0x3e5   : > { %7423 = vmatpush3.bf16.msra.mxu1 %v8093_v33  ;;  %7438 = vmatprep.mubr.msk.bf16.mxu1 %vm8381_vm0, %v8380_v1  ;;  %v8115_v33 = vld [vmem:[%s9930_s26 + $0x88] sm:$0xff]  }
 0x3e6   : > { %7424 = vmatprep.subr.bf16.mxu1 %v8380_v1  ;;  %7475 = vmatpush3.bf16.msra.mxu0 %v8115_v33 }
 0x3e7   : > { %7476 = vmatprep.subr.bf16.mxu0 %v8380_v1 }
 0x3e9   : > { %7425 = vmatpush3.bf16.msra.mxu1 %v8094_v34  ;;  %v8117_v34 = vld [vmem:[%s9930_s26 + $0x80] sm:$0xff]  }
 0x3ea   : > { %7426 = vmatprep.subr.bf16.mxu1 %v8380_v1  ;;  %7477 = vmatpush3.bf16.msra.mxu0 %v8117_v34 }
 0x3eb   : > { %7502 = vmatprep.subr.bf16.mxu0 %v8380_v1 }
 0x3ed   : > { %7427 = vmatpush3.bf16.msra.mxu1 %v8095_v35  ;;  %7479 = vmatmul.mubr.bf16.vlgmr.msra.gmra.mxu0 %v8583_v23 }
 0x3ee   : > { %7428 = vmatprep.subr.bf16.mxu1 %v8380_v1  ;;  %7518 = vmatprep.mubr.msk.bf16.mxu0 %vm8381_vm0, %v8380_v1 }
 0x3f1   : > { %7429 = vmatpush3.bf16.msra.mxu1 %v8096_v36 }
 0x3f2   : > { %7430 = vmatprep.subr.bf16.mxu1 %v8380_v1 }
 0x3f5   : > { %7431 = vmatpush3.bf16.msra.mxu1 %v8097_v37  ;;  %v8102_v37 = vld [vmem:[%s9929_s2 + $0xb8] sm:$0xff]  }
 0x3f6   : > { %7432 = vmatprep.subr.bf16.mxu1 %v8380_v1 }
 0x3f9   : > { %7433 = vmatpush3.bf16.msra.mxu1 %v8098_v38 }
 0x3fa   : > { %7434 = vmatprep.subr.bf16.mxu1 %v8380_v1 }
 0x3fd   : > { %7435 = vmatpush3.bf16.msra.mxu1 %v8099_v39  ;;  %v8104_v39 = vld [vmem:[%s9929_s2 + $0xb0] sm:$0xff]  }
 0x3fe   : > { %7436 = vmatprep.subr.bf16.mxu1 %v8380_v1 }
 0x401   : > { %7437 = vmatpush3.bf16.msra.mxu1 %v8100_v41  ;;  %v8108_v41 = vld [vmem:[%s9929_s2 + $0xa0] sm:$0xff]  }
 0x402   : > { %7442 = vmatprep.subr.msk.mxu1 %vm980_vm1, %v1463_v46 }
 0x404   : > { %7439 = vmatmul.mubr.bf16.vlgmr.msra.gmra.mxu1 %v8583_v23 }
 0x405   : > { %7443 = vmatpush3.xpose.msk.msra.mxu1 %vm980_vm1, %v1463_v46  ;;  %v6351_v46 = vld [vmem:[%s9902_s5 + $0x2] ss:$0 sm:$0xff] }
 0x406   : > { %7444 = vmatprep.subr.msk.mxu1 %vm980_vm1, %v1460_v45 }
 0x409   : > { %7445 = vmatpush3.xpose.msk.msra.mxu1 %vm980_vm1, %v1460_v45  ;;  %v8116_v45 = vld [vmem:[%s9929_s2 + $0x80] sm:$0xff]  }
 0x484   : > { %v8767_v48 = vpop.f32.mrf.mxu1 }
 0x486   : > { %v7380_v49 = vpop.f32.mrf.mxu1 }
 0x488   : > { %v8769_v50 = vpop.f32.mrf.mxu1 }
 0x48a   : > { %v7381_v51 = vpop.f32.mrf.mxu1 }
 0x4a4   : > { %v1345_v53 = vpop.f32.mrf.mxu1 }
 0x4a5   : > { %v1346_v54 = vadd.f32 %v6264_v52, %v1345_v53 }
 0x4a6   : > { %v7400_v55 = vpop.f32.mrf.mxu1 }
 0x4a7   : > { %7446 = vmatprep.mubr.msk.f32.mxu1 %vm980_vm1, %v1346_v54  ;;  %v6246_v55 = vld [vmem:[%s9906_s9] ss:$0 sm:$0xff] }
 0x4a8   : > { %v1348_v56 = vpop.f32.mrf.mxu1 }
 0x4a9   : > { %v1349_v57 = vadd.f32 %v6264_v52, %v1348_v56  ;;  %v1236_v56 = vadd.f32 %v6246_v55, %v8767_v48 }
 0x4aa   : > { %v7401_v58 = vpop.f32.mrf.mxu1 }
 0x4ab   : > { %7447 = vmatmul.mubr.msk.f32.vlgmr.msra.gmra.mxu1 %vm980_vm1, %v1349_v57 }
 0x4ad   : > { %v1935_v47 = vpop.f32.mrf.mxu0 }
 0x4ae   : > { %v1936_v49 = vadd.f32 %v6351_v46, %v1935_v47  ;;  %v8129_v47 = vld [vmem:[%s9929_s2 + $0xe0] sm:$0xff]  }
 0x4af   : > { %v7480_v51 = vpop.f32.mrf.mxu0 }
 0x4b0   : > { %v8131_v51 = vld [vmem:[%s9929_s2 + $0xd8] sm:$0xff]  }
 0x4b1   : > { %v1938_v52 = vpop.f32.mrf.mxu0 }
 0x4b2   : > { %v1939_v53 = vadd.f32 %v6351_v46, %v1938_v52  ;;  %v8133_v52 = vld [vmem:[%s9929_s2 + $0xd0] sm:$0xff]  }
 0x4b3   : > { %v7481_v54 = vpop.f32.mrf.mxu0 }
 0x4b4   : > { %v8137_v54 = vld [vmem:[%s9929_s2 + $0xc0] sm:$0xff]  }
 0x4c4   : > { %v1573_v59 = vpop.f32.mrf.mxu1 }
 0x4c5   : > { %v1574_v63 = vadd.f32 %v6316_v60, %v1573_v59 }
 0x4c6   : > { %v7440_v61 = vpop.f32.mrf.mxu1 }
 0x4c8   : > { %v1576_v62 = vpop.f32.mrf.mxu1 }
 0x4c9   : > { %v1577_v0 = vadd.f32 %v6316_v60, %v1576_v62  ;;  %v1237_v60 = vadd.f32 %v6246_v55, %v8769_v50  ;;  %v8118_v50 = vld [vmem:[%s9933_s28 + $0xb8] sm:$0xff]  }
 0x4ca   : > { %v7441_v2 = vpop.f32.mrf.mxu1  ;;  %7503 = vmatpush3.bf16.msra.mxu0 %v8118_v50 }
 0x4cb   : > { %7449 = vmatprep.subr.msk.mxu1 %vm1098_vm4, %v1577_v0  ;;  %7504 = vmatprep.subr.bf16.mxu0 %v8380_v1 }
 0x4cc   : > { %7450 = vmatpush3.msk.msra.mxu1 %vm1098_vm4, %v1577_v0 }
 0x4cd   : > { %7451 = vmatprep.subr.mxu1 %v1574_v63 }
 0x4ce   : > { %7452 = vmatpush3.msra.mxu1 %v1574_v63 }
 0x4cf   : > { %7456 = vmatprep.subr.bf16.mxu1 %v8380_v1 }
 0x56b   : > { %v7448_v3 = vpop.f32.mrf.mxu1 }
 0x56c   : > { %v1670_v4 = vsel %vm1072_vm3, %v7448_v3, -inf }
 0x56d   : > { %1671 = vmax.xlane.f32.xlu1 %v1670_v4  ;;  %v1658_v5 = vpop.f32.mrf.mxu1 }
 0x56e   : > { %v1667_v6 = vsel %vm1068_vm2, %v1658_v5, -inf }
 0x56f   : > { %1668 = vmax.xlane.f32.xlu0 %v1667_v6 }
 0x5f6   : > { %v1672_v7 = vpop.xlane.xlu1 %1671 }
 0x5f7   : > { %v1674_v8 = vsub.f32 %v7448_v3, %v1672_v7  ;;  %v6377_v3 = vld [vmem:[%s9903_s6 + $0x2] ss:$0 sm:$0xff]  ;;  %v8119_v7 = vld [vmem:[%s9933_s28 + $0xb0] sm:$0xff]  }
 0x5f8   : > { %v1669_v9 = vpop.xlane.xlu0 %1668  ;;  %7505 = vmatpush3.bf16.msra.mxu0 %v8119_v7 }
 0x5f9   : > { %v1677_v10 = vmul.f32 1.442695, %v1674_v8  ;;  %v1673_v11 = vsub.f32 %v1658_v5, %v1669_v9  ;;  %v8120_v8 = vld [vmem:[%s9933_s28 + $0xa8] sm:$0xff]   ;;  %7506 = vmatprep.subr.bf16.mxu0 %v8380_v1  ;;  %v8121_v9 = vld [vmem:[%s9933_s28 + $0xa0] sm:$0xff]  }
 0x5fb   : > { %8300 = vpow2.f32 %v1677_v10  ;;  %v1675_v12 = vmul.f32 1.442695, %v1673_v11  ;;  %v8122_v10 = vld [vmem:[%s9933_s28 + $0x98] sm:$0xff]   ;;  %v8123_v11 = vld [vmem:[%s9933_s28 + $0x90] sm:$0xff]  }
 0x5fc   : > { %7507 = vmatpush3.bf16.msra.mxu0 %v8120_v8 }
 0x5fd   : > { %8302 = vpow2.f32 %v1675_v12  ;;  %7508 = vmatprep.subr.bf16.mxu0 %v8380_v1  ;;  %v8124_v12 = vld [vmem:[%s9933_s28 + $0x88] sm:$0xff]  }
 0x600   : > { %7509 = vmatpush3.bf16.msra.mxu0 %v8121_v9 }
 0x601   : > { %7510 = vmatprep.subr.bf16.mxu0 %v8380_v1 }
 0x604   : > { %7511 = vmatpush3.bf16.msra.mxu0 %v8122_v10 }
 0x605   : > { %7512 = vmatprep.subr.bf16.mxu0 %v8380_v1 }
 0x608   : > { %v8301_v13 = vpop.eup %8300  ;;  %7513 = vmatpush3.bf16.msra.mxu0 %v8123_v11 }
 0x609   : > { %v1682_v14 = vsel %vm1072_vm3, %v8301_v13, 0.0  ;;  %7514 = vmatprep.subr.bf16.mxu0 %v8380_v1 }
 0x60a   : > { %v8303_v15 = vpop.eup %8302  ;;  %1683 = vadd.xlane.f32.xlu1 %v1682_v14 }
 0x60b   : > { %v1679_v16 = vsel %vm1068_vm2, %v8303_v15, 0.0 }
 0x60c   : > { %1680 = vadd.xlane.f32.xlu0 %v1679_v16  ;;  %7515 = vmatpush3.bf16.msra.mxu0 %v8124_v12 }
 0x60d   : > { %7516 = vmatprep.subr.bf16.mxu0 %v8380_v1 }
 0x693   : > { %v1684_v17 = vpop.xlane.xlu1 %1683 }
 0x694   : > { %8304 = vrcp.f32 %v1684_v17 }
 0x695   : > { %v1681_v18 = vpop.xlane.xlu0 %1680 }
 0x696   : > { %8306 = vrcp.f32 %v1681_v18 }
 0x6a1   : > { %v8305_v19 = vpop.eup %8304 }
 0x6a2   : > { %v1688_v25 = vmul.f32 %v8305_v19, %v8301_v13  ;;  %v8125_v13 = vld [vmem:[%s9933_s28 + $0x80] sm:$0xff]  }
 0x6a3   : > { %v8307_v20 = vpop.eup %8306  ;;  %7517 = vmatpush3.bf16.msra.mxu0 %v8125_v13 }
 0x6a4   : > { %v1686_v24 = vmul.f32 %v8307_v20, %v8303_v15  ;;  %7562 = vmatprep.subr.bf16.mxu0 %v8380_v1 }
 0x6a6   : > { %7453 = vmatprep.mubr.msk.f32.mxu1 %vm1068_vm2, %v1686_v24  ;;  %7519 = vmatmul.mubr.bf16.vlgmr.msra.gmra.mxu0 %v8583_v23 }
 0x6a7   : > { %7454 = vmatmul.mubr.msk.f32.vlgmr.msra.gmra.mxu1 %vm1068_vm2, %v1688_v25  ;;  %7578 = vmatprep.mubr.msk.bf16.mxu0 %vm8381_vm0, %v8380_v1 }
 0x6a8   : > { %7458 = vmatprep.mubr.msk.bf16.mxu1 %vm8381_vm0, %v8380_v1  ;;  %7457 = vmatpush3.bf16.msra.mxu1 %v8101_v26 }
 0x6a9   : > { %7482 = vmatprep.subr.bf16.mxu1 %v8380_v1 }
 0x766   : > { %v2163_v31 = vpop.f32.mrf.mxu0 }
 0x767   : > { %v7455_v35 = vpop.f32.mrf.mxu1 }
 0x768   : > { %v7520_v33 = vpop.f32.mrf.mxu0 }
 0x769   : > { %v1764_v36 = vpop.f32.mrf.mxu1 }
 0x76a   : > { %v1773_v38 = vpack.c.bf16 %v7455_v35, %v1764_v36  ;;  %v2166_v34 = vpop.f32.mrf.mxu0  ;;  %v2164_v35 = vadd.f32 %v6403_v32, %v2163_v31  ;;  %v8150_v31 = vld [vmem:[%s9933_s28 + $0xc0] sm:$0xff]  }
 0x76b   : > { %v2167_v36 = vadd.f32 %v6403_v32, %v2166_v34 }
 0x76c   : > { %7459 = vmatmul.mubr.msk.bf16.vlgmr.msra.gmra.mxu1 %vm980_vm1, %v1773_v38  ;;  %v8126_v38 = vld [vmem:[%s9929_s2 + $0xf8] sm:$0xff]  }
 0x76d   : > { %7483 = vmatpush3.bf16.msra.mxu1 %v8102_v37  ;;  %7498 = vmatprep.mubr.msk.bf16.mxu1 %vm8381_vm0, %v8380_v1  ;;  %v7521_v37 = vpop.f32.mrf.mxu0 }
 0x76e   : > { %7484 = vmatprep.subr.bf16.mxu1 %v8380_v1  ;;  %7563 = vmatpush3.bf16.msra.mxu0 %v8126_v38 }
 0x76f   : > { %7564 = vmatprep.subr.bf16.mxu0 %v8380_v1 }
 0x771   : > { %7485 = vmatpush3.bf16.msra.mxu1 %v8104_v39  ;;  %v8127_v39 = vld [vmem:[%s9929_s2 + $0xf0] sm:$0xff]  }
 0x772   : > { %7486 = vmatprep.subr.bf16.mxu1 %v8380_v1  ;;  %7565 = vmatpush3.bf16.msra.mxu0 %v8127_v39 }
 0x773   : > { %7566 = vmatprep.subr.bf16.mxu0 %v8380_v1 }
 0x775   : > { %7487 = vmatpush3.bf16.msra.mxu1 %v8106_v40  ;;  %v8128_v40 = vld [vmem:[%s9929_s2 + $0xe8] sm:$0xff]  }
 0x776   : > { %7488 = vmatprep.subr.bf16.mxu1 %v8380_v1  ;;  %7567 = vmatpush3.bf16.msra.mxu0 %v8128_v40 }
 0x777   : > { %7568 = vmatprep.subr.bf16.mxu0 %v8380_v1 }
 0x779   : > { %7489 = vmatpush3.bf16.msra.mxu1 %v8108_v41 }
 0x77a   : > { %7490 = vmatprep.subr.bf16.mxu1 %v8380_v1  ;;  %7569 = vmatpush3.bf16.msra.mxu0 %v8129_v47 }
 0x77b   : > { %7570 = vmatprep.subr.bf16.mxu0 %v8380_v1 }
 0x77d   : > { %7491 = vmatpush3.bf16.msra.mxu1 %v8110_v42 }
 0x77e   : > { %7492 = vmatprep.subr.bf16.mxu1 %v8380_v1  ;;  %7571 = vmatpush3.bf16.msra.mxu0 %v8131_v51 }
 0x77f   : > { %7572 = vmatprep.subr.bf16.mxu0 %v8380_v1 }
 0x781   : > { %7493 = vmatpush3.bf16.msra.mxu1 %v8112_v43 }
 0x782   : > { %7494 = vmatprep.subr.bf16.mxu1 %v8380_v1  ;;  %7573 = vmatpush3.bf16.msra.mxu0 %v8133_v52 }
 0x783   : > { %7574 = vmatprep.subr.bf16.mxu0 %v8380_v1 }
 0x785   : > { %7495 = vmatpush3.bf16.msra.mxu1 %v8114_v44 }
 0x786   : > { %7496 = vmatprep.subr.bf16.mxu1 %v8380_v1 }
 0x789   : > { %7497 = vmatpush3.bf16.msra.mxu1 %v8116_v45 }
 0x78c   : > { %7499 = vmatmul.mubr.bf16.vlgmr.msra.gmra.mxu1 %v8583_v23 }
 0x78d   : > { %7526 = vmatprep.mubr.msk.f32.mxu1 %vm980_vm1, %v1936_v49  ;;  %v8130_v49 = vld [vmem:[%s9905_s8 + $0x10] sm:$0xff]  }
 0x82c   : > { %v1819_v57 = vpop.f32.mrf.mxu1 }
 0x82d   : > { %v8872_v58 = vadd.f32 %v1819_v57, %v1236_v56  ;;  %v8132_v57 = vld [vmem:[%s9930_s26 + $0xf8] sm:$0xff]  }
 0x82e   : > { %v7460_v59 = vpop.f32.mrf.mxu1 }
 0x830   : > { %v1822_v61 = vpop.f32.mrf.mxu1 }
 0x831   : > { %v8875_v62 = vadd.f32 %v1822_v61, %v1237_v60  ;;  %v8134_v60 = vld [vmem:[%s9930_s26 + $0xf0] sm:$0xff]   ;;  %v8136_v61 = vld [vmem:[%s9930_s26 + $0xe8] sm:$0xff]  }
 0x832   : > { %v7461_v63 = vpop.f32.mrf.mxu1 }
 0x833   : > { %v8138_v63 = vld [vmem:[%s9930_s26 + $0xe0] sm:$0xff]  }
 0x84c   : > { %v2049_v0 = vpop.f32.mrf.mxu1 }
 0x84d   : > { %v2050_v48 = vadd.f32 %v6377_v3, %v2049_v0  ;;  %v8139_v0 = vld [vmem:[%s9930_s26 + $0xd8] sm:$0xff]  }
 0x84e   : > { %v7500_v2 = vpop.f32.mrf.mxu1 }
 0x84f   : > { %v8140_v2 = vld [vmem:[%s9930_s26 + $0xd0] sm:$0xff]  }
 0x850   : > { %v2052_v4 = vpop.f32.mrf.mxu1 }
 0x851   : > { %v2053_v5 = vadd.f32 %v6377_v3, %v2052_v4  ;;  %v8141_v3 = vld [vmem:[%s9930_s26 + $0xc8] sm:$0xff]   ;;  %v8142_v4 = vld [vmem:[%s9930_s26 + $0xc0] sm:$0xff]  }
 0x852   : > { %v7501_v6 = vpop.f32.mrf.mxu1 }
 0x853   : > { %7522 = vmatprep.subr.msk.mxu1 %vm980_vm1, %v2053_v5  ;;  %v6464_v6 = vld [vmem:[%s9903_s6 + $0x3] ss:$0 sm:$0xff] }
 0x854   : > { %7523 = vmatpush3.xpose.msk.msra.mxu1 %vm980_vm1, %v2053_v5 }
 0x855   : > { %7524 = vmatprep.subr.msk.mxu1 %vm980_vm1, %v2050_v48 }
 0x858   : > { %7525 = vmatpush3.xpose.msk.msra.mxu1 %vm980_vm1, %v2050_v48 }
 0x859   : > { %7529 = vmatprep.subr.msk.mxu1 %vm1098_vm4, %v2167_v36 }
 0x85b   : > { %7527 = vmatmul.mubr.msk.f32.vlgmr.msra.gmra.mxu1 %vm980_vm1, %v1939_v53  ;;  %v8135_v53 = vld [vmem:[%s9929_s2 + $0xc8] sm:$0xff]  }
 0x85c   : > { %7530 = vmatpush3.msk.msra.mxu1 %vm1098_vm4, %v2167_v36  ;;  %7575 = vmatpush3.bf16.msra.mxu0 %v8135_v53 }
 0x85d   : > { %7531 = vmatprep.subr.mxu1 %v2164_v35  ;;  %7576 = vmatprep.subr.bf16.mxu0 %v8380_v1 }
 0x85e   : > { %7532 = vmatpush3.msra.mxu1 %v2164_v35 }
 0x85f   : > { %7536 = vmatprep.subr.bf16.mxu1 %v8380_v1 }
 0x860   : > { %7577 = vmatpush3.bf16.msra.mxu0 %v8137_v54 }
 0x863   : > { %7579 = vmatmul.mubr.bf16.vlgmr.msra.gmra.mxu0 %v8583_v23 }
 0x91b   : > { %v7528_v14 = vpop.f32.mrf.mxu1 }
 0x91c   : > { %v2260_v15 = vsel %vm1072_vm3, %v7528_v14, -inf }
 0x91d   : > { %2261 = vmax.xlane.f32.xlu1 %v2260_v15  ;;  %v2248_v16 = vpop.f32.mrf.mxu1 }
 0x91e   : > { %v2257_v17 = vsel %vm1068_vm2, %v2248_v16, -inf }
 0x91f   : > { %2258 = vmax.xlane.f32.xlu0 %v2257_v17 }
 0x923   : > { %v2639_v5 = vpop.f32.mrf.mxu0 }
 0x924   : > { %v2640_v7 = vadd.f32 %v6464_v6, %v2639_v5 }
 0x925   : > { %v7580_v48 = vpop.f32.mrf.mxu0 }
 0x927   : > { %v2642_v50 = vpop.f32.mrf.mxu0 }
 0x928   : > { %v2643_v8 = vadd.f32 %v6464_v6, %v2642_v50 }
 0x929   : > { %v7581_v9 = vpop.f32.mrf.mxu0 }
 0x92a   : > { %7602 = vmatprep.subr.msk.mxu0 %vm980_vm1, %v2643_v8 }
 0x92b   : > { %7603 = vmatpush3.xpose.msk.msra.mxu0 %vm980_vm1, %v2643_v8 }
 0x92c   : > { %7604 = vmatprep.subr.msk.mxu0 %vm980_vm1, %v2640_v7 }
 0x92f   : > { %7605 = vmatpush3.xpose.msk.msra.mxu0 %vm980_vm1, %v2640_v7 }
 0x9a6   : > { %v2262_v18 = vpop.xlane.xlu1 %2261 }
 0x9a7   : > { %v2264_v19 = vsub.f32 %v7528_v14, %v2262_v18 }
 0x9a8   : > { %v2259_v20 = vpop.xlane.xlu0 %2258 }
 0x9a9   : > { %v2267_v24 = vmul.f32 1.442695, %v2264_v19  ;;  %v2263_v25 = vsub.f32 %v2248_v16, %v2259_v20  ;;  %v6438_v16 = vld [vmem:[%s9902_s5 + $0x3] ss:$0 sm:$0xff] }
 0x9ab   : > { %8308 = vpow2.f32 %v2267_v24  ;;  %v2265_v26 = vmul.f32 1.442695, %v2263_v25 }
 0x9ad   : > { %8310 = vpow2.f32 %v2265_v26  ;;  %v8145_v26 = vld [vmem:[%s9933_s28 + $0xe8] sm:$0xff]  }
 0x9b8   : > { %v8309_v27 = vpop.eup %8308 }
 0x9b9   : > { %v2272_v28 = vsel %vm1072_vm3, %v8309_v27, 0.0 }
 0x9ba   : > { %v8311_v29 = vpop.eup %8310  ;;  %2273 = vadd.xlane.f32.xlu1 %v2272_v28  ;;  %v8147_v28 = vld [vmem:[%s9933_s28 + $0xd8] sm:$0xff]  }
 0x9bb   : > { %v2269_v30 = vsel %vm1068_vm2, %v8311_v29, 0.0 }
 0x9bc   : > { %2270 = vadd.xlane.f32.xlu0 %v2269_v30  ;;  %v8149_v30 = vld [vmem:[%s9933_s28 + $0xc8] sm:$0xff]  }
 0xa43   : > { %v2274_v41 = vpop.xlane.xlu1 %2273 }
 0xa44   : > { %8312 = vrcp.f32 %v2274_v41 }
 0xa45   : > { %v2271_v42 = vpop.xlane.xlu0 %2270 }
 0xa46   : > { %8314 = vrcp.f32 %v2271_v42 }
 0xa51   : > { %v8313_v43 = vpop.eup %8312 }
 0xa52   : > { %v2278_v46 = vmul.f32 %v8313_v43, %v8309_v27  ;;  %v8146_v27 = vld [vmem:[%s9933_s28 + $0xe0] sm:$0xff]  }
 0xa53   : > { %v8315_v44 = vpop.eup %8314 }
 0xa54   : > { %v2276_v45 = vmul.f32 %v8315_v44, %v8311_v29  ;;  %v8148_v29 = vld [vmem:[%s9933_s28 + $0xd0] sm:$0xff]  }
 0xa56   : > { %7533 = vmatprep.mubr.msk.f32.mxu1 %vm1068_vm2, %v2276_v45 }
 0xa57   : > { %7534 = vmatmul.mubr.msk.f32.vlgmr.msra.gmra.mxu1 %vm1068_vm2, %v2278_v46  ;;  %v6490_v46 = vld [vmem:[%s9904_s7 + $0x3] ss:$0 sm:$0xff] }
 0xa58   : > { %7538 = vmatprep.mubr.msk.bf16.mxu1 %vm8381_vm0, %v8380_v1  ;;  %7537 = vmatpush3.bf16.msra.mxu1 %v8130_v49 }
 0xa59   : > { %7542 = vmatprep.subr.bf16.mxu1 %v8380_v1 }
 0xb17   : > { %v7535_v55 = vpop.f32.mrf.mxu1 }
 0xb19   : > { %v2354_v56 = vpop.f32.mrf.mxu1 }
 0xb1a   : > { %v2363_v59 = vpack.c.bf16 %v7535_v55, %v2354_v56 }
 0xb1c   : > { %7539 = vmatmul.mubr.msk.bf16.vlgmr.msra.gmra.mxu1 %vm980_vm1, %v2363_v59 }
 0xb1d   : > { %7543 = vmatpush3.bf16.msra.mxu1 %v8132_v57  ;;  %7558 = vmatprep.mubr.msk.bf16.mxu1 %vm8381_vm0, %v8380_v1 }
 0xb1e   : > { %7544 = vmatprep.subr.bf16.mxu1 %v8380_v1 }
 0xb21   : > { %7545 = vmatpush3.bf16.msra.mxu1 %v8134_v60 }
 0xb22   : > { %7546 = vmatprep.subr.bf16.mxu1 %v8380_v1 }
 0xb25   : > { %7547 = vmatpush3.bf16.msra.mxu1 %v8136_v61  ;;  %v8151_v61 = vld [vmem:[%s9905_s8 + $0x18] sm:$0xff]  }
 0xb26   : > { %7548 = vmatprep.subr.bf16.mxu1 %v8380_v1 }
 0xb29   : > { %7549 = vmatpush3.bf16.msra.mxu1 %v8138_v63 }
 0xb2a   : > { %7550 = vmatprep.subr.bf16.mxu1 %v8380_v1 }
 0xb2d   : > { %7551 = vmatpush3.bf16.msra.mxu1 %v8139_v0 }
 0xb2e   : > { %7552 = vmatprep.subr.bf16.mxu1 %v8380_v1 }
 0xb31   : > { %7553 = vmatpush3.bf16.msra.mxu1 %v8140_v2 }
 0xb32   : > { %7554 = vmatprep.subr.bf16.mxu1 %v8380_v1 }
 0xb35   : > { %7555 = vmatpush3.bf16.msra.mxu1 %v8141_v3 }
 0xb36   : > { %7556 = vmatprep.subr.bf16.mxu1 %v8380_v1 }
 0xb39   : > { %7557 = vmatpush3.bf16.msra.mxu1 %v8142_v4 }
 0xb3a   : > { %7582 = vmatprep.subr.bf16.mxu1 %v8380_v1 }
 0xb3c   : > { %7559 = vmatmul.mubr.bf16.vlgmr.msra.gmra.mxu1 %v8583_v23 }
 0xb3d   : > { %7598 = vmatprep.mubr.msk.bf16.mxu1 %vm8381_vm0, %v8380_v1 }
 0xbdc   : > { %v2409_v10 = vpop.f32.mrf.mxu1 }
 0xbdd   : > { %v9016_v11 = vadd.f32 %v2409_v10, %v8872_v58  ;;  %v8143_v58 = vld [vmem:[%s9933_s28 + $0xf8] sm:$0xff]   ;;  %v637_v10 = vlaneseq }
 0xbde   : > { %v7540_v12 = vpop.f32.mrf.mxu1  ;;  %7583 = vmatpush3.bf16.msra.mxu1 %v8143_v58  ;;  %v8153_v58 = vld [vmem:[%s9909_s12 + $0x30] sm:$0xff]  }
 0xbdf   : > { %7584 = vmatprep.subr.bf16.mxu1 %v8380_v1  ;;  %v638_v12 = vand.u32 127, %v637_v10 }
 0xbe0   : > { %v2412_v13 = vpop.f32.mrf.mxu1 }
 0xbe1   : > { %v9019_v14 = vadd.f32 %v2412_v13, %v8875_v62  ;;  %v8144_v62 = vld [vmem:[%s9933_s28 + $0xf0] sm:$0xff]   ;;  %vm639_vm5 = vcmp.lt.s32.totalorder %v638_v12, 64 }
 0xbe2   : > { %v7541_v15 = vpop.f32.mrf.mxu1  ;;  %7585 = vmatpush3.bf16.msra.mxu1 %v8144_v62  ;;  %v8154_v62 = vld [vmem:[%s9909_s12 + $0x28] sm:$0xff]  }
 0xbe3   : > { %7586 = vmatprep.subr.bf16.mxu1 %v8380_v1 }
 0xbe6   : > { %7587 = vmatpush3.bf16.msra.mxu1 %v8145_v26  ;;  %v8155_v26 = vld [vmem:[%s9909_s12 + $0x20] sm:$0xff]  }
 0xbe7   : > { %7588 = vmatprep.subr.bf16.mxu1 %v8380_v1 }
 0xbea   : > { %7589 = vmatpush3.bf16.msra.mxu1 %v8146_v27  ;;  %v8156_v27 = vld [vmem:[%s9909_s12 + $0x18] sm:$0xff]  }
 0xbeb   : > { %7590 = vmatprep.subr.bf16.mxu1 %v8380_v1 }
 0xbee   : > { %7591 = vmatpush3.bf16.msra.mxu1 %v8147_v28  ;;  %v8157_v28 = vld [vmem:[%s9909_s12 + $0x10] sm:$0xff]  }
 0xbef   : > { %7592 = vmatprep.subr.bf16.mxu1 %v8380_v1 }
 0xbf2   : > { %7593 = vmatpush3.bf16.msra.mxu1 %v8148_v29  ;;  %v8158_v29 = vld [vmem:[%s9909_s12 + $0x8] sm:$0xff]  }
 0xbf3   : > { %7594 = vmatprep.subr.bf16.mxu1 %v8380_v1 }
 0xbf6   : > { %7595 = vmatpush3.bf16.msra.mxu1 %v8149_v30  ;;  %v8159_v30 = vld [vmem:[%s9909_s12] sm:$0xff]  }
 0xbf7   : > { %7596 = vmatprep.subr.bf16.mxu1 %v8380_v1 }
 0xbfa   : > { %7597 = vmatpush3.bf16.msra.mxu1 %v8150_v31  ;;  %v8160_v31 = vld [vmem:[%s9911_s14 + $0x38] sm:$0xff]  }
 0xbfb   : > { %7642 = vmatprep.subr.bf16.mxu1 %v8380_v1 }
 0xbfc   : > { %v2525_v17 = vpop.f32.mrf.mxu1 }
 0xbfd   : > { %v2526_v18 = vadd.f32 %v6438_v16, %v2525_v17  ;;  %7599 = vmatmul.mubr.bf16.vlgmr.msra.gmra.mxu1 %v8583_v23 }
 0xbfe   : > { %v7560_v19 = vpop.f32.mrf.mxu1  ;;  %7658 = vmatprep.mubr.msk.bf16.mxu1 %vm8381_vm0, %v8380_v1  ;;  %7643 = vmatpush3.bf16.msra.mxu1 %v8160_v31  ;;  %v8174_v31 = vld [vmem:[%s9930_s26 + $0x120] sm:$0xff]  }
 0xbff   : > { %7606 = vmatprep.mubr.msk.f32.mxu0 %vm980_vm1, %v2526_v18  ;;  %7644 = vmatprep.subr.bf16.mxu1 %v8380_v1 }
 0xc00   : > { %v2528_v20 = vpop.f32.mrf.mxu1 }
 0xc01   : > { %v2529_v24 = vadd.f32 %v6438_v16, %v2528_v20 }
 0xc02   : > { %v7561_v25 = vpop.f32.mrf.mxu1 }
 0xc03   : > { %7607 = vmatmul.mubr.msk.f32.vlgmr.msra.gmra.mxu0 %vm980_vm1, %v2529_v24  ;;  %v8152_v25 = vld [vmem:[%s9909_s12 + $0x38] sm:$0xff]  }
 0xcbd   : > { %v2753_v45 = vpop.f32.mrf.mxu1 }
 0xcbe   : > { %v2754_v51 = vadd.f32 %v6490_v46, %v2753_v45 }
 0xcbf   : > { %v7600_v47 = vpop.f32.mrf.mxu1 }
 0xcc0   : > { %v6509_v47 = vld [vmem:[%s9908_s11] ss:$0 sm:$0xff] }
 0xcc1   : > { %v2756_v49 = vpop.f32.mrf.mxu1 }
 0xcc2   : > { %v2757_v52 = vadd.f32 %v6490_v46, %v2756_v49 }
 0xcc3   : > { %v7608_v32 = vpop.f32.mrf.mxu0  ;;  %v7601_v53 = vpop.f32.mrf.mxu1 }
 0xcc4   : > { %v2850_v33 = vsel %vm1072_vm3, %v7608_v32, -inf  ;;  %7609 = vmatprep.subr.msk.mxu0 %vm1098_vm4, %v2757_v52 }
 0xcc5   : > { %2851 = vmax.xlane.f32.xlu1 %v2850_v33  ;;  %v2838_v34 = vpop.f32.mrf.mxu0  ;;  %7610 = vmatpush3.msk.msra.mxu0 %vm1098_vm4, %v2757_v52  ;;  %v8162_v33 = vld [vmem:[%s9911_s14 + $0x28] sm:$0xff]  }
 0xcc6   : > { %v2847_v35 = vsel %vm1068_vm2, %v2838_v34, -inf  ;;  %7611 = vmatprep.subr.mxu0 %v2754_v51 }
 0xcc7   : > { %2848 = vmax.xlane.f32.xlu0 %v2847_v35  ;;  %7612 = vmatpush3.msra.mxu0 %v2754_v51  ;;  %v8164_v35 = vld [vmem:[%s9911_s14 + $0x18] sm:$0xff]  }
 0xcc8   : > { %7616 = vmatprep.subr.bf16.mxu0 %v8380_v1 }
 0xd4e   : > { %v2852_v36 = vpop.xlane.xlu1 %2851 }
 0xd4f   : > { %v2854_v37 = vsub.f32 %v7608_v32, %v2852_v36  ;;  %v8161_v32 = vld [vmem:[%s9911_s14 + $0x30] sm:$0xff]  }
 0xd50   : > { %v2849_v38 = vpop.xlane.xlu0 %2848  ;;  %7645 = vmatpush3.bf16.msra.mxu1 %v8161_v32  ;;  %v8175_v32 = vld [vmem:[%s9929_s2 + $0x120] sm:$0xff]  }
 0xd51   : > { %v2857_v39 = vmul.f32 1.442695, %v2854_v37  ;;  %v2853_v40 = vsub.f32 %v2838_v34, %v2849_v38  ;;  %7646 = vmatprep.subr.bf16.mxu1 %v8380_v1  ;;  %v8163_v34 = vld [vmem:[%s9911_s14 + $0x20] sm:$0xff]  }
 0xd53   : > { %8316 = vpow2.f32 %v2857_v39  ;;  %v2855_v41 = vmul.f32 1.442695, %v2853_v40 }
 0xd54   : > { %7647 = vmatpush3.bf16.msra.mxu1 %v8162_v33  ;;  %v8176_v33 = vld [vmem:[%s9930_s26 + $0x118] sm:$0xff]  }
 0xd55   : > { %8318 = vpow2.f32 %v2855_v41  ;;  %7648 = vmatprep.subr.bf16.mxu1 %v8380_v1 }
 0xd58   : > { %7649 = vmatpush3.bf16.msra.mxu1 %v8163_v34  ;;  %v8177_v34 = vld [vmem:[%s9929_s2 + $0x118] sm:$0xff]  }
 0xd59   : > { %7650 = vmatprep.subr.bf16.mxu1 %v8380_v1 }
 0xd5c   : > { %7651 = vmatpush3.bf16.msra.mxu1 %v8164_v35  ;;  %v8178_v35 = vld [vmem:[%s9930_s26 + $0x110] sm:$0xff]  }
 0xd5d   : > { %7652 = vmatprep.subr.bf16.mxu1 %v8380_v1 }
 0xd60   : > { %v8317_v23 = vpop.eup %8316 }
 0xd61   : > { %v2862_v42 = vsel %vm1072_vm3, %v8317_v23, 0.0 }
 0xd62   : > { %v8319_v43 = vpop.eup %8318  ;;  %2863 = vadd.xlane.f32.xlu1 %v2862_v42 }
 0xd63   : > { %v2859_v44 = vsel %vm1068_vm2, %v8319_v43, 0.0 }
 0xd64   : > { %2860 = vadd.xlane.f32.xlu0 %v2859_v44 }
 0xdeb   : > { %v2864_v54 = vpop.xlane.xlu1 %2863 }
 0xdec   : > { %8320 = vrcp.f32 %v2864_v54  ;;  %v8165_v54 = vld [vmem:[%s9911_s14 + $0x10] sm:$0xff]  }
 0xded   : > { %v2861_v55 = vpop.xlane.xlu0 %2860  ;;  %7653 = vmatpush3.bf16.msra.mxu1 %v8165_v54  ;;  %v6529_v54 = vld [vmem:[%s9914_s17] ss:$0 sm:$0xff] }
 0xdee   : > { %8322 = vrcp.f32 %v2861_v55  ;;  %7654 = vmatprep.subr.bf16.mxu1 %v8380_v1  ;;  %v8166_v55 = vld [vmem:[%s9911_s14 + $0x8] sm:$0xff]  }
 0xdf1   : > { %7655 = vmatpush3.bf16.msra.mxu1 %v8166_v55 }
 0xdf2   : > { %7656 = vmatprep.subr.bf16.mxu1 %v8380_v1 }
 0xdf9   : > { %v8321_v56 = vpop.eup %8320 }
 0xdfa   : > { %v2868_v60 = vmul.f32 %v8321_v56, %v8317_v23  ;;  %v8167_v56 = vld [vmem:[%s9911_s14] sm:$0xff]  }
 0xdfb   : > { %v8323_v57 = vpop.eup %8322  ;;  %7657 = vmatpush3.bf16.msra.mxu1 %v8167_v56 }
 0xdfc   : > { %v2866_v59 = vmul.f32 %v8323_v57, %v8319_v43  ;;  %v6508_v43 = vld [vmem:[%s9907_s10] ss:$0 sm:$0xff]  ;;  %7682 = vmatprep.subr.bf16.mxu1 %v8380_v1 }
 0xdfd   : > { %v6510_v57 = vld [vmem:[%s9910_s13] ss:$0 sm:$0xff] }
 0xdfe   : > { %7613 = vmatprep.mubr.msk.f32.mxu0 %vm1068_vm2, %v2866_v59 }
 0xdff   : > { %7614 = vmatmul.mubr.msk.f32.vlgmr.msra.gmra.mxu0 %vm1068_vm2, %v2868_v60 }
 0xe00   : > { %7618 = vmatprep.mubr.msk.bf16.mxu0 %vm8381_vm0, %v8380_v1  ;;  %7617 = vmatpush3.bf16.msra.mxu0 %v8151_v61 }
 0xe01   : > { %7622 = vmatprep.subr.bf16.mxu0 %v8380_v1 }
 0xebf   : > { %v7615_v63 = vpop.f32.mrf.mxu0 }
 0xec1   : > { %v2944_v0 = vpop.f32.mrf.mxu0 }
 0xec2   : > { %v2953_v2 = vpack.c.bf16 %v7615_v63, %v2944_v0 }
 0xec4   : > { %7619 = vmatmul.mubr.msk.bf16.vlgmr.msra.gmra.mxu0 %vm980_vm1, %v2953_v2 }
 0xec5   : > { %7638 = vmatprep.mubr.msk.bf16.mxu0 %vm8381_vm0, %v8380_v1  ;;  %7623 = vmatpush3.bf16.msra.mxu0 %v8152_v25 }
 0xec6   : > { %7624 = vmatprep.subr.bf16.mxu0 %v8380_v1 }
 0xec9   : > { %7625 = vmatpush3.bf16.msra.mxu0 %v8153_v58 }
 0xeca   : > { %7626 = vmatprep.subr.bf16.mxu0 %v8380_v1 }
 0xecd   : > { %7627 = vmatpush3.bf16.msra.mxu0 %v8154_v62  ;;  %v8168_v62 = vld [vmem:[%s9930_s26 + $0x138] sm:$0xff]  }
 0xece   : > { %7628 = vmatprep.subr.bf16.mxu0 %v8380_v1 }
 0xed1   : > { %7629 = vmatpush3.bf16.msra.mxu0 %v8155_v26  ;;  %v8169_v26 = vld [vmem:[%s9929_s2 + $0x138] sm:$0xff]  }
 0xed2   : > { %7630 = vmatprep.subr.bf16.mxu0 %v8380_v1 }
 0xed5   : > { %7631 = vmatpush3.bf16.msra.mxu0 %v8156_v27  ;;  %v8170_v27 = vld [vmem:[%s9930_s26 + $0x130] sm:$0xff]  }
 0xed6   : > { %7632 = vmatprep.subr.bf16.mxu0 %v8380_v1 }
 0xed9   : > { %7633 = vmatpush3.bf16.msra.mxu0 %v8157_v28  ;;  %v8171_v28 = vld [vmem:[%s9929_s2 + $0x130] sm:$0xff]  }
 0xeda   : > { %7634 = vmatprep.subr.bf16.mxu0 %v8380_v1 }
 0xedd   : > { %7635 = vmatpush3.bf16.msra.mxu0 %v8158_v29  ;;  %v8172_v29 = vld [vmem:[%s9930_s26 + $0x128] sm:$0xff]  }
 0xede   : > { %7636 = vmatprep.subr.bf16.mxu0 %v8380_v1 }
 0xee1   : > { %7637 = vmatpush3.bf16.msra.mxu0 %v8159_v30  ;;  %v8173_v30 = vld [vmem:[%s9929_s2 + $0x128] sm:$0xff]  }
 0xee2   : > { %7662 = vmatprep.subr.bf16.mxu0 %v8380_v1 }
 0xf84   : > { %v2999_v3 = vpop.f32.mrf.mxu0 }
 0xf85   : > { %v3006_v4 = vadd.f32 %v2999_v3, %v9016_v11  ;;  %v9088_v11 = vsel %vm639_vm5, 1.0, %v8380_v1 }
 0xf86   : > { %v7620_v5 = vpop.f32.mrf.mxu0 }
 0xf87   : > { %v3008_v6 = vadd.f32 %v3006_v4, %v8575_v21 }
 0xf88   : > { %v3002_v48 = vpop.f32.mrf.mxu0 }
 0xf89   : > { %v3007_v50 = vadd.f32 %v3002_v48, %v9019_v14  ;;  %3012 = vadd.xlane.f32.xlu1 %v3008_v6  ;;  %v6527_v48 = vld [vmem:[%s9912_s15] ss:$0 sm:$0xff] }
 0xf8a   : > { %v7621_v7 = vpop.f32.mrf.mxu0 }
 0xf8b   : > { %v3009_v8 = vadd.f32 %v3007_v50, %v8577_v22 }
 0xf8d   : > { %v3014_v9 = vsel %vm1098_vm4, %v3009_v8, 0.0 }
 0xf8e   : > { %3015 = vadd.xlane.f32.xlu0 %v3014_v9 }
0x1012   : > { %v3013_v13 = vpop.xlane.xlu1 %3012 }
0x1013   : > { %v3017_v15 = vmul.f32 0.015625, %v3013_v13 }
0x1015   : > { %v3019_v16 = vsub.f32 %v3008_v6, %v3017_v15 }
0x1017   : > { %v3016_v21 = vpop.xlane.xlu0 %3015  ;;  %v3021_v17 = vmul.f32 %v3019_v16, %v3019_v16 }
0x1018   : > { %v3018_v18 = vmul.f32 0.015625, %v3016_v21 }
0x1019   : > { %v3023_v14 = vmul.f32 %v9088_v11, %v3021_v17 }
0x101a   : > { %v3020_v19 = vsub.f32 %v3009_v8, %v3018_v18 }
0x101b   : > { %3025 = vadd.xlane.f32.xlu0 %v3023_v14 }
0x101c   : > { %v3022_v22 = vmul.f32 %v3020_v19, %v3020_v19 }
0x101e   : > { %v3024_v20 = vmul.f32 %v9088_v11, %v3022_v22 }
0x1020   : > { %v3027_v24 = vsel %vm1098_vm4, %v3024_v20, 0.0 }
0x1021   : > { %3028 = vadd.xlane.f32.xlu1 %v3027_v24 }
0x10a4   : > { %v3026_v36 = vpop.xlane.xlu0 %3025 }
0x10a5   : > { %v3030_v37 = vmul.f32 0.015625, %v3026_v36  ;;  %v8179_v36 = vld [vmem:[%s9929_s2 + $0x110] sm:$0xff]  }
0x10a7   : > { %v3032_v38 = vadd.f32 1e-05, %v3030_v37  ;;  %v8180_v37 = vld [vmem:[%s9930_s26 + $0x108] sm:$0xff]  }
0x10a9   : > { %8324 = vrsqrt.f32 %v3032_v38  ;;  %v8181_v38 = vld [vmem:[%s9929_s2 + $0x108] sm:$0xff]  }
0x10aa   : > { %v3029_v39 = vpop.xlane.xlu1 %3028 }
0x10ab   : > { %v3031_v40 = vmul.f32 0.015625, %v3029_v39  ;;  %v8182_v39 = vld [vmem:[%s9930_s26 + $0x100] sm:$0xff]  }
0x10ad   : > { %v3033_v41 = vadd.f32 1e-05, %v3031_v40  ;;  %v8183_v40 = vld [vmem:[%s9929_s2 + $0x100] sm:$0xff]  }
0x10af   : > { %8326 = vrsqrt.f32 %v3033_v41 }
0x10b6   : > { %v8325_v23 = vpop.eup %8324 }
0x10b7   : > { %v3036_v42 = vmul.f32 %v8325_v23, %v3019_v16 }
0x10b9   : > { %v3044_v46 = vmul.f32 %v6508_v43, %v3036_v42 }
0x10bb   : > { %v3052_v51 = vadd.f32 %v6509_v47, %v3044_v46 }
0x10bc   : > { %v8327_v44 = vpop.eup %8326 }
0x10bd   : > { %v3037_v45 = vmul.f32 %v8327_v44, %v3020_v19 }
0x10bf   : > { %v3045_v49 = vmul.f32 %v6508_v43, %v3037_v45 }
0x10c1   : > { %v3053_v52 = vadd.f32 %v6509_v47, %v3045_v49  ;;  %v6528_v49 = vld [vmem:[%s9913_s16] ss:$0 sm:$0xff] }
0x10c3   : > { %v3054_v53 = vpack.c.bf16 %v3053_v52, %v3052_v51 }
0x10c5   : > { %7639 = vmatmul.mubr.bf16.vlgmr.msra.gmra.mxu0 %v3054_v53 }
0x10c6   : > { %7678 = vmatprep.mubr.msk.bf16.mxu0 %vm8381_vm0, %v8380_v1  ;;  %7663 = vmatpush3.bf16.msra.mxu0 %v8168_v62 }
0x10c7   : > { %7664 = vmatprep.subr.bf16.mxu0 %v8380_v1 }
0x10ca   : > { %7665 = vmatpush3.bf16.msra.mxu0 %v8170_v27 }
0x10cb   : > { %7666 = vmatprep.subr.bf16.mxu0 %v8380_v1 }
0x10ce   : > { %7667 = vmatpush3.bf16.msra.mxu0 %v8172_v29 }
0x10cf   : > { %7668 = vmatprep.subr.bf16.mxu0 %v8380_v1 }
0x10d2   : > { %7669 = vmatpush3.bf16.msra.mxu0 %v8174_v31 }
0x10d3   : > { %7670 = vmatprep.subr.bf16.mxu0 %v8380_v1 }
0x10d6   : > { %7671 = vmatpush3.bf16.msra.mxu0 %v8176_v33 }
0x10d7   : > { %7672 = vmatprep.subr.bf16.mxu0 %v8380_v1 }
0x10da   : > { %7673 = vmatpush3.bf16.msra.mxu0 %v8178_v35  ;;  %v6664_v35 = vld [vmem:[%s9903_s6 + $0x5] ss:$0 sm:$0xff] }
0x10db   : > { %7674 = vmatprep.subr.bf16.mxu0 %v8380_v1 }
0x10de   : > { %7675 = vmatpush3.bf16.msra.mxu0 %v8180_v37 }
0x10df   : > { %7676 = vmatprep.subr.bf16.mxu0 %v8380_v1 }
0x10e2   : > { %7677 = vmatpush3.bf16.msra.mxu0 %v8182_v39 }
0x10e3   : > { %7702 = vmatprep.subr.bf16.mxu0 %v8380_v1 }
0x1185   : > { %v3160_v59 = vpop.f32.mrf.mxu0 }
0x1186   : > { %v3161_v61 = vadd.f32 %v6510_v57, %v3160_v59  ;;  %v8184_v59 = vld [vmem:[%s9933_s28 + $0x138] sm:$0xff]  }
0x1187   : > { %v7640_v60 = vpop.f32.mrf.mxu0 }
0x1188   : > { %v3167_v3 = vmax.f32 %v3161_v61, 0.0  ;;  %v8185_v61 = vld [vmem:[%s9933_s28 + $0x130] sm:$0xff]  }
0x1189   : > { %v3163_v63 = vpop.f32.mrf.mxu0 }
0x118a   : > { %v3164_v0 = vadd.f32 %v6510_v57, %v3163_v63  ;;  %v8186_v63 = vld [vmem:[%s9933_s28 + $0x128] sm:$0xff]  }
0x118b   : > { %v7641_v2 = vpop.f32.mrf.mxu0 }
0x118c   : > { %v3168_v4 = vmax.f32 %v3164_v0, 0.0  ;;  %v8187_v0 = vld [vmem:[%s9933_s28 + $0x120] sm:$0xff]   ;;  %v8188_v2 = vld [vmem:[%s9933_s28 + $0x118] sm:$0xff]  }
0x118e   : > { %v3169_v5 = vpack.c.bf16 %v3168_v4, %v3167_v3  ;;  %v8189_v3 = vld [vmem:[%s9933_s28 + $0x110] sm:$0xff]   ;;  %v8190_v4 = vld [vmem:[%s9933_s28 + $0x108] sm:$0xff]  }
0x1190   : > { %7659 = vmatmul.mubr.bf16.vlgmr.msra.gmra.mxu1 %v3169_v5  ;;  %v8191_v5 = vld [vmem:[%s9933_s28 + $0x100] sm:$0xff]  }
0x1191   : > { %7698 = vmatprep.mubr.msk.bf16.mxu1 %vm8381_vm0, %v8380_v1  ;;  %7683 = vmatpush3.bf16.msra.mxu1 %v8169_v26 }
0x1192   : > { %7684 = vmatprep.subr.bf16.mxu1 %v8380_v1 }
0x1195   : > { %7685 = vmatpush3.bf16.msra.mxu1 %v8171_v28  ;;  %v6600_v28 = vld [vmem:[%s9904_s7 + $0x4] ss:$0 sm:$0xff] }
0x1196   : > { %7686 = vmatprep.subr.bf16.mxu1 %v8380_v1 }
0x1199   : > { %7687 = vmatpush3.bf16.msra.mxu1 %v8173_v30 }
0x119a   : > { %7688 = vmatprep.subr.bf16.mxu1 %v8380_v1 }
0x119d   : > { %7689 = vmatpush3.bf16.msra.mxu1 %v8175_v32 }
0x119e   : > { %7690 = vmatprep.subr.bf16.mxu1 %v8380_v1 }
0x11a1   : > { %7691 = vmatpush3.bf16.msra.mxu1 %v8177_v34 }
0x11a2   : > { %7692 = vmatprep.subr.bf16.mxu1 %v8380_v1 }
0x11a5   : > { %7693 = vmatpush3.bf16.msra.mxu1 %v8179_v36 }
0x11a6   : > { %7694 = vmatprep.subr.bf16.mxu1 %v8380_v1 }
0x11a9   : > { %7695 = vmatpush3.bf16.msra.mxu1 %v8181_v38 }
0x11aa   : > { %7696 = vmatprep.subr.bf16.mxu1 %v8380_v1 }
0x11ad   : > { %7697 = vmatpush3.bf16.msra.mxu1 %v8183_v40 }
0x1250   : > { %v3268_v6 = vpop.f32.mrf.mxu1 }
0x1251   : > { %v3275_v50 = vadd.f32 %v3268_v6, %v3052_v51  ;;  %v8192_v6 = vld [vmem:[%s9929_s2 + $0x178] sm:$0xff]  }
0x1252   : > { %v7660_v7 = vpop.f32.mrf.mxu1 }
0x1253   : > { %v3284_v8 = vadd.f32 %v6527_v48, %v3275_v50  ;;  %v8194_v50 = vld [vmem:[%s9929_s2 + $0x168] sm:$0xff]   ;;  %v8195_v7 = vld [vmem:[%s9929_s2 + $0x160] sm:$0xff]  }
0x1254   : > { %v3271_v9 = vpop.f32.mrf.mxu1 }
0x1255   : > { %v3276_v10 = vadd.f32 %v3271_v9, %v3053_v52  ;;  %3288 = vadd.xlane.f32.xlu1 %v3284_v8  ;;  %v8197_v9 = vld [vmem:[%s9929_s2 + $0x150] sm:$0xff]  }
0x1256   : > { %v7661_v12 = vpop.f32.mrf.mxu1 }
0x1257   : > { %v3285_v13 = vadd.f32 %v6527_v48, %v3276_v10  ;;  %v8193_v48 = vld [vmem:[%s9929_s2 + $0x170] sm:$0xff]   ;;  %v8198_v10 = vld [vmem:[%s9929_s2 + $0x148] sm:$0xff]   ;;  %v8199_v12 = vld [vmem:[%s9929_s2 + $0x140] sm:$0xff]  }
0x1259   : > { %v3290_v15 = vsel %vm1098_vm4, %v3285_v13, 0.0 }
0x125a   : > { %3291 = vadd.xlane.f32.xlu0 %v3290_v15 }
0x12de   : > { %v3289_v16 = vpop.xlane.xlu1 %3288 }
0x12df   : > { %v3293_v21 = vmul.f32 0.015625, %v3289_v16 }
0x12e1   : > { %v9174_v17 = vsub.f32 %v3284_v8, %v3293_v21  ;;  %v8196_v8 = vld [vmem:[%s9929_s2 + $0x158] sm:$0xff]  }
0x12e3   : > { %v3292_v18 = vpop.xlane.xlu0 %3291  ;;  %v3297_v14 = vmul.f32 %v9174_v17, %v9174_v17 }
0x12e4   : > { %v3294_v19 = vmul.f32 0.015625, %v3292_v18 }
0x12e5   : > { %v3299_v22 = vmul.f32 %v9088_v11, %v3297_v14  ;;  %v6574_v14 = vld [vmem:[%s9903_s6 + $0x4] ss:$0 sm:$0xff] }
0x12e6   : > { %v9179_v20 = vsub.f32 %v3285_v13, %v3294_v19  ;;  %v6548_v13 = vld [vmem:[%s9902_s5 + $0x4] ss:$0 sm:$0xff] }
0x12e7   : > { %3301 = vadd.xlane.f32.xlu0 %v3299_v22 }
0x12e8   : > { %v3298_v24 = vmul.f32 %v9179_v20, %v9179_v20 }
0x12ea   : > { %v3300_v25 = vmul.f32 %v9088_v11, %v3298_v24 }
0x12ec   : > { %v3303_v58 = vsel %vm1098_vm4, %v3300_v25, 0.0 }
0x12ed   : > { %3304 = vadd.xlane.f32.xlu1 %v3303_v58 }
0x1370   : > { %v3302_v41 = vpop.xlane.xlu0 %3301 }
0x1371   : > { %v3306_v23 = vmul.f32 0.015625, %v3302_v41 }
0x1373   : > { %v3308_v42 = vadd.f32 1e-05, %v3306_v23 }
0x1375   : > { %8328 = vrsqrt.f32 %v3308_v42 }
0x1376   : > { %v3305_v43 = vpop.xlane.xlu1 %3304 }
0x1377   : > { %v3307_v44 = vmul.f32 0.015625, %v3305_v43 }
0x1379   : > { %v3309_v45 = vadd.f32 1e-05, %v3307_v44 }
0x137b   : > { %8330 = vrsqrt.f32 %v3309_v45 }
0x1382   : > { %v8329_v46 = vpop.eup %8328 }
0x1383   : > { %v3312_v47 = vmul.f32 %v8329_v46, %v9174_v17 }
0x1385   : > { %v3320_v52 = vmul.f32 %v6528_v49, %v3312_v47 }
0x1387   : > { %v9256_v56 = vadd.f32 %v6529_v54, %v3320_v52 }
0x1388   : > { %v8331_v51 = vpop.eup %8330 }
0x1389   : > { %v3313_v53 = vmul.f32 %v8331_v51, %v9179_v20 }
0x138b   : > { %v3321_v55 = vmul.f32 %v6528_v49, %v3313_v53 }
0x138d   : > { %v9258_v57 = vadd.f32 %v6529_v54, %v3321_v55 }
0x138f   : > { %v9265_v60 = vpack.c.bf16 %v9258_v57, %v9256_v56 }
0x1391   : > { %7679 = vmatmul.mubr.bf16.vlgmr.msra.gmra.mxu0 %v9265_v60  ;;  %7699 = vmatmul.mubr.bf16.vlgmr.msra.gmra.mxu1 %v9265_v60 }
0x1392   : > { %7703 = vmatpush3.bf16.msra.mxu0 %v8184_v59  ;;  %7718 = vmatprep.mubr.msk.bf16.mxu0 %vm8381_vm0, %v8380_v1 }
0x1393   : > { %7704 = vmatprep.subr.bf16.mxu0 %v8380_v1 }
0x1396   : > { %7705 = vmatpush3.bf16.msra.mxu0 %v8185_v61 }
0x1397   : > { %7706 = vmatprep.subr.bf16.mxu0 %v8380_v1 }
0x139a   : > { %7707 = vmatpush3.bf16.msra.mxu0 %v8186_v63 }
0x139b   : > { %7708 = vmatprep.subr.bf16.mxu0 %v8380_v1 }
0x139e   : > { %7709 = vmatpush3.bf16.msra.mxu0 %v8187_v0 }
0x139f   : > { %7710 = vmatprep.subr.bf16.mxu0 %v8380_v1 }
0x13a2   : > { %7711 = vmatpush3.bf16.msra.mxu0 %v8188_v2 }
0x13a3   : > { %7712 = vmatprep.subr.bf16.mxu0 %v8380_v1 }
0x13a6   : > { %7713 = vmatpush3.bf16.msra.mxu0 %v8189_v3  ;;  %v8200_v3 = vld [vmem:[%s9905_s8 + $0x20] sm:$0xff]  }
0x13a7   : > { %7714 = vmatprep.subr.bf16.mxu0 %v8380_v1 }
0x13aa   : > { %7715 = vmatpush3.bf16.msra.mxu0 %v8190_v4 }
0x13ab   : > { %7716 = vmatprep.subr.bf16.mxu0 %v8380_v1 }
0x13ae   : > { %7717 = vmatpush3.bf16.msra.mxu0 %v8191_v5 }
0x13af   : > { %7762 = vmatprep.subr.bf16.mxu0 %v8380_v1 }
0x13b1   : > { %7719 = vmatmul.mubr.bf16.vlgmr.msra.gmra.mxu0 %v9265_v60 }
0x13b2   : > { %7763 = vmatpush3.bf16.msra.mxu0 %v8192_v6  ;;  %7778 = vmatprep.mubr.msk.bf16.mxu0 %vm8381_vm0, %v8380_v1  ;;  %v8201_v6 = vld [vmem:[%s9930_s26 + $0x178] sm:$0xff]  }
0x13b3   : > { %7764 = vmatprep.subr.bf16.mxu0 %v8380_v1 }
0x13b6   : > { %7765 = vmatpush3.bf16.msra.mxu0 %v8193_v48 }
0x13b7   : > { %7766 = vmatprep.subr.bf16.mxu0 %v8380_v1 }
0x13ba   : > { %7767 = vmatpush3.bf16.msra.mxu0 %v8194_v50  ;;  %v8202_v50 = vld [vmem:[%s9930_s26 + $0x170] sm:$0xff]  }
0x13bb   : > { %7768 = vmatprep.subr.bf16.mxu0 %v8380_v1 }
0x13be   : > { %7769 = vmatpush3.bf16.msra.mxu0 %v8195_v7  ;;  %v8203_v7 = vld [vmem:[%s9930_s26 + $0x168] sm:$0xff]  }
0x13bf   : > { %7770 = vmatprep.subr.bf16.mxu0 %v8380_v1 }
0x13c2   : > { %7771 = vmatpush3.bf16.msra.mxu0 %v8196_v8  ;;  %v8204_v8 = vld [vmem:[%s9930_s26 + $0x160] sm:$0xff]  }
0x13c3   : > { %7772 = vmatprep.subr.bf16.mxu0 %v8380_v1 }
0x13c6   : > { %7773 = vmatpush3.bf16.msra.mxu0 %v8197_v9  ;;  %v8205_v9 = vld [vmem:[%s9930_s26 + $0x158] sm:$0xff]  }
0x13c7   : > { %7774 = vmatprep.subr.bf16.mxu0 %v8380_v1 }
0x13ca   : > { %7775 = vmatpush3.bf16.msra.mxu0 %v8198_v10  ;;  %v8206_v10 = vld [vmem:[%s9930_s26 + $0x150] sm:$0xff]  }
0x13cb   : > { %7776 = vmatprep.subr.bf16.mxu0 %v8380_v1 }
0x13ce   : > { %7777 = vmatpush3.bf16.msra.mxu0 %v8199_v12  ;;  %v8207_v12 = vld [vmem:[%s9930_s26 + $0x148] sm:$0xff]  }
0x13d1   : > { %7779 = vmatmul.mubr.bf16.vlgmr.msra.gmra.mxu0 %v9265_v60 }
0x1451   : > { %v3440_v15 = vpop.f32.mrf.mxu0  ;;  %v3554_v16 = vpop.f32.mrf.mxu1 }
0x1452   : > { %v3441_v21 = vadd.f32 %v6548_v13, %v3440_v15  ;;  %v3555_v58 = vadd.f32 %v6574_v14, %v3554_v16  ;;  %v8209_v15 = vld [vmem:[%s9933_s28 + $0x178] sm:$0xff]   ;;  %v8210_v16 = vld [vmem:[%s9933_s28 + $0x170] sm:$0xff]  }
0x1453   : > { %v7680_v17 = vpop.f32.mrf.mxu0  ;;  %v7700_v18 = vpop.f32.mrf.mxu1 }
0x1454   : > { %7726 = vmatprep.mubr.msk.f32.mxu1 %vm980_vm1, %v3441_v21  ;;  %v8211_v21 = vld [vmem:[%s9933_s28 + $0x168] sm:$0xff]   ;;  %v8212_v17 = vld [vmem:[%s9933_s28 + $0x160] sm:$0xff]   ;;  %v8213_v18 = vld [vmem:[%s9933_s28 + $0x158] sm:$0xff]  }
0x1455   : > { %v3443_v19 = vpop.f32.mrf.mxu0  ;;  %v3557_v22 = vpop.f32.mrf.mxu1 }
0x1456   : > { %v3558_v20 = vadd.f32 %v6574_v14, %v3557_v22  ;;  %v3444_v62 = vadd.f32 %v6548_v13, %v3443_v19  ;;  %v8208_v13 = vld [vmem:[%s9930_s26 + $0x140] sm:$0xff]   ;;  %v8214_v14 = vld [vmem:[%s9933_s28 + $0x150] sm:$0xff]   ;;  %v8215_v19 = vld [vmem:[%s9933_s28 + $0x148] sm:$0xff]  }
0x1457   : > { %v7681_v24 = vpop.f32.mrf.mxu0  ;;  %v7701_v25 = vpop.f32.mrf.mxu1  ;;  %v8216_v22 = vld [vmem:[%s9933_s28 + $0x140] sm:$0xff]  }
0x1458   : > { %7722 = vmatprep.subr.msk.mxu1 %vm980_vm1, %v3558_v20  ;;  %v8218_v24 = vld [vmem:[%s9929_s2 + $0x1b0] sm:$0xff]   ;;  %v8219_v25 = vld [vmem:[%s9929_s2 + $0x1a8] sm:$0xff]  }
0x1459   : > { %7723 = vmatpush3.xpose.msk.msra.mxu1 %vm980_vm1, %v3558_v20  ;;  %v8217_v20 = vld [vmem:[%s9929_s2 + $0x1b8] sm:$0xff]  }
0x145a   : > { %7724 = vmatprep.subr.msk.mxu1 %vm980_vm1, %v3555_v58 }
0x145d   : > { %7725 = vmatpush3.xpose.msk.msra.mxu1 %vm980_vm1, %v3555_v58  ;;  %v8220_v58 = vld [vmem:[%s9929_s2 + $0x1a0] sm:$0xff]  }
0x1460   : > { %7727 = vmatmul.mubr.msk.f32.vlgmr.msra.gmra.mxu1 %vm980_vm1, %v3444_v62  ;;  %v8221_v62 = vld [vmem:[%s9929_s2 + $0x198] sm:$0xff]  }
0x1471   : > { %v3668_v26 = vpop.f32.mrf.mxu0 }
0x1472   : > { %v3669_v32 = vadd.f32 %v6600_v28, %v3668_v26  ;;  %v8222_v26 = vld [vmem:[%s9929_s2 + $0x190] sm:$0xff]  }
0x1473   : > { %v7720_v27 = vpop.f32.mrf.mxu0 }
0x1474   : > { %v8223_v27 = vld [vmem:[%s9929_s2 + $0x188] sm:$0xff]  }
0x1475   : > { %v3671_v29 = vpop.f32.mrf.mxu0 }
0x1476   : > { %v3672_v30 = vadd.f32 %v6600_v28, %v3671_v29  ;;  %v8224_v28 = vld [vmem:[%s9929_s2 + $0x180] sm:$0xff]  }
0x1477   : > { %v7721_v31 = vpop.f32.mrf.mxu0 }
0x1478   : > { %7729 = vmatprep.subr.msk.mxu1 %vm1098_vm4, %v3672_v30 }
0x1479   : > { %7730 = vmatpush3.msk.msra.mxu1 %vm1098_vm4, %v3672_v30 }
0x147a   : > { %7731 = vmatprep.subr.mxu1 %v3669_v32 }
0x147b   : > { %7732 = vmatpush3.msra.mxu1 %v3669_v32 }
0x147c   : > { %7736 = vmatprep.subr.bf16.mxu1 %v8380_v1 }
0x1491   : > { %v4151_v33 = vpop.f32.mrf.mxu0 }
0x1492   : > { %v4152_v39 = vadd.f32 %v6664_v35, %v4151_v33  ;;  %v6638_v33 = vld [vmem:[%s9902_s5 + $0x5] ss:$0 sm:$0xff] }
0x1493   : > { %v7780_v34 = vpop.f32.mrf.mxu0 }
0x1495   : > { %v4154_v36 = vpop.f32.mrf.mxu0 }
0x1496   : > { %v4155_v37 = vadd.f32 %v6664_v35, %v4154_v36 }
0x1497   : > { %v7781_v38 = vpop.f32.mrf.mxu0 }
0x1498   : > { %7802 = vmatprep.subr.msk.mxu0 %vm980_vm1, %v4155_v37 }
0x1499   : > { %7803 = vmatpush3.xpose.msk.msra.mxu0 %vm980_vm1, %v4155_v37 }
0x149a   : > { %7804 = vmatprep.subr.msk.mxu0 %vm980_vm1, %v4152_v39 }
0x149d   : > { %7805 = vmatpush3.xpose.msk.msra.mxu0 %vm980_vm1, %v4152_v39 }
0x1520   : > { %v7728_v40 = vpop.f32.mrf.mxu1 }
0x1521   : > { %v3765_v41 = vsel %vm1072_vm3, %v7728_v40, -inf }
0x1522   : > { %3766 = vmax.xlane.f32.xlu1 %v3765_v41  ;;  %v3753_v23 = vpop.f32.mrf.mxu1 }
0x1523   : > { %v3762_v42 = vsel %vm1068_vm2, %v3753_v23, -inf }
0x1524   : > { %3763 = vmax.xlane.f32.xlu0 %v3762_v42 }
0x15ab   : > { %v3767_v43 = vpop.xlane.xlu1 %3766 }
0x15ac   : > { %v3769_v44 = vsub.f32 %v7728_v40, %v3767_v43 }
0x15ad   : > { %v3764_v45 = vpop.xlane.xlu0 %3763 }
0x15ae   : > { %v3772_v46 = vmul.f32 1.442695, %v3769_v44  ;;  %v3768_v47 = vsub.f32 %v3753_v23, %v3764_v45  ;;  %v6690_v23 = vld [vmem:[%s9904_s7 + $0x5] ss:$0 sm:$0xff] }
0x15b0   : > { %8332 = vpow2.f32 %v3772_v46  ;;  %v3770_v49 = vmul.f32 1.442695, %v3768_v47 }
0x15b2   : > { %8334 = vpow2.f32 %v3770_v49  ;;  %v6753_v49 = vld [vmem:[%s9903_s6 + $0x6] ss:$0 sm:$0xff] }
0x15bd   : > { %v8333_v51 = vpop.eup %8332 }
0x15be   : > { %v3777_v52 = vsel %vm1072_vm3, %v8333_v51, 0.0 }
0x15bf   : > { %v8335_v53 = vpop.eup %8334  ;;  %3778 = vadd.xlane.f32.xlu1 %v3777_v52 }
0x15c0   : > { %v3774_v54 = vsel %vm1068_vm2, %v8335_v53, 0.0 }
0x15c1   : > { %3775 = vadd.xlane.f32.xlu0 %v3774_v54 }
0x1648   : > { %v3779_v55 = vpop.xlane.xlu1 %3778 }
0x1649   : > { %8336 = vrcp.f32 %v3779_v55 }
0x164a   : > { %v3776_v59 = vpop.xlane.xlu0 %3775 }
0x164b   : > { %8338 = vrcp.f32 %v3776_v59 }
0x1656   : > { %v8337_v61 = vpop.eup %8336 }
0x1657   : > { %v3783_v2 = vmul.f32 %v8337_v61, %v8333_v51 }
0x1658   : > { %v8339_v63 = vpop.eup %8338 }
0x1659   : > { %v3781_v0 = vmul.f32 %v8339_v63, %v8335_v53 }
0x165b   : > { %7733 = vmatprep.mubr.msk.f32.mxu1 %vm1068_vm2, %v3781_v0 }
0x165c   : > { %7734 = vmatmul.mubr.msk.f32.vlgmr.msra.gmra.mxu1 %vm1068_vm2, %v3783_v2 }
0x165d   : > { %7738 = vmatprep.mubr.msk.bf16.mxu1 %vm8381_vm0, %v8380_v1  ;;  %7737 = vmatpush3.bf16.msra.mxu1 %v8200_v3 }
0x165e   : > { %7742 = vmatprep.subr.bf16.mxu1 %v8380_v1 }
0x171c   : > { %v7735_v4 = vpop.f32.mrf.mxu1 }
0x171e   : > { %v3859_v5 = vpop.f32.mrf.mxu1 }
0x171f   : > { %v3868_v48 = vpack.c.bf16 %v7735_v4, %v3859_v5 }
0x1721   : > { %7739 = vmatmul.mubr.msk.bf16.vlgmr.msra.gmra.mxu1 %vm980_vm1, %v3868_v48 }
0x1722   : > { %7743 = vmatpush3.bf16.msra.mxu1 %v8201_v6  ;;  %7758 = vmatprep.mubr.msk.bf16.mxu1 %vm8381_vm0, %v8380_v1 }
0x1723   : > { %7744 = vmatprep.subr.bf16.mxu1 %v8380_v1 }
0x1726   : > { %7745 = vmatpush3.bf16.msra.mxu1 %v8202_v50 }
0x1727   : > { %7746 = vmatprep.subr.bf16.mxu1 %v8380_v1 }
0x172a   : > { %7747 = vmatpush3.bf16.msra.mxu1 %v8203_v7 }
0x172b   : > { %7748 = vmatprep.subr.bf16.mxu1 %v8380_v1 }
0x172e   : > { %7749 = vmatpush3.bf16.msra.mxu1 %v8204_v8 }
0x172f   : > { %7750 = vmatprep.subr.bf16.mxu1 %v8380_v1 }
0x1732   : > { %7751 = vmatpush3.bf16.msra.mxu1 %v8205_v9 }
0x1733   : > { %7752 = vmatprep.subr.bf16.mxu1 %v8380_v1 }
0x1736   : > { %7753 = vmatpush3.bf16.msra.mxu1 %v8206_v10 }
0x1737   : > { %7754 = vmatprep.subr.bf16.mxu1 %v8380_v1 }
0x173a   : > { %7755 = vmatpush3.bf16.msra.mxu1 %v8207_v12 }
0x173b   : > { %7756 = vmatprep.subr.bf16.mxu1 %v8380_v1 }
0x173e   : > { %7757 = vmatpush3.bf16.msra.mxu1 %v8208_v13 }
0x173f   : > { %7782 = vmatprep.subr.bf16.mxu1 %v8380_v1 }
0x1741   : > { %7759 = vmatmul.mubr.bf16.vlgmr.msra.gmra.mxu1 %v9265_v60 }
0x1742   : > { %7783 = vmatpush3.bf16.msra.mxu1 %v8209_v15  ;;  %7798 = vmatprep.mubr.msk.bf16.mxu1 %vm8381_vm0, %v8380_v1 }
0x1743   : > { %7784 = vmatprep.subr.bf16.mxu1 %v8380_v1 }
0x1746   : > { %7785 = vmatpush3.bf16.msra.mxu1 %v8210_v16 }
0x1747   : > { %7786 = vmatprep.subr.bf16.mxu1 %v8380_v1 }
0x174a   : > { %7787 = vmatpush3.bf16.msra.mxu1 %v8211_v21  ;;  %v8225_v21 = vld [vmem:[%s9905_s8 + $0x28] sm:$0xff]  }
0x174b   : > { %7788 = vmatprep.subr.bf16.mxu1 %v8380_v1 }
0x174e   : > { %7789 = vmatpush3.bf16.msra.mxu1 %v8212_v17 }
0x174f   : > { %7790 = vmatprep.subr.bf16.mxu1 %v8380_v1 }
0x1752   : > { %7791 = vmatpush3.bf16.msra.mxu1 %v8213_v18 }
0x1753   : > { %7792 = vmatprep.subr.bf16.mxu1 %v8380_v1 }
0x1756   : > { %7793 = vmatpush3.bf16.msra.mxu1 %v8214_v14  ;;  %v8226_v14 = vld [vmem:[%s9930_s26 + $0x1b8] sm:$0xff]  }
0x1757   : > { %7794 = vmatprep.subr.bf16.mxu1 %v8380_v1 }
0x175a   : > { %7795 = vmatpush3.bf16.msra.mxu1 %v8215_v19 }
0x175b   : > { %7796 = vmatprep.subr.bf16.mxu1 %v8380_v1 }
0x175e   : > { %7797 = vmatpush3.bf16.msra.mxu1 %v8216_v22  ;;  %v8227_v22 = vld [vmem:[%s9930_s26 + $0x1b0] sm:$0xff]  }
0x175f   : > { %7842 = vmatprep.subr.bf16.mxu1 %v8380_v1 }
0x1761   : > { %7799 = vmatmul.mubr.bf16.vlgmr.msra.gmra.mxu1 %v9265_v60 }
0x1762   : > { %7843 = vmatpush3.bf16.msra.mxu1 %v8217_v20  ;;  %7858 = vmatprep.mubr.msk.bf16.mxu1 %vm8381_vm0, %v8380_v1  ;;  %v8228_v20 = vld [vmem:[%s9930_s26 + $0x1a8] sm:$0xff]  }
0x1763   : > { %7844 = vmatprep.subr.bf16.mxu1 %v8380_v1 }
0x1766   : > { %7845 = vmatpush3.bf16.msra.mxu1 %v8218_v24  ;;  %v8229_v24 = vld [vmem:[%s9930_s26 + $0x1a0] sm:$0xff]  }
0x1767   : > { %7846 = vmatprep.subr.bf16.mxu1 %v8380_v1 }
0x176a   : > { %7847 = vmatpush3.bf16.msra.mxu1 %v8219_v25  ;;  %v8230_v25 = vld [vmem:[%s9930_s26 + $0x198] sm:$0xff]  }
0x176b   : > { %7848 = vmatprep.subr.bf16.mxu1 %v8380_v1 }
0x176e   : > { %7849 = vmatpush3.bf16.msra.mxu1 %v8220_v58  ;;  %v8231_v58 = vld [vmem:[%s9930_s26 + $0x190] sm:$0xff]  }
0x176f   : > { %7850 = vmatprep.subr.bf16.mxu1 %v8380_v1 }
0x1772   : > { %7851 = vmatpush3.bf16.msra.mxu1 %v8221_v62  ;;  %v8232_v62 = vld [vmem:[%s9930_s26 + $0x188] sm:$0xff]  }
0x1773   : > { %7852 = vmatprep.subr.bf16.mxu1 %v8380_v1 }
0x1776   : > { %7853 = vmatpush3.bf16.msra.mxu1 %v8222_v26  ;;  %v8233_v26 = vld [vmem:[%s9930_s26 + $0x180] sm:$0xff]  }
0x1777   : > { %7854 = vmatprep.subr.bf16.mxu1 %v8380_v1 }
0x177a   : > { %7855 = vmatpush3.bf16.msra.mxu1 %v8223_v27  ;;  %v8234_v27 = vld [vmem:[%s9933_s28 + $0x1b8] sm:$0xff]  }
0x177b   : > { %7856 = vmatprep.subr.bf16.mxu1 %v8380_v1 }
0x177e   : > { %7857 = vmatpush3.bf16.msra.mxu1 %v8224_v28  ;;  %v8235_v28 = vld [vmem:[%s9933_s28 + $0x1b0] sm:$0xff]  }
0x1781   : > { %7859 = vmatmul.mubr.bf16.vlgmr.msra.gmra.mxu1 %v9265_v60 }
0x17e1   : > { %v9477_v29 = vpop.f32.mrf.mxu1 }
0x17e3   : > { %v7740_v30 = vpop.f32.mrf.mxu1 }
0x17e4   : > { %v8236_v30 = vld [vmem:[%s9933_s28 + $0x1a8] sm:$0xff]  }
0x17e5   : > { %v9479_v31 = vpop.f32.mrf.mxu1 }
0x17e7   : > { %v7741_v32 = vpop.f32.mrf.mxu1 }
0x17e8   : > { %v8237_v32 = vld [vmem:[%s9933_s28 + $0x1a0] sm:$0xff]  }
0x1801   : > { %v4037_v34 = vpop.f32.mrf.mxu1 }
0x1802   : > { %v4038_v35 = vadd.f32 %v6638_v33, %v4037_v34  ;;  %v8239_v34 = vld [vmem:[%s9933_s28 + $0x190] sm:$0xff]  }
0x1803   : > { %v7760_v36 = vpop.f32.mrf.mxu1 }
0x1804   : > { %7806 = vmatprep.mubr.msk.f32.mxu0 %vm980_vm1, %v4038_v35  ;;  %v8240_v35 = vld [vmem:[%s9933_s28 + $0x188] sm:$0xff]   ;;  %v8241_v36 = vld [vmem:[%s9933_s28 + $0x180] sm:$0xff]  }
0x1805   : > { %v4040_v37 = vpop.f32.mrf.mxu1 }
0x1806   : > { %v4041_v38 = vadd.f32 %v6638_v33, %v4040_v37  ;;  %v8238_v33 = vld [vmem:[%s9933_s28 + $0x198] sm:$0xff]  }
0x1807   : > { %v7761_v39 = vpop.f32.mrf.mxu1  ;;  %v8242_v37 = vld [vmem:[%s9929_s2 + $0x1f8] sm:$0xff]  }
0x1808   : > { %7807 = vmatmul.mubr.msk.f32.vlgmr.msra.gmra.mxu0 %vm980_vm1, %v4041_v38  ;;  %v8243_v38 = vld [vmem:[%s9929_s2 + $0x1f0] sm:$0xff]   ;;  %v8244_v39 = vld [vmem:[%s9929_s2 + $0x1e8] sm:$0xff]  }
0x1821   : > { %v4265_v40 = vpop.f32.mrf.mxu1 }
0x1822   : > { %v4266_v45 = vadd.f32 %v6690_v23, %v4265_v40  ;;  %v8245_v40 = vld [vmem:[%s9929_s2 + $0x1e0] sm:$0xff]  }
0x1823   : > { %v7800_v41 = vpop.f32.mrf.mxu1 }
0x1824   : > { %v8246_v41 = vld [vmem:[%s9929_s2 + $0x1d8] sm:$0xff]  }
0x1825   : > { %v4268_v42 = vpop.f32.mrf.mxu1 }
0x1826   : > { %v4269_v43 = vadd.f32 %v6690_v23, %v4268_v42  ;;  %v8247_v23 = vld [vmem:[%s9929_s2 + $0x1d0] sm:$0xff]   ;;  %v8248_v42 = vld [vmem:[%s9929_s2 + $0x1c8] sm:$0xff]  }
0x1827   : > { %v7801_v44 = vpop.f32.mrf.mxu1 }
0x1828   : > { %7809 = vmatprep.subr.msk.mxu0 %vm1098_vm4, %v4269_v43  ;;  %v6620_v44 = vld [vmem:[%s9906_s9 + $0x1] ss:$0 sm:$0xff] }
0x1829   : > { %7810 = vmatpush3.msk.msra.mxu0 %vm1098_vm4, %v4269_v43  ;;  %v8249_v43 = vld [vmem:[%s9929_s2 + $0x1c0] sm:$0xff]  }
0x182a   : > { %7811 = vmatprep.subr.mxu0 %v4266_v45 }
0x182b   : > { %7812 = vmatpush3.msra.mxu0 %v4266_v45  ;;  %v3928_v45 = vadd.f32 %v6620_v44, %v9477_v29 }
0x182c   : > { %7816 = vmatprep.subr.bf16.mxu0 %v8380_v1 }
0x1841   : > { %v4741_v46 = vpop.f32.mrf.mxu1 }
0x1842   : > { %v4742_v54 = vadd.f32 %v6753_v49, %v4741_v46 }
0x1843   : > { %v7860_v47 = vpop.f32.mrf.mxu1 }
0x1845   : > { %v4744_v51 = vpop.f32.mrf.mxu1 }
0x1846   : > { %v4745_v52 = vadd.f32 %v6753_v49, %v4744_v51  ;;  %v3929_v51 = vadd.f32 %v6620_v44, %v9479_v31  ;;  %v8256_v44 = vld [vmem:[%s9930_s26 + $0x1d0] sm:$0xff]  }
0x1847   : > { %v7861_v53 = vpop.f32.mrf.mxu1 }
0x1848   : > { %7882 = vmatprep.subr.msk.mxu1 %vm980_vm1, %v4745_v52 }
0x1849   : > { %7883 = vmatpush3.xpose.msk.msra.mxu1 %vm980_vm1, %v4745_v52 }
0x184a   : > { %7884 = vmatprep.subr.msk.mxu1 %vm980_vm1, %v4742_v54 }
0x184d   : > { %7885 = vmatpush3.xpose.msk.msra.mxu1 %vm980_vm1, %v4742_v54 }
0x18c8   : > { %v7808_v55 = vpop.f32.mrf.mxu0 }
0x18c9   : > { %v4362_v59 = vsel %vm1072_vm3, %v7808_v55, -inf }
0x18ca   : > { %4363 = vmax.xlane.f32.xlu1 %v4362_v59  ;;  %v4350_v61 = vpop.f32.mrf.mxu0 }
0x18cb   : > { %v4359_v63 = vsel %vm1068_vm2, %v4350_v61, -inf }
0x18cc   : > { %4360 = vmax.xlane.f32.xlu0 %v4359_v63 }
0x1953   : > { %v4364_v0 = vpop.xlane.xlu1 %4363 }
0x1954   : > { %v4366_v2 = vsub.f32 %v7808_v55, %v4364_v0  ;;  %v6727_v55 = vld [vmem:[%s9902_s5 + $0x6] ss:$0 sm:$0xff] }
0x1955   : > { %v4361_v3 = vpop.xlane.xlu0 %4360 }
0x1956   : > { %v4369_v4 = vmul.f32 1.442695, %v4366_v2  ;;  %v4365_v5 = vsub.f32 %v4350_v61, %v4361_v3 }
0x1958   : > { %8340 = vpow2.f32 %v4369_v4  ;;  %v4367_v6 = vmul.f32 1.442695, %v4365_v5  ;;  %v6779_v4 = vld [vmem:[%s9904_s7 + $0x6] ss:$0 sm:$0xff] }
0x195a   : > { %8342 = vpow2.f32 %v4367_v6 }
0x1965   : > { %v8341_v48 = vpop.eup %8340 }
0x1966   : > { %v4374_v50 = vsel %vm1072_vm3, %v8341_v48, 0.0 }
0x1967   : > { %v8343_v7 = vpop.eup %8342  ;;  %4375 = vadd.xlane.f32.xlu1 %v4374_v50 }
0x1968   : > { %v4371_v8 = vsel %vm1068_vm2, %v8343_v7, 0.0 }
0x1969   : > { %4372 = vadd.xlane.f32.xlu0 %v4371_v8 }
0x19f0   : > { %v4376_v9 = vpop.xlane.xlu1 %4375 }
0x19f1   : > { %8344 = vrcp.f32 %v4376_v9  ;;  %v6842_v9 = vld [vmem:[%s9903_s6 + $0x7] ss:$0 sm:$0xff] }
0x19f2   : > { %v4373_v10 = vpop.xlane.xlu0 %4372 }
0x19f3   : > { %8346 = vrcp.f32 %v4373_v10 }
0x19fe   : > { %v8345_v12 = vpop.eup %8344 }
0x19ff   : > { %v4380_v16 = vmul.f32 %v8345_v12, %v8341_v48 }
0x1a00   : > { %v8347_v13 = vpop.eup %8346 }
0x1a01   : > { %v4378_v15 = vmul.f32 %v8347_v13, %v8343_v7 }
0x1a03   : > { %7813 = vmatprep.mubr.msk.f32.mxu0 %vm1068_vm2, %v4378_v15 }
0x1a04   : > { %7814 = vmatmul.mubr.msk.f32.vlgmr.msra.gmra.mxu0 %vm1068_vm2, %v4380_v16 }
0x1a05   : > { %7818 = vmatprep.mubr.msk.bf16.mxu0 %vm8381_vm0, %v8380_v1  ;;  %7817 = vmatpush3.bf16.msra.mxu0 %v8225_v21 }
0x1a06   : > { %7822 = vmatprep.subr.bf16.mxu0 %v8380_v1 }
0x1ac4   : > { %v7815_v17 = vpop.f32.mrf.mxu0 }
0x1ac6   : > { %v4456_v18 = vpop.f32.mrf.mxu0 }
0x1ac7   : > { %v4465_v19 = vpack.c.bf16 %v7815_v17, %v4456_v18 }
0x1ac9   : > { %7819 = vmatmul.mubr.msk.bf16.vlgmr.msra.gmra.mxu0 %vm980_vm1, %v4465_v19 }
0x1aca   : > { %7823 = vmatpush3.bf16.msra.mxu0 %v8226_v14  ;;  %7838 = vmatprep.mubr.msk.bf16.mxu0 %vm8381_vm0, %v8380_v1 }
0x1acb   : > { %7824 = vmatprep.subr.bf16.mxu0 %v8380_v1 }
0x1ace   : > { %7825 = vmatpush3.bf16.msra.mxu0 %v8227_v22 }
0x1acf   : > { %7826 = vmatprep.subr.bf16.mxu0 %v8380_v1 }
0x1ad2   : > { %7827 = vmatpush3.bf16.msra.mxu0 %v8228_v20 }
0x1ad3   : > { %7828 = vmatprep.subr.bf16.mxu0 %v8380_v1 }
0x1ad6   : > { %7829 = vmatpush3.bf16.msra.mxu0 %v8229_v24 }
0x1ad7   : > { %7830 = vmatprep.subr.bf16.mxu0 %v8380_v1 }
0x1ada   : > { %7831 = vmatpush3.bf16.msra.mxu0 %v8230_v25 }
0x1adb   : > { %7832 = vmatprep.subr.bf16.mxu0 %v8380_v1 }
0x1ade   : > { %7833 = vmatpush3.bf16.msra.mxu0 %v8231_v58 }
0x1adf   : > { %7834 = vmatprep.subr.bf16.mxu0 %v8380_v1 }
0x1ae2   : > { %7835 = vmatpush3.bf16.msra.mxu0 %v8232_v62 }
0x1ae3   : > { %7836 = vmatprep.subr.bf16.mxu0 %v8380_v1 }
0x1ae6   : > { %7837 = vmatpush3.bf16.msra.mxu0 %v8233_v26 }
0x1ae7   : > { %7862 = vmatprep.subr.bf16.mxu0 %v8380_v1 }
0x1ae9   : > { %7839 = vmatmul.mubr.bf16.vlgmr.msra.gmra.mxu0 %v9265_v60 }
0x1aea   : > { %7863 = vmatpush3.bf16.msra.mxu0 %v8234_v27  ;;  %7878 = vmatprep.mubr.msk.bf16.mxu0 %vm8381_vm0, %v8380_v1 }
0x1aeb   : > { %7864 = vmatprep.subr.bf16.mxu0 %v8380_v1 }
0x1aee   : > { %7865 = vmatpush3.bf16.msra.mxu0 %v8235_v28 }
0x1aef   : > { %7866 = vmatprep.subr.bf16.mxu0 %v8380_v1 }
0x1af2   : > { %7867 = vmatpush3.bf16.msra.mxu0 %v8236_v30 }
0x1af3   : > { %7868 = vmatprep.subr.bf16.mxu0 %v8380_v1 }
0x1af6   : > { %7869 = vmatpush3.bf16.msra.mxu0 %v8237_v32 }
0x1af7   : > { %7870 = vmatprep.subr.bf16.mxu0 %v8380_v1 }
0x1afa   : > { %7871 = vmatpush3.bf16.msra.mxu0 %v8238_v33 }
0x1afb   : > { %7872 = vmatprep.subr.bf16.mxu0 %v8380_v1 }
0x1afe   : > { %7873 = vmatpush3.bf16.msra.mxu0 %v8239_v34 }
0x1aff   : > { %7874 = vmatprep.subr.bf16.mxu0 %v8380_v1 }
0x1b02   : > { %7875 = vmatpush3.bf16.msra.mxu0 %v8240_v35 }
0x1b03   : > { %7876 = vmatprep.subr.bf16.mxu0 %v8380_v1 }
0x1b06   : > { %7877 = vmatpush3.bf16.msra.mxu0 %v8241_v36  ;;  %v8250_v36 = vld [vmem:[%s9905_s8 + $0x30] sm:$0xff]  }
0x1b07   : > { %7922 = vmatprep.subr.bf16.mxu0 %v8380_v1 }
0x1b09   : > { %7879 = vmatmul.mubr.bf16.vlgmr.msra.gmra.mxu0 %v9265_v60 }
0x1b0a   : > { %7923 = vmatpush3.bf16.msra.mxu0 %v8242_v37  ;;  %7938 = vmatprep.mubr.msk.bf16.mxu0 %vm8381_vm0, %v8380_v1 }
0x1b0b   : > { %7924 = vmatprep.subr.bf16.mxu0 %v8380_v1 }
0x1b0e   : > { %7925 = vmatpush3.bf16.msra.mxu0 %v8243_v38 }
0x1b0f   : > { %7926 = vmatprep.subr.bf16.mxu0 %v8380_v1 }
0x1b12   : > { %7927 = vmatpush3.bf16.msra.mxu0 %v8244_v39  ;;  %v8251_v39 = vld [vmem:[%s9930_s26 + $0x1f8] sm:$0xff]  }
0x1b13   : > { %7928 = vmatprep.subr.bf16.mxu0 %v8380_v1 }
0x1b16   : > { %7929 = vmatpush3.bf16.msra.mxu0 %v8245_v40 }
0x1b17   : > { %7930 = vmatprep.subr.bf16.mxu0 %v8380_v1 }
0x1b1a   : > { %7931 = vmatpush3.bf16.msra.mxu0 %v8246_v41  ;;  %v8252_v41 = vld [vmem:[%s9930_s26 + $0x1f0] sm:$0xff]  }
0x1b1b   : > { %7932 = vmatprep.subr.bf16.mxu0 %v8380_v1 }
0x1b1e   : > { %7933 = vmatpush3.bf16.msra.mxu0 %v8247_v23  ;;  %v8253_v23 = vld [vmem:[%s9930_s26 + $0x1e8] sm:$0xff]  }
0x1b1f   : > { %7934 = vmatprep.subr.bf16.mxu0 %v8380_v1 }
0x1b22   : > { %7935 = vmatpush3.bf16.msra.mxu0 %v8248_v42  ;;  %v8254_v42 = vld [vmem:[%s9930_s26 + $0x1e0] sm:$0xff]  }
0x1b23   : > { %7936 = vmatprep.subr.bf16.mxu0 %v8380_v1 }
0x1b26   : > { %7937 = vmatpush3.bf16.msra.mxu0 %v8249_v43  ;;  %v8255_v43 = vld [vmem:[%s9930_s26 + $0x1d8] sm:$0xff]  }
0x1b29   : > { %7939 = vmatmul.mubr.bf16.vlgmr.msra.gmra.mxu0 %v9265_v60 }
0x1b89   : > { %v4511_v46 = vpop.f32.mrf.mxu0 }
0x1b8a   : > { %v9620_v47 = vadd.f32 %v4511_v46, %v3928_v45  ;;  %v8257_v45 = vld [vmem:[%s9930_s26 + $0x1c8] sm:$0xff]   ;;  %v8258_v46 = vld [vmem:[%s9930_s26 + $0x1c0] sm:$0xff]  }
0x1b8b   : > { %v7820_v49 = vpop.f32.mrf.mxu0 }
0x1b8c   : > { %v8259_v49 = vld [vmem:[%s9933_s28 + $0x1f8] sm:$0xff]  }
0x1b8d   : > { %v4514_v52 = vpop.f32.mrf.mxu0 }
0x1b8e   : > { %v9623_v53 = vadd.f32 %v4514_v52, %v3929_v51  ;;  %v8260_v51 = vld [vmem:[%s9933_s28 + $0x1f0] sm:$0xff]   ;;  %v8261_v52 = vld [vmem:[%s9933_s28 + $0x1e8] sm:$0xff]  }
0x1b8f   : > { %v7821_v54 = vpop.f32.mrf.mxu0 }
0x1b90   : > { %v8262_v54 = vld [vmem:[%s9933_s28 + $0x1e0] sm:$0xff]  }
0x1ba9   : > { %v4627_v59 = vpop.f32.mrf.mxu0 }
0x1baa   : > { %v4628_v61 = vadd.f32 %v6727_v55, %v4627_v59  ;;  %v8264_v59 = vld [vmem:[%s9933_s28 + $0x1d0] sm:$0xff]  }
0x1bab   : > { %v7840_v63 = vpop.f32.mrf.mxu0 }
0x1bac   : > { %7886 = vmatprep.mubr.msk.f32.mxu1 %vm980_vm1, %v4628_v61  ;;  %v8265_v61 = vld [vmem:[%s9933_s28 + $0x1c8] sm:$0xff]   ;;  %v8266_v63 = vld [vmem:[%s9933_s28 + $0x1c0] sm:$0xff]  }
0x1bad   : > { %v4630_v29 = vpop.f32.mrf.mxu0 }
0x1bae   : > { %v4631_v0 = vadd.f32 %v6727_v55, %v4630_v29  ;;  %v8263_v55 = vld [vmem:[%s9933_s28 + $0x1d8] sm:$0xff]  }
0x1baf   : > { %v7841_v2 = vpop.f32.mrf.mxu0 }
0x1bb0   : > { %7887 = vmatmul.mubr.msk.f32.vlgmr.msra.gmra.mxu1 %vm980_vm1, %v4631_v0 }
0x1bc9   : > { %v4855_v3 = vpop.f32.mrf.mxu0 }
0x1bca   : > { %v4856_v50 = vadd.f32 %v6779_v4, %v4855_v3 }
0x1bcb   : > { %v7880_v31 = vpop.f32.mrf.mxu0 }
0x1bcd   : > { %v4858_v5 = vpop.f32.mrf.mxu0 }
0x1bce   : > { %v4859_v6 = vadd.f32 %v6779_v4, %v4858_v5  ;;  %v6816_v5 = vld [vmem:[%s9902_s5 + $0x7] ss:$0 sm:$0xff] }
0x1bcf   : > { %v7881_v48 = vpop.f32.mrf.mxu0 }
0x1bd0   : > { %7889 = vmatprep.subr.msk.mxu1 %vm1098_vm4, %v4859_v6 }
0x1bd1   : > { %7890 = vmatpush3.msk.msra.mxu1 %vm1098_vm4, %v4859_v6 }
0x1bd2   : > { %7891 = vmatprep.subr.mxu1 %v4856_v50 }
0x1bd3   : > { %7892 = vmatpush3.msra.mxu1 %v4856_v50 }
0x1bd4   : > { %7896 = vmatprep.subr.bf16.mxu1 %v8380_v1 }
0x1be9   : > { %v5331_v7 = vpop.f32.mrf.mxu0 }
0x1bea   : > { %v5332_v15 = vadd.f32 %v6842_v9, %v5331_v7 }
0x1beb   : > { %v7940_v8 = vpop.f32.mrf.mxu0 }
0x1bed   : > { %v5334_v10 = vpop.f32.mrf.mxu0 }
0x1bee   : > { %v5335_v12 = vadd.f32 %v6842_v9, %v5334_v10 }
0x1bef   : > { %v7941_v13 = vpop.f32.mrf.mxu0 }
0x1bf0   : > { %7962 = vmatprep.subr.msk.mxu0 %vm980_vm1, %v5335_v12 }
0x1bf1   : > { %7963 = vmatpush3.xpose.msk.msra.mxu0 %vm980_vm1, %v5335_v12 }
0x1bf2   : > { %7964 = vmatprep.subr.msk.mxu0 %vm980_vm1, %v5332_v15 }
0x1bf5   : > { %7965 = vmatpush3.xpose.msk.msra.mxu0 %vm980_vm1, %v5332_v15 }
0x1c70   : > { %v7888_v16 = vpop.f32.mrf.mxu1 }
0x1c71   : > { %v4952_v21 = vsel %vm1072_vm3, %v7888_v16, -inf }
0x1c72   : > { %4953 = vmax.xlane.f32.xlu1 %v4952_v21  ;;  %v4940_v17 = vpop.f32.mrf.mxu1 }
0x1c73   : > { %v4949_v18 = vsel %vm1068_vm2, %v4940_v17, -inf }
0x1c74   : > { %4950 = vmax.xlane.f32.xlu0 %v4949_v18 }
0x1cfb   : > { %v4954_v14 = vpop.xlane.xlu1 %4953 }
0x1cfc   : > { %v4956_v19 = vsub.f32 %v7888_v16, %v4954_v14 }
0x1cfd   : > { %v4951_v22 = vpop.xlane.xlu0 %4950 }
0x1cfe   : > { %v4959_v20 = vmul.f32 1.442695, %v4956_v19  ;;  %v4955_v24 = vsub.f32 %v4940_v17, %v4951_v22 }
0x1d00   : > { %8348 = vpow2.f32 %v4959_v20  ;;  %v4957_v25 = vmul.f32 1.442695, %v4955_v24 }
0x1d02   : > { %8350 = vpow2.f32 %v4957_v25 }
0x1d0d   : > { %v8349_v58 = vpop.eup %8348 }
0x1d0e   : > { %v4964_v62 = vsel %vm1072_vm3, %v8349_v58, 0.0 }
0x1d0f   : > { %v8351_v26 = vpop.eup %8350  ;;  %4965 = vadd.xlane.f32.xlu1 %v4964_v62 }
0x1d10   : > { %v4961_v27 = vsel %vm1068_vm2, %v8351_v26, 0.0 }
0x1d11   : > { %4962 = vadd.xlane.f32.xlu0 %v4961_v27 }
0x1d98   : > { %v4966_v28 = vpop.xlane.xlu1 %4965 }
0x1d99   : > { %8352 = vrcp.f32 %v4966_v28 }
0x1d9a   : > { %v4963_v30 = vpop.xlane.xlu0 %4962 }
0x1d9b   : > { %8354 = vrcp.f32 %v4963_v30 }
0x1da6   : > { %v8353_v32 = vpop.eup %8352 }
0x1da7   : > { %v4970_v35 = vmul.f32 %v8353_v32, %v8349_v58 }
0x1da8   : > { %v8355_v33 = vpop.eup %8354 }
0x1da9   : > { %v4968_v34 = vmul.f32 %v8355_v33, %v8351_v26 }
0x1dab   : > { %7893 = vmatprep.mubr.msk.f32.mxu1 %vm1068_vm2, %v4968_v34 }
0x1dac   : > { %7894 = vmatmul.mubr.msk.f32.vlgmr.msra.gmra.mxu1 %vm1068_vm2, %v4970_v35 }
0x1dad   : > { %7898 = vmatprep.mubr.msk.bf16.mxu1 %vm8381_vm0, %v8380_v1  ;;  %7897 = vmatpush3.bf16.msra.mxu1 %v8250_v36  ;;  %v8267_v36 = vld [vmem:[%s9905_s8 + $0x38] sm:$0xff]  }
0x1dae   : > { %7902 = vmatprep.subr.bf16.mxu1 %v8380_v1 }
0x1e6c   : > { %v7895_v37 = vpop.f32.mrf.mxu1 }
0x1e6e   : > { %v5046_v38 = vpop.f32.mrf.mxu1 }
0x1e6f   : > { %v5055_v40 = vpack.c.bf16 %v7895_v37, %v5046_v38 }
0x1e71   : > { %7899 = vmatmul.mubr.msk.bf16.vlgmr.msra.gmra.mxu1 %vm980_vm1, %v5055_v40 }
0x1e72   : > { %7903 = vmatpush3.bf16.msra.mxu1 %v8251_v39  ;;  %7918 = vmatprep.mubr.msk.bf16.mxu1 %vm8381_vm0, %v8380_v1 }
0x1e73   : > { %7904 = vmatprep.subr.bf16.mxu1 %v8380_v1 }
0x1e76   : > { %7905 = vmatpush3.bf16.msra.mxu1 %v8252_v41 }
0x1e77   : > { %7906 = vmatprep.subr.bf16.mxu1 %v8380_v1 }
0x1e7a   : > { %7907 = vmatpush3.bf16.msra.mxu1 %v8253_v23 }
0x1e7b   : > { %7908 = vmatprep.subr.bf16.mxu1 %v8380_v1 }
0x1e7e   : > { %7909 = vmatpush3.bf16.msra.mxu1 %v8254_v42 }
0x1e7f   : > { %7910 = vmatprep.subr.bf16.mxu1 %v8380_v1 }
0x1e82   : > { %7911 = vmatpush3.bf16.msra.mxu1 %v8255_v43 }
0x1e83   : > { %7912 = vmatprep.subr.bf16.mxu1 %v8380_v1 }
0x1e86   : > { %7913 = vmatpush3.bf16.msra.mxu1 %v8256_v44 }
0x1e87   : > { %7914 = vmatprep.subr.bf16.mxu1 %v8380_v1 }
0x1e8a   : > { %7915 = vmatpush3.bf16.msra.mxu1 %v8257_v45 }
0x1e8b   : > { %7916 = vmatprep.subr.bf16.mxu1 %v8380_v1 }
0x1e8e   : > { %7917 = vmatpush3.bf16.msra.mxu1 %v8258_v46 }
0x1e8f   : > { %7942 = vmatprep.subr.bf16.mxu1 %v8380_v1 }
0x1e91   : > { %7919 = vmatmul.mubr.bf16.vlgmr.msra.gmra.mxu1 %v9265_v60 }
0x1e92   : > { %7943 = vmatpush3.bf16.msra.mxu1 %v8259_v49  ;;  %7958 = vmatprep.mubr.msk.bf16.mxu1 %vm8381_vm0, %v8380_v1 }
0x1e93   : > { %7944 = vmatprep.subr.bf16.mxu1 %v8380_v1 }
0x1e96   : > { %7945 = vmatpush3.bf16.msra.mxu1 %v8260_v51 }
0x1e97   : > { %7946 = vmatprep.subr.bf16.mxu1 %v8380_v1 }
0x1e9a   : > { %7947 = vmatpush3.bf16.msra.mxu1 %v8261_v52 }
0x1e9b   : > { %7948 = vmatprep.subr.bf16.mxu1 %v8380_v1 }
0x1e9e   : > { %7949 = vmatpush3.bf16.msra.mxu1 %v8262_v54 }
0x1e9f   : > { %7950 = vmatprep.subr.bf16.mxu1 %v8380_v1 }
0x1ea2   : > { %7951 = vmatpush3.bf16.msra.mxu1 %v8263_v55 }
0x1ea3   : > { %7952 = vmatprep.subr.bf16.mxu1 %v8380_v1 }
0x1ea6   : > { %7953 = vmatpush3.bf16.msra.mxu1 %v8264_v59 }
0x1ea7   : > { %7954 = vmatprep.subr.bf16.mxu1 %v8380_v1 }
0x1eaa   : > { %7955 = vmatpush3.bf16.msra.mxu1 %v8265_v61 }
0x1eab   : > { %7956 = vmatprep.subr.bf16.mxu1 %v8380_v1 }
0x1eae   : > { %7957 = vmatpush3.bf16.msra.mxu1 %v8266_v63 }
0x1eaf   : > { %8002 = vmatprep.subr.bf16.mxu1 %v8380_v1 }
0x1eb1   : > { %7959 = vmatmul.mubr.bf16.vlgmr.msra.gmra.mxu1 %v9265_v60 }
0x1eb2   : > { %8018 = vmatprep.mubr.msk.bf16.mxu1 %vm8381_vm0, %v8380_v1 }
0x1f31   : > { %v5101_v29 = vpop.f32.mrf.mxu1 }
0x1f32   : > { %v9729_v0 = vadd.f32 %v5101_v29, %v9620_v47 }
0x1f33   : > { %v7900_v2 = vpop.f32.mrf.mxu1 }
0x1f35   : > { %v5104_v3 = vpop.f32.mrf.mxu1 }
0x1f36   : > { %v9732_v31 = vadd.f32 %v5104_v3, %v9623_v53  ;;  %v6868_v53 = vld [vmem:[%s9904_s7 + $0x7] ss:$0 sm:$0xff]  ;;  %v8269_v3 = vld [vmem:[%s9909_s12 + $0x70] sm:$0xff]  }
0x1f37   : > { %v7901_v4 = vpop.f32.mrf.mxu1 }
0x1f38   : > { %v8271_v4 = vld [vmem:[%s9909_s12 + $0x60] sm:$0xff]  }
0x1f51   : > { %v5217_v6 = vpop.f32.mrf.mxu1 }
0x1f52   : > { %v5218_v48 = vadd.f32 %v6816_v5, %v5217_v6  ;;  %v8273_v6 = vld [vmem:[%s9909_s12 + $0x50] sm:$0xff]  }
0x1f53   : > { %v7920_v60 = vpop.f32.mrf.mxu1 }
0x1f54   : > { %7966 = vmatprep.mubr.msk.f32.mxu0 %vm980_vm1, %v5218_v48  ;;  %v8274_v48 = vld [vmem:[%s9909_s12 + $0x48] sm:$0xff]   ;;  %v8275_v60 = vld [vmem:[%s9909_s12 + $0x40] sm:$0xff]  }
0x1f55   : > { %v5220_v50 = vpop.f32.mrf.mxu1 }
0x1f56   : > { %v5221_v7 = vadd.f32 %v6816_v5, %v5220_v50  ;;  %v8272_v5 = vld [vmem:[%s9909_s12 + $0x58] sm:$0xff]  }
0x1f57   : > { %v7921_v8 = vpop.f32.mrf.mxu1  ;;  %v8276_v50 = vld [vmem:[%s9911_s14 + $0x78] sm:$0xff]  }
0x1f58   : > { %7967 = vmatmul.mubr.msk.f32.vlgmr.msra.gmra.mxu0 %vm980_vm1, %v5221_v7  ;;  %8003 = vmatpush3.bf16.msra.mxu1 %v8276_v50  ;;  %v8277_v7 = vld [vmem:[%s9911_s14 + $0x70] sm:$0xff]   ;;  %v8278_v8 = vld [vmem:[%s9911_s14 + $0x68] sm:$0xff]   ;;  %v8291_v50 = vld [vmem:[%s9915_s18] sm:$0xff]  }
0x1f59   : > { %8004 = vmatprep.subr.bf16.mxu1 %v8380_v1 }
0x1f5c   : > { %8005 = vmatpush3.bf16.msra.mxu1 %v8277_v7 }
0x1f5d   : > { %8006 = vmatprep.subr.bf16.mxu1 %v8380_v1 }
0x1f60   : > { %8007 = vmatpush3.bf16.msra.mxu1 %v8278_v8 }
0x1f61   : > { %8008 = vmatprep.subr.bf16.mxu1 %v8380_v1 }
0x1f71   : > { %v5445_v47 = vpop.f32.mrf.mxu1 }
0x1f72   : > { %v5446_v15 = vadd.f32 %v6868_v53, %v5445_v47  ;;  %v8279_v47 = vld [vmem:[%s9911_s14 + $0x60] sm:$0xff]  }
0x1f73   : > { %v7960_v9 = vpop.f32.mrf.mxu1  ;;  %8009 = vmatpush3.bf16.msra.mxu1 %v8279_v47 }
0x1f74   : > { %v8280_v9 = vld [vmem:[%s9911_s14 + $0x58] sm:$0xff]   ;;  %8010 = vmatprep.subr.bf16.mxu1 %v8380_v1 }
0x1f75   : > { %v5448_v10 = vpop.f32.mrf.mxu1 }
0x1f76   : > { %v5449_v12 = vadd.f32 %v6868_v53, %v5448_v10 }
0x1f77   : > { %v7961_v13 = vpop.f32.mrf.mxu1  ;;  %8011 = vmatpush3.bf16.msra.mxu1 %v8280_v9 }
0x1f78   : > { %7969 = vmatprep.subr.msk.mxu0 %vm1098_vm4, %v5449_v12  ;;  %8012 = vmatprep.subr.bf16.mxu1 %v8380_v1 }
0x1f79   : > { %7970 = vmatpush3.msk.msra.mxu0 %vm1098_vm4, %v5449_v12 }
0x1f7a   : > { %7971 = vmatprep.subr.mxu0 %v5446_v15 }
0x1f7b   : > { %7972 = vmatpush3.msra.mxu0 %v5446_v15 }
0x1f7c   : > { %7976 = vmatprep.subr.bf16.mxu0 %v8380_v1 }
0x2018   : > { %v7968_v16 = vpop.f32.mrf.mxu0 }
0x2019   : > { %v5542_v21 = vsel %vm1072_vm3, %v7968_v16, -inf }
0x201a   : > { %5543 = vmax.xlane.f32.xlu1 %v5542_v21  ;;  %v5530_v17 = vpop.f32.mrf.mxu0 }
0x201b   : > { %v5539_v18 = vsel %vm1068_vm2, %v5530_v17, -inf }
0x201c   : > { %5540 = vmax.xlane.f32.xlu0 %v5539_v18  ;;  %v6890_v18 = vld [vmem:[%s9907_s10 + $0x1] ss:$0 sm:$0xff] }
0x20a3   : > { %v5544_v14 = vpop.xlane.xlu1 %5543 }
0x20a4   : > { %v5546_v19 = vsub.f32 %v7968_v16, %v5544_v14 }
0x20a5   : > { %v5541_v22 = vpop.xlane.xlu0 %5540 }
0x20a6   : > { %v5549_v20 = vmul.f32 1.442695, %v5546_v19  ;;  %v5545_v24 = vsub.f32 %v5530_v17, %v5541_v22 }
0x20a8   : > { %8356 = vpow2.f32 %v5549_v20  ;;  %v5547_v25 = vmul.f32 1.442695, %v5545_v24  ;;  %v6891_v20 = vld [vmem:[%s9908_s11 + $0x1] ss:$0 sm:$0xff] }
0x20aa   : > { %8358 = vpow2.f32 %v5547_v25 }
0x20b5   : > { %v8357_v58 = vpop.eup %8356 }
0x20b6   : > { %v5554_v62 = vsel %vm1072_vm3, %v8357_v58, 0.0 }
0x20b7   : > { %v8359_v26 = vpop.eup %8358  ;;  %5555 = vadd.xlane.f32.xlu1 %v5554_v62 }
0x20b8   : > { %v5551_v27 = vsel %vm1068_vm2, %v8359_v26, 0.0 }
0x20b9   : > { %5552 = vadd.xlane.f32.xlu0 %v5551_v27  ;;  %v8282_v27 = vld [vmem:[%s9911_s14 + $0x48] sm:$0xff]  }
0x2140   : > { %v5556_v28 = vpop.xlane.xlu1 %5555 }
0x2141   : > { %8360 = vrcp.f32 %v5556_v28  ;;  %v8283_v28 = vld [vmem:[%s9911_s14 + $0x40] sm:$0xff]  }
0x2142   : > { %v5553_v30 = vpop.xlane.xlu0 %5552 }
0x2143   : > { %8362 = vrcp.f32 %v5553_v30  ;;  %v6909_v30 = vld [vmem:[%s9910_s13 + $0x1] ss:$0 sm:$0xff] }
0x214e   : > { %v8361_v32 = vpop.eup %8360 }
0x214f   : > { %v5560_v35 = vmul.f32 %v8361_v32, %v8357_v58 }
0x2150   : > { %v8363_v33 = vpop.eup %8362 }
0x2151   : > { %v5558_v34 = vmul.f32 %v8363_v33, %v8359_v26  ;;  %v8281_v26 = vld [vmem:[%s9911_s14 + $0x50] sm:$0xff]  }
0x2152   : > { %8013 = vmatpush3.bf16.msra.mxu1 %v8281_v26 }
0x2153   : > { %7973 = vmatprep.mubr.msk.f32.mxu0 %vm1068_vm2, %v5558_v34  ;;  %8014 = vmatprep.subr.bf16.mxu1 %v8380_v1 }
0x2154   : > { %7974 = vmatmul.mubr.msk.f32.vlgmr.msra.gmra.mxu0 %vm1068_vm2, %v5560_v35 }
0x2155   : > { %7978 = vmatprep.mubr.msk.bf16.mxu0 %vm8381_vm0, %v8380_v1  ;;  %7977 = vmatpush3.bf16.msra.mxu0 %v8267_v36 }
0x2156   : > { %7982 = vmatprep.subr.bf16.mxu0 %v8380_v1  ;;  %8015 = vmatpush3.bf16.msra.mxu1 %v8282_v27 }
0x2157   : > { %8016 = vmatprep.subr.bf16.mxu1 %v8380_v1 }
0x215a   : > { %8017 = vmatpush3.bf16.msra.mxu1 %v8283_v28 }
0x2214   : > { %v7975_v37 = vpop.f32.mrf.mxu0 }
0x2216   : > { %v5636_v38 = vpop.f32.mrf.mxu0 }
0x2217   : > { %v5645_v39 = vpack.c.bf16 %v7975_v37, %v5636_v38 }
0x2219   : > { %7979 = vmatmul.mubr.msk.bf16.vlgmr.msra.gmra.mxu0 %vm980_vm1, %v5645_v39 }
0x221a   : > { %7998 = vmatprep.mubr.msk.bf16.mxu0 %vm8381_vm0, %v8380_v1 }
0x22d9   : > { %v5691_v40 = vpop.f32.mrf.mxu0 }
0x22da   : > { %v5698_v41 = vadd.f32 %v5691_v40, %v9729_v0 }
0x22db   : > { %v7980_v23 = vpop.f32.mrf.mxu0 }
0x22dc   : > { %v5700_v42 = vadd.f32 %v5698_v41, %v9256_v56  ;;  %v6943_v23 = vld [vmem:[%s9912_s15 + $0x1] ss:$0 sm:$0xff] }
0x22dd   : > { %v5694_v43 = vpop.f32.mrf.mxu0 }
0x22de   : > { %v5699_v44 = vadd.f32 %v5694_v43, %v9732_v31  ;;  %5706 = vadd.xlane.f32.xlu1 %v5700_v42  ;;  %v8270_v31 = vld [vmem:[%s9909_s12 + $0x68] sm:$0xff]  }
0x22df   : > { %v7981_v45 = vpop.f32.mrf.mxu0 }
0x22e0   : > { %v5701_v46 = vadd.f32 %v5699_v44, %v9258_v57  ;;  %v8268_v57 = vld [vmem:[%s9909_s12 + $0x78] sm:$0xff]  }
0x22e1   : > { %7983 = vmatpush3.bf16.msra.mxu0 %v8268_v57 }
0x22e2   : > { %v5708_v49 = vsel %vm1098_vm4, %v5701_v46, 0.0  ;;  %7984 = vmatprep.subr.bf16.mxu0 %v8380_v1 }
0x22e3   : > { %5709 = vadd.xlane.f32.xlu0 %v5708_v49 }
0x22e5   : > { %7985 = vmatpush3.bf16.msra.mxu0 %v8269_v3 }
0x22e6   : > { %7986 = vmatprep.subr.bf16.mxu0 %v8380_v1 }
0x22e9   : > { %7987 = vmatpush3.bf16.msra.mxu0 %v8270_v31  ;;  %v8284_v31 = vld [vmem:[%s9915_s18 + $0x38] sm:$0xff]  }
0x22ea   : > { %7988 = vmatprep.subr.bf16.mxu0 %v8380_v1 }
0x22ed   : > { %7989 = vmatpush3.bf16.msra.mxu0 %v8271_v4  ;;  %v8285_v4 = vld [vmem:[%s9915_s18 + $0x30] sm:$0xff]  }
0x22ee   : > { %7990 = vmatprep.subr.bf16.mxu0 %v8380_v1 }
0x22f1   : > { %7991 = vmatpush3.bf16.msra.mxu0 %v8272_v5  ;;  %v8287_v5 = vld [vmem:[%s9915_s18 + $0x20] sm:$0xff]  }
0x22f2   : > { %7992 = vmatprep.subr.bf16.mxu0 %v8380_v1 }
0x22f5   : > { %7993 = vmatpush3.bf16.msra.mxu0 %v8273_v6  ;;  %v8288_v6 = vld [vmem:[%s9915_s18 + $0x18] sm:$0xff]  }
0x22f6   : > { %7994 = vmatprep.subr.bf16.mxu0 %v8380_v1 }
0x22f9   : > { %7995 = vmatpush3.bf16.msra.mxu0 %v8274_v48  ;;  %v8289_v48 = vld [vmem:[%s9915_s18 + $0x10] sm:$0xff]  }
0x22fa   : > { %7996 = vmatprep.subr.bf16.mxu0 %v8380_v1 }
0x22fd   : > { %7997 = vmatpush3.bf16.msra.mxu0 %v8275_v60  ;;  %v8290_v60 = vld [vmem:[%s9915_s18 + $0x8] sm:$0xff]  }
0x22fe   : > { %8022 = vmatprep.subr.bf16.mxu0 %v8380_v1 }
0x2367   : > { %v5707_v51 = vpop.xlane.xlu1 %5706 }
0x2368   : > { %v5711_v52 = vmul.f32 0.015625, %v5707_v51 }
0x236a   : > { %v5713_v54 = vsub.f32 %v5700_v42, %v5711_v52 }
0x236c   : > { %v5710_v55 = vpop.xlane.xlu0 %5709  ;;  %v5715_v59 = vmul.f32 %v5713_v54, %v5713_v54 }
0x236d   : > { %v5712_v61 = vmul.f32 0.015625, %v5710_v55 }
0x236e   : > { %v5717_v63 = vmul.f32 %v9088_v11, %v5715_v59 }
0x236f   : > { %v5714_v29 = vsub.f32 %v5701_v46, %v5712_v61 }
0x2370   : > { %5719 = vadd.xlane.f32.xlu0 %v5717_v63 }
0x2371   : > { %v5716_v56 = vmul.f32 %v5714_v29, %v5714_v29 }
0x2373   : > { %v5718_v0 = vmul.f32 %v9088_v11, %v5716_v56 }
0x2375   : > { %v5721_v2 = vsel %vm1098_vm4, %v5718_v0, 0.0 }
0x2376   : > { %5722 = vadd.xlane.f32.xlu1 %v5721_v2 }
0x23f9   : > { %v5720_v53 = vpop.xlane.xlu0 %5719 }
0x23fa   : > { %v5724_v10 = vmul.f32 0.015625, %v5720_v53 }
0x23fc   : > { %v5726_v12 = vadd.f32 1e-05, %v5724_v10 }
0x23fe   : > { %8364 = vrsqrt.f32 %v5726_v12 }
0x23ff   : > { %v5723_v13 = vpop.xlane.xlu1 %5722 }
0x2400   : > { %v5725_v15 = vmul.f32 0.015625, %v5723_v13 }
0x2402   : > { %v5727_v16 = vadd.f32 1e-05, %v5725_v15  ;;  %v6946_v15 = vld [vmem:[%s9913_s16 + $0x1] ss:$0 sm:$0xff] }
0x2404   : > { %8366 = vrsqrt.f32 %v5727_v16 }
0x240b   : > { %v8365_v21 = vpop.eup %8364 }
0x240c   : > { %v5730_v17 = vmul.f32 %v8365_v21, %v5713_v54 }
0x240e   : > { %v5738_v22 = vmul.f32 %v6890_v18, %v5730_v17 }
0x2410   : > { %v5746_v25 = vadd.f32 %v6891_v20, %v5738_v22 }
0x2411   : > { %v8367_v14 = vpop.eup %8366 }
0x2412   : > { %v5731_v19 = vmul.f32 %v8367_v14, %v5714_v29 }
0x2414   : > { %v5739_v24 = vmul.f32 %v6890_v18, %v5731_v19 }
0x2416   : > { %v5747_v58 = vadd.f32 %v6891_v20, %v5739_v24  ;;  %v6948_v20 = vld [vmem:[%s9916_s19] ss:$0 sm:$0xff] }
0x2418   : > { %v5748_v62 = vpack.c.bf16 %v5747_v58, %v5746_v25 }
0x241a   : > { %7999 = vmatmul.mubr.bf16.vlgmr.msra.gmra.mxu0 %v5748_v62 }
0x241b   : > { %8038 = vmatprep.mubr.msk.bf16.mxu0 %vm8381_vm0, %v8380_v1  ;;  %8023 = vmatpush3.bf16.msra.mxu0 %v8284_v31 }
0x241c   : > { %8024 = vmatprep.subr.bf16.mxu0 %v8380_v1 }
0x241f   : > { %8025 = vmatpush3.bf16.msra.mxu0 %v8285_v4 }
0x2420   : > { %8026 = vmatprep.subr.bf16.mxu0 %v8380_v1 }
0x24da   : > { %v5856_v32 = vpop.f32.mrf.mxu0 }
0x24db   : > { %v5857_v34 = vadd.f32 %v6909_v30, %v5856_v32 }
0x24dc   : > { %v8000_v33 = vpop.f32.mrf.mxu0 }
0x24dd   : > { %v5863_v38 = vmax.f32 %v5857_v34, 0.0 }
0x24de   : > { %v5859_v35 = vpop.f32.mrf.mxu0 }
0x24df   : > { %v5860_v36 = vadd.f32 %v6909_v30, %v5859_v35 }
0x24e0   : > { %v8001_v37 = vpop.f32.mrf.mxu0 }
0x24e1   : > { %v5864_v39 = vmax.f32 %v5860_v36, 0.0 }
0x24e3   : > { %v5865_v40 = vpack.c.bf16 %v5864_v39, %v5863_v38 }
0x24e5   : > { %8019 = vmatmul.mubr.bf16.vlgmr.msra.gmra.mxu1 %v5865_v40 }
0x25a5   : > { %v5965_v41 = vpop.f32.mrf.mxu1 }
0x25a6   : > { %v5972_v42 = vadd.f32 %v5965_v41, %v5746_v25 }
0x25a7   : > { %v8020_v43 = vpop.f32.mrf.mxu1 }
0x25a8   : > { %v5982_v44 = vadd.f32 %v6943_v23, %v5972_v42 }
0x25a9   : > { %v5968_v45 = vpop.f32.mrf.mxu1 }
0x25aa   : > { %v5973_v46 = vadd.f32 %v5968_v45, %v5747_v58  ;;  %5988 = vadd.xlane.f32.xlu1 %v5982_v44 }
0x25ab   : > { %v8021_v49 = vpop.f32.mrf.mxu1 }
0x25ac   : > { %v5983_v51 = vadd.f32 %v6943_v23, %v5973_v46 }
0x25ae   : > { %v5990_v52 = vsel %vm1098_vm4, %v5983_v51, 0.0 }
0x25af   : > { %5991 = vadd.xlane.f32.xlu0 %v5990_v52 }
0x2633   : > { %v5989_v54 = vpop.xlane.xlu1 %5988 }
0x2634   : > { %v5993_v55 = vmul.f32 0.015625, %v5989_v54 }
0x2636   : > { %v5995_v59 = vsub.f32 %v5982_v44, %v5993_v55 }
0x2638   : > { %v5992_v61 = vpop.xlane.xlu0 %5991  ;;  %v5997_v63 = vmul.f32 %v5995_v59, %v5995_v59 }
0x2639   : > { %v5994_v29 = vmul.f32 0.015625, %v5992_v61 }
0x263a   : > { %v5999_v56 = vmul.f32 %v9088_v11, %v5997_v63 }
0x263b   : > { %v5996_v0 = vsub.f32 %v5983_v51, %v5994_v29 }
0x263c   : > { %6001 = vadd.xlane.f32.xlu0 %v5999_v56 }
0x263d   : > { %v5998_v2 = vmul.f32 %v5996_v0, %v5996_v0 }
0x263f   : > { %v6000_v57 = vmul.f32 %v9088_v11, %v5998_v2  ;;  %v8286_v11 = vld [vmem:[%s9915_s18 + $0x28] sm:$0xff]  }
0x2640   : > { %8027 = vmatpush3.bf16.msra.mxu0 %v8286_v11 }
0x2641   : > { %v6003_v3 = vsel %vm1098_vm4, %v6000_v57, 0.0  ;;  %8028 = vmatprep.subr.bf16.mxu0 %v8380_v1 }
0x2642   : > { %6004 = vadd.xlane.f32.xlu1 %v6003_v3 }
0x2644   : > { %8029 = vmatpush3.bf16.msra.mxu0 %v8287_v5 }
0x2645   : > { %8030 = vmatprep.subr.bf16.mxu0 %v8380_v1 }
0x2648   : > { %8031 = vmatpush3.bf16.msra.mxu0 %v8288_v6 }
0x2649   : > { %8032 = vmatprep.subr.bf16.mxu0 %v8380_v1 }
0x264c   : > { %8033 = vmatpush3.bf16.msra.mxu0 %v8289_v48 }
0x264d   : > { %8034 = vmatprep.subr.bf16.mxu0 %v8380_v1 }
0x2650   : > { %8035 = vmatpush3.bf16.msra.mxu0 %v8290_v60 }
0x2651   : > { %8036 = vmatprep.subr.bf16.mxu0 %v8380_v1  ;;  %v6947_v1 = vld [vmem:[%s9914_s17 + $0x1] ss:$0 sm:$0xff] }
0x2654   : > { %8037 = vmatpush3.bf16.msra.mxu0 %v8291_v50 }
0x26c5   : > { %v6002_v7 = vpop.xlane.xlu0 %6001 }
0x26c6   : > { %v6006_v8 = vmul.f32 0.015625, %v6002_v7 }
0x26c8   : > { %v6008_v47 = vadd.f32 1e-05, %v6006_v8 }
0x26ca   : > { %8368 = vrsqrt.f32 %v6008_v47 }
0x26cb   : > { %v6005_v9 = vpop.xlane.xlu1 %6004 }
0x26cc   : > { %v6007_v53 = vmul.f32 0.015625, %v6005_v9 }
0x26ce   : > { %v6009_v10 = vadd.f32 1e-05, %v6007_v53 }
0x26d0   : > { %8370 = vrsqrt.f32 %v6009_v10 }
0x26d7   : > { %v8369_v12 = vpop.eup %8368 }
0x26d8   : > { %v6012_v13 = vmul.f32 %v8369_v12, %v5995_v59 }
0x26da   : > { %v6020_v17 = vmul.f32 %v6946_v15, %v6012_v13 }
0x26dc   : > { %v6028_v14 = vadd.f32 %v6947_v1, %v6020_v17 }
0x26dd   : > { %v8371_v16 = vpop.eup %8370 }
0x26de   : > { %v6013_v21 = vmul.f32 %v8371_v16, %v5996_v0 }
0x26e0   : > { %v6021_v18 = vmul.f32 %v6946_v15, %v6013_v21 }
0x26e2   : > { %v6029_v19 = vadd.f32 %v6947_v1, %v6021_v18 }
0x26e4   : > { %v6030_v22 = vpack.c.bf16 %v6029_v19, %v6028_v14 }
0x26e6   : > { %8039 = vmatmul.mubr.bf16.vlgmr.msra.gmra.mxu0 %v6030_v22 }
0x27a6   : > { %v6136_v24 = vpop.f32.mrf.mxu0 }
0x27a7   : > { %v6137_v25 = vadd.f32 %v6948_v20, %v6136_v24 }
0x27a8   : > { %v8040_v58 = vpop.f32.mrf.mxu0 }
0x27a9   : > { %6143 = vst [vmem:[%s629_s4] sm:$0xff] %v6137_v25 }
0x27aa   : > { %v6139_v62 = vpop.f32.mrf.mxu0 }
0x27ab   : > { %v6140_v26 = vadd.f32 %v6948_v20, %v6139_v62 }
0x27ac   : > { %v8041_v27 = vpop.f32.mrf.mxu0 }
0x27ad   : > { %6144 = vst [vmem:[%s629_s4 + $0x8] sm:$0x3] %v6140_v26 }
0x27ae PF: > { %s9934_s30 = sld [smem:[#allocation2_spill]] }
0x27b4   : > { %s30_s1 = sadd.s32 1, %s9934_s30  }
0x27b5   : > { %p27_p4 = scmp.ge.s32.totalorder %s30_s1, 4  }
0x27b7   :  { %29 = sbr.rel (!%p27_p4) target bundleno = 6 (0x6), region = 182 }

</bundles_post_ra>
